<compile_context>
chip_gen: v5e
topology: v5e:2x2
jax: 0.10.0
libtpu: 0.0.40
codegen_flags: <defaults>
</compile_context>

<pallas_src>
import jax
import jax.numpy as jnp
from jax.experimental import pallas as pl
from jax.experimental.pallas import tpu as pltpu


# ----------------------------------------------------------------------------
# Fused kernel factory: all GRU layers + final FC in one pallas_call.
# ----------------------------------------------------------------------------
def _make_fused_gru_kernel(num_layers):
    """Ref layout (in order):
      inputs : gi0 (T,B,3Hp),
               whh_0 (Hp,3Hp), bhh_0 (1,3Hp),
               [wih_l (Hp,3Hp), bih_l (1,3Hp), whh_l (Hp,3Hp), bhh_l (1,3Hp)]
                   for l in 1..num_layers-1,
               fc_w (Hp,O), fc_b (1,O)
      outputs: out (B,O)
      scratch: seq_scr (T,B,Hp), gi_scr (T,B,3Hp)
    """
    n_in = 3 + 4 * (num_layers - 1) + 2

    def kernel(*refs):
        in_refs = refs[:n_in]
        out_ref = refs[n_in]
        seq_scr = refs[n_in + 1]
        gi_scr = refs[n_in + 2]

        gi0_ref = in_refs[0]
        T, B, G3 = gi0_ref.shape
        Hp = G3 // 3
        fc_w_ref, fc_b_ref = in_refs[n_in - 2], in_refs[n_in - 1]

        def gru_cell(gi_t, h_prev, whh, bhh):
            # Single MXU matmul per recurrent step (input projection and b_ih
            # are already folded into gi_t).  Gate slices are 128-lane aligned.
            gh = jnp.dot(h_prev, whh, preferred_element_type=jnp.float32) + bhh
            r = jax.nn.sigmoid(gi_t[:, 0:Hp] + gh[:, 0:Hp])
            z = jax.nn.sigmoid(gi_t[:, Hp:2 * Hp] + gh[:, Hp:2 * Hp])
            n = jnp.tanh(gi_t[:, 2 * Hp:] + r * gh[:, 2 * Hp:])
            return (1.0 - z) * n + z * h_prev

        # ------------------ layer 0: recurrence only ------------------------
        whh0 = in_refs[1][...]
        bhh0 = in_refs[2][...]

        def body0(t, h):
            h_new = gru_cell(gi0_ref[t], h, whh0, bhh0)
            if num_layers > 1:
                seq_scr[t] = h_new        # inter-layer activation, VMEM-resident
            return h_new

        h = jax.lax.fori_loop(0, T, body0, jnp.zeros((B, Hp), jnp.float32),
                              unroll=True)

        # ------------------ layers 1 .. L-1 ----------------------------------
        for l in range(1, num_layers):
            base = 3 + 4 * (l - 1)
            wih = in_refs[base + 0][...]
            bih = in_refs[base + 1][...]
            whh = in_refs[base + 2][...]
            bhh = in_refs[base + 3][...]

            # Hoisted input projection for ALL timesteps: no serial dependency,
            # so it stays off the recurrence's critical path.
            for t in range(T):            # static unroll (T is small & static)
                gi_scr[t] = (
                    jnp.dot(seq_scr[t], wih, preferred_element_type=jnp.float32)
                    + bih)

            last = (l == num_layers - 1)

            def body_l(t, h, _whh=whh, _bhh=bhh, _last=last):
                h_new = gru_cell(gi_scr[t], h, _whh, _bhh)
                if not _last:
                    seq_scr[t] = h_new
                return h_new

            h = jax.lax.fori_loop(0, T, body_l, jnp.zeros((B, Hp), jnp.float32),
                                  unroll=True)

        # ------------------ final Linear on last timestep --------------------
        out_ref[...] = (
            jnp.dot(h, fc_w_ref[...], preferred_element_type=jnp.float32)
            + fc_b_ref[...])

    return kernel


# ----------------------------------------------------------------------------
# Padding helpers (lane-dense hidden size, exact zero padding).
# ----------------------------------------------------------------------------
def _round_up(x, m):
    return ((x + m - 1) // m) * m


def _pad_gate_cols(w, H, Hp):
    """(rows, 3H) -> (rows, 3Hp): pad each gate block [r|z|n] to Hp columns."""
    rows = w.shape[0]
    w3 = w.reshape(rows, 3, H)
    w3 = jnp.pad(w3, ((0, 0), (0, 0), (0, Hp - H)))
    return w3.reshape(rows, 3 * Hp)


def _pad_rows(w, H, Hp):
    """(H, cols) -> (Hp, cols) with zero rows."""
    return jnp.pad(w, ((0, Hp - H), (0, 0)))


# ----------------------------------------------------------------------------
# Full GRUModel forward.
# ----------------------------------------------------------------------------
def init_params(key, num_layers, in_sz, hidden_sz, out_sz):
    """Deterministic synthetic parameters, same shapes as torch.nn.GRU / Linear
    (weights stored pre-transposed: (D_in, 3H) / (H, 3H), gate order [r|z|n])."""
    params = {"gru_layers": []}
    bound = 1.0 / jnp.sqrt(hidden_sz)
    for layer in range(num_layers):
        d_in = in_sz if layer == 0 else hidden_sz
        key, k1, k2, k3, k4 = jax.random.split(key, 5)
        w_ih_t = jax.random.uniform(k1, (d_in, 3 * hidden_sz), jnp.float32, -bound, bound)
        w_hh_t = jax.random.uniform(k2, (hidden_sz, 3 * hidden_sz), jnp.float32, -bound, bound)
        b_ih = jax.random.uniform(k3, (1, 3 * hidden_sz), jnp.float32, -bound, bound)
        b_hh = jax.random.uniform(k4, (1, 3 * hidden_sz), jnp.float32, -bound, bound)
        params["gru_layers"].append((w_ih_t, w_hh_t, b_ih, b_hh))
    key, k1, k2 = jax.random.split(key, 3)
    fc_bound = 1.0 / jnp.sqrt(hidden_sz)
    params["fc_w_t"] = jax.random.uniform(k1, (hidden_sz, out_sz), jnp.float32, -fc_bound, fc_bound)
    params["fc_b"] = jax.random.uniform(k2, (1, out_sz), jnp.float32, -fc_bound, fc_bound)
    return params


@jax.jit
def gru_model_forward(x_btd, params):
    """x_btd: (B, T, in_sz) batch-first, like the PyTorch module. Returns (B, out_sz)."""
    layers = params["gru_layers"]
    num_layers = len(layers)
    H = layers[0][1].shape[0]                 # w_hh_t: (H, 3H)
    Hp = _round_up(H, 128)                    # lane-dense hidden size
    out_sz = params["fc_w_t"].shape[1]

    x = jnp.transpose(x_btd, (1, 0, 2)).astype(jnp.float32)   # (T, B, D) time-major
    T, B, _ = x.shape

    # Hoisted layer-0 input projection: one batched matmul over all timesteps,
    # fully parallel over T, so it is left to XLA outside the serial kernel.
    w_ih0_t, w_hh0_t, b_ih0, b_hh0 = layers[0]
    gi0 = (jnp.einsum("tbd,dg->tbg", x, _pad_gate_cols(w_ih0_t, H, Hp))
           + _pad_gate_cols(b_ih0, H, Hp))                    # (T, B, 3Hp)

    inputs = [gi0,
              _pad_gate_cols(_pad_rows(w_hh0_t, H, Hp), H, Hp),
              _pad_gate_cols(b_hh0, H, Hp)]
    for (w_ih_t, w_hh_t, b_ih, b_hh) in layers[1:]:
        inputs += [_pad_gate_cols(_pad_rows(w_ih_t, H, Hp), H, Hp),
                   _pad_gate_cols(b_ih, H, Hp),
                   _pad_gate_cols(_pad_rows(w_hh_t, H, Hp), H, Hp),
                   _pad_gate_cols(b_hh, H, Hp)]
    inputs += [_pad_rows(params["fc_w_t"], H, Hp), params["fc_b"]]

    return pl.pallas_call(
        _make_fused_gru_kernel(num_layers),
        out_shape=jax.ShapeDtypeStruct((B, out_sz), jnp.float32),
        # Whole problem (< 2 MiB of weights + activations) lives in VMEM: no
        # grid, no per-timestep pipelining, a single kernel launch.
        scratch_shapes=[
            pltpu.VMEM((T, B, Hp), jnp.float32),        # inter-layer h sequence
            pltpu.VMEM((T, B, 3 * Hp), jnp.float32),    # precomputed gate inputs
        ],
    )(*inputs)


# ----------------------------------------------------------------------------
# Pure-JAX reference (same math, unpadded) for a correctness check.
# ----------------------------------------------------------------------------
def gru_model_reference(x_btd, params):
    x = jnp.transpose(x_btd, (1, 0, 2)).astype(jnp.float32)   # (T, B, D)
    for (w_ih_t, w_hh_t, b_ih, b_hh) in params["gru_layers"]:
        H = w_hh_t.shape[0]
        T, B, _ = x.shape
        h = jnp.zeros((B, H), jnp.float32)
        outs = []
        for t in range(T):
            gi = x[t] @ w_ih_t + b_ih
            gh = h @ w_hh_t + b_hh
            r = jax.nn.sigmoid(gi[:, :H] + gh[:, :H])
            z = jax.nn.sigmoid(gi[:, H:2 * H] + gh[:, H:2 * H])
            n = jnp.tanh(gi[:, 2 * H:] + r * gh[:, 2 * H:])
            h = (1.0 - z) * n + z * h
            outs.append(h)
        x = jnp.stack(outs, axis=0)
    return x[-1] @ params["fc_w_t"] + params["fc_b"]


if __name__ == "__main__":
    # Small shapes consistent with the module's forward: (batch, seq, features).
    B, T, IN_SZ, HID_SZ, OUT_SZ, NUM_LAYERS = 2, 8, 16, 32, 4, 2

    key = jax.random.PRNGKey(0)
    key, kx, kp = jax.random.split(key, 3)
    x = jax.random.normal(kx, (B, T, IN_SZ), jnp.float32)
    params = init_params(kp, NUM_LAYERS, IN_SZ, HID_SZ, OUT_SZ)

    out = gru_model_forward(x, params)
    out = jax.block_until_ready(out)
    assert out.shape == (B, OUT_SZ), out.shape

    ref = gru_model_reference(x, params)
    assert jnp.allclose(out, ref, atol=1e-4, rtol=1e-4), (out, ref)

    print("KERNEL_OK")
</pallas_src>

<mosaic_0001>
module attributes {stable_mosaic.version = 11 : i64} {
  func.func @kernel(%arg0: memref<8x2x384xf32, #tpu.memory_space<vmem>>, %arg1: memref<128x384xf32, #tpu.memory_space<vmem>>, %arg2: memref<1x384xf32, #tpu.memory_space<vmem>>, %arg3: memref<128x384xf32, #tpu.memory_space<vmem>>, %arg4: memref<1x384xf32, #tpu.memory_space<vmem>>, %arg5: memref<128x384xf32, #tpu.memory_space<vmem>>, %arg6: memref<1x384xf32, #tpu.memory_space<vmem>>, %arg7: memref<128x4xf32, #tpu.memory_space<vmem>>, %arg8: memref<1x4xf32, #tpu.memory_space<vmem>>, %arg9: memref<2x4xf32, #tpu.memory_space<vmem>>, %arg10: memref<8x2x128xf32, #tpu.memory_space<vmem>>, %arg11: memref<8x2x384xf32, #tpu.memory_space<vmem>>) attributes {dimension_semantics = [], scalar_prefetch = 0 : i64, scratch_operands = 2 : i64, tpu.core_type = #tpu.core_type<tc>} {
    %c0 = arith.constant 0 : index
    %c0_0 = arith.constant 0 : index
    %0 = vector.load %arg1[%c0, %c0_0] : memref<128x384xf32, #tpu.memory_space<vmem>>, vector<128x384xf32>
    %c0_1 = arith.constant 0 : index
    %c0_2 = arith.constant 0 : index
    %1 = vector.load %arg2[%c0_1, %c0_2] : memref<1x384xf32, #tpu.memory_space<vmem>>, vector<1x384xf32>
    %cst = arith.constant 0.000000e+00 : f32
    %2 = vector.broadcast %cst : f32 to vector<2x128xf32>
    %c0_i32 = arith.constant 0 : i32
    %3 = arith.index_cast %c0_i32 : i32 to index
    %c0_3 = arith.constant 0 : index
    %c0_4 = arith.constant 0 : index
    %4 = vector.load %arg0[%3, %c0_3, %c0_4] : memref<8x2x384xf32, #tpu.memory_space<vmem>>, vector<1x2x384xf32>
    %5 = vector.shape_cast %4 : vector<1x2x384xf32> to vector<2x384xf32>
    %cst_5 = arith.constant dense<0.000000e+00> : vector<2x384xf32>
    %6 = tpu.matmul %2, %0, %cst_5 {dimension_numbers = #tpu.dot_dimension_numbers<[1], [0], [0], [1], [0, 0, 1, 1], [], []>} : vector<2x128xf32>, vector<128x384xf32>, vector<2x384xf32> -> vector<2x384xf32>
    %7 = vector.broadcast %1 : vector<1x384xf32> to vector<2x384xf32>
    %8 = arith.addf %6, %7 : vector<2x384xf32>
    %9 = vector.extract_strided_slice %5 {offsets = [0, 0], sizes = [2, 128], strides = [1, 1]} : vector<2x384xf32> to vector<2x128xf32>
    %10 = vector.extract_strided_slice %8 {offsets = [0, 0], sizes = [2, 128], strides = [1, 1]} : vector<2x384xf32> to vector<2x128xf32>
    %11 = arith.addf %9, %10 : vector<2x128xf32>
    %12 = arith.negf %11 : vector<2x128xf32>
    %13 = math.exp %12 : vector<2x128xf32>
    %cst_6 = arith.constant 1.000000e+00 : f32
    %14 = vector.broadcast %cst_6 : f32 to vector<2x128xf32>
    %15 = arith.addf %14, %13 : vector<2x128xf32>
    %16 = arith.divf %14, %15 : vector<2x128xf32>
    %17 = vector.extract_strided_slice %5 {offsets = [0, 128], sizes = [2, 128], strides = [1, 1]} : vector<2x384xf32> to vector<2x128xf32>
    %18 = vector.extract_strided_slice %8 {offsets = [0, 128], sizes = [2, 128], strides = [1, 1]} : vector<2x384xf32> to vector<2x128xf32>
    %19 = arith.addf %17, %18 : vector<2x128xf32>
    %20 = arith.negf %19 : vector<2x128xf32>
    %21 = math.exp %20 : vector<2x128xf32>
    %cst_7 = arith.constant 1.000000e+00 : f32
    %22 = vector.broadcast %cst_7 : f32 to vector<2x128xf32>
    %23 = arith.addf %22, %21 : vector<2x128xf32>
    %24 = arith.divf %22, %23 : vector<2x128xf32>
    %25 = vector.extract_strided_slice %5 {offsets = [0, 256], sizes = [2, 128], strides = [1, 1]} : vector<2x384xf32> to vector<2x128xf32>
    %26 = vector.extract_strided_slice %8 {offsets = [0, 256], sizes = [2, 128], strides = [1, 1]} : vector<2x384xf32> to vector<2x128xf32>
    %27 = arith.mulf %16, %26 : vector<2x128xf32>
    %28 = arith.addf %25, %27 : vector<2x128xf32>
    %29 = math.tanh %28 : vector<2x128xf32>
    %cst_8 = arith.constant 1.000000e+00 : f32
    %30 = vector.broadcast %cst_8 : f32 to vector<2x128xf32>
    %31 = arith.subf %30, %24 : vector<2x128xf32>
    %32 = arith.mulf %31, %29 : vector<2x128xf32>
    %33 = arith.mulf %24, %2 : vector<2x128xf32>
    %34 = arith.addf %32, %33 : vector<2x128xf32>
    %35 = arith.index_cast %c0_i32 : i32 to index
    %c0_9 = arith.constant 0 : index
    %c0_10 = arith.constant 0 : index
    %36 = vector.load %arg10[%35, %c0_9, %c0_10] : memref<8x2x128xf32, #tpu.memory_space<vmem>>, vector<1x2x128xf32>
    %37 = vector.shape_cast %36 : vector<1x2x128xf32> to vector<2x128xf32>
    %38 = vector.shape_cast %34 : vector<2x128xf32> to vector<1x2x128xf32>
    tpu.vector_store %arg10[%35, %c0_9, %c0_10], %38 {strides = array<i32>} : memref<8x2x128xf32, #tpu.memory_space<vmem>>, vector<1x2x128xf32>,
    %c1_i32 = arith.constant 1 : i32
    %39 = arith.index_cast %c1_i32 : i32 to index
    %c0_11 = arith.constant 0 : index
    %c0_12 = arith.constant 0 : index
    %40 = vector.load %arg0[%39, %c0_11, %c0_12] : memref<8x2x384xf32, #tpu.memory_space<vmem>>, vector<1x2x384xf32>
    %41 = vector.shape_cast %40 : vector<1x2x384xf32> to vector<2x384xf32>
    %cst_13 = arith.constant dense<0.000000e+00> : vector<2x384xf32>
    %42 = tpu.matmul %34, %0, %cst_13 {dimension_numbers = #tpu.dot_dimension_numbers<[1], [0], [0], [1], [0, 0, 1, 1], [], []>} : vector<2x128xf32>, vector<128x384xf32>, vector<2x384xf32> -> vector<2x384xf32>
    %43 = vector.broadcast %1 : vector<1x384xf32> to vector<2x384xf32>
    %44 = arith.addf %42, %43 : vector<2x384xf32>
    %45 = vector.extract_strided_slice %41 {offsets = [0, 0], sizes = [2, 128], strides = [1, 1]} : vector<2x384xf32> to vector<2x128xf32>
    %46 = vector.extract_strided_slice %44 {offsets = [0, 0], sizes = [2, 128], strides = [1, 1]} : vector<2x384xf32> to vector<2x128xf32>
    %47 = arith.addf %45, %46 : vector<2x128xf32>
    %48 = arith.negf %47 : vector<2x128xf32>
    %49 = math.exp %48 : vector<2x128xf32>
    %cst_14 = arith.constant 1.000000e+00 : f32
    %50 = vector.broadcast %cst_14 : f32 to vector<2x128xf32>
    %51 = arith.addf %50, %49 : vector<2x128xf32>
    %52 = arith.divf %50, %51 : vector<2x128xf32>
    %53 = vector.extract_strided_slice %41 {offsets = [0, 128], sizes = [2, 128], strides = [1, 1]} : vector<2x384xf32> to vector<2x128xf32>
    %54 = vector.extract_strided_slice %44 {offsets = [0, 128], sizes = [2, 128], strides = [1, 1]} : vector<2x384xf32> to vector<2x128xf32>
    %55 = arith.addf %53, %54 : vector<2x128xf32>
    %56 = arith.negf %55 : vector<2x128xf32>
    %57 = math.exp %56 : vector<2x128xf32>
    %cst_15 = arith.constant 1.000000e+00 : f32
    %58 = vector.broadcast %cst_15 : f32 to vector<2x128xf32>
    %59 = arith.addf %58, %57 : vector<2x128xf32>
    %60 = arith.divf %58, %59 : vector<2x128xf32>
    %61 = vector.extract_strided_slice %41 {offsets = [0, 256], sizes = [2, 128], strides = [1, 1]} : vector<2x384xf32> to vector<2x128xf32>
    %62 = vector.extract_strided_slice %44 {offsets = [0, 256], sizes = [2, 128], strides = [1, 1]} : vector<2x384xf32> to vector<2x128xf32>
    %63 = arith.mulf %52, %62 : vector<2x128xf32>
    %64 = arith.addf %61, %63 : vector<2x128xf32>
    %65 = math.tanh %64 : vector<2x128xf32>
    %cst_16 = arith.constant 1.000000e+00 : f32
    %66 = vector.broadcast %cst_16 : f32 to vector<2x128xf32>
    %67 = arith.subf %66, %60 : vector<2x128xf32>
    %68 = arith.mulf %67, %65 : vector<2x128xf32>
    %69 = arith.mulf %60, %34 : vector<2x128xf32>
    %70 = arith.addf %68, %69 : vector<2x128xf32>
    %71 = arith.index_cast %c1_i32 : i32 to index
    %c0_17 = arith.constant 0 : index
    %c0_18 = arith.constant 0 : index
    %72 = vector.load %arg10[%71, %c0_17, %c0_18] : memref<8x2x128xf32, #tpu.memory_space<vmem>>, vector<1x2x128xf32>
    %73 = vector.shape_cast %72 : vector<1x2x128xf32> to vector<2x128xf32>
    %74 = vector.shape_cast %70 : vector<2x128xf32> to vector<1x2x128xf32>
    tpu.vector_store %arg10[%71, %c0_17, %c0_18], %74 {strides = array<i32>} : memref<8x2x128xf32, #tpu.memory_space<vmem>>, vector<1x2x128xf32>,
    %c2_i32 = arith.constant 2 : i32
    %75 = arith.index_cast %c2_i32 : i32 to index
    %c0_19 = arith.constant 0 : index
    %c0_20 = arith.constant 0 : index
    %76 = vector.load %arg0[%75, %c0_19, %c0_20] : memref<8x2x384xf32, #tpu.memory_space<vmem>>, vector<1x2x384xf32>
    %77 = vector.shape_cast %76 : vector<1x2x384xf32> to vector<2x384xf32>
    %cst_21 = arith.constant dense<0.000000e+00> : vector<2x384xf32>
    %78 = tpu.matmul %70, %0, %cst_21 {dimension_numbers = #tpu.dot_dimension_numbers<[1], [0], [0], [1], [0, 0, 1, 1], [], []>} : vector<2x128xf32>, vector<128x384xf32>, vector<2x384xf32> -> vector<2x384xf32>
    %79 = vector.broadcast %1 : vector<1x384xf32> to vector<2x384xf32>
    %80 = arith.addf %78, %79 : vector<2x384xf32>
    %81 = vector.extract_strided_slice %77 {offsets = [0, 0], sizes = [2, 128], strides = [1, 1]} : vector<2x384xf32> to vector<2x128xf32>
    %82 = vector.extract_strided_slice %80 {offsets = [0, 0], sizes = [2, 128], strides = [1, 1]} : vector<2x384xf32> to vector<2x128xf32>
    %83 = arith.addf %81, %82 : vector<2x128xf32>
    %84 = arith.negf %83 : vector<2x128xf32>
    %85 = math.exp %84 : vector<2x128xf32>
    %cst_22 = arith.constant 1.000000e+00 : f32
    %86 = vector.broadcast %cst_22 : f32 to vector<2x128xf32>
    %87 = arith.addf %86, %85 : vector<2x128xf32>
    %88 = arith.divf %86, %87 : vector<2x128xf32>
    %89 = vector.extract_strided_slice %77 {offsets = [0, 128], sizes = [2, 128], strides = [1, 1]} : vector<2x384xf32> to vector<2x128xf32>
    %90 = vector.extract_strided_slice %80 {offsets = [0, 128], sizes = [2, 128], strides = [1, 1]} : vector<2x384xf32> to vector<2x128xf32>
    %91 = arith.addf %89, %90 : vector<2x128xf32>
    %92 = arith.negf %91 : vector<2x128xf32>
    %93 = math.exp %92 : vector<2x128xf32>
    %cst_23 = arith.constant 1.000000e+00 : f32
    %94 = vector.broadcast %cst_23 : f32 to vector<2x128xf32>
    %95 = arith.addf %94, %93 : vector<2x128xf32>
    %96 = arith.divf %94, %95 : vector<2x128xf32>
    %97 = vector.extract_strided_slice %77 {offsets = [0, 256], sizes = [2, 128], strides = [1, 1]} : vector<2x384xf32> to vector<2x128xf32>
    %98 = vector.extract_strided_slice %80 {offsets = [0, 256], sizes = [2, 128], strides = [1, 1]} : vector<2x384xf32> to vector<2x128xf32>
    %99 = arith.mulf %88, %98 : vector<2x128xf32>
    %100 = arith.addf %97, %99 : vector<2x128xf32>
    %101 = math.tanh %100 : vector<2x128xf32>
    %cst_24 = arith.constant 1.000000e+00 : f32
    %102 = vector.broadcast %cst_24 : f32 to vector<2x128xf32>
    %103 = arith.subf %102, %96 : vector<2x128xf32>
    %104 = arith.mulf %103, %101 : vector<2x128xf32>
    %105 = arith.mulf %96, %70 : vector<2x128xf32>
    %106 = arith.addf %104, %105 : vector<2x128xf32>
    %107 = arith.index_cast %c2_i32 : i32 to index
    %c0_25 = arith.constant 0 : index
    %c0_26 = arith.constant 0 : index
    %108 = vector.load %arg10[%107, %c0_25, %c0_26] : memref<8x2x128xf32, #tpu.memory_space<vmem>>, vector<1x2x128xf32>
    %109 = vector.shape_cast %108 : vector<1x2x128xf32> to vector<2x128xf32>
    %110 = vector.shape_cast %106 : vector<2x128xf32> to vector<1x2x128xf32>
    tpu.vector_store %arg10[%107, %c0_25, %c0_26], %110 {strides = array<i32>} : memref<8x2x128xf32, #tpu.memory_space<vmem>>, vector<1x2x128xf32>,
    %c3_i32 = arith.constant 3 : i32
    %111 = arith.index_cast %c3_i32 : i32 to index
    %c0_27 = arith.constant 0 : index
    %c0_28 = arith.constant 0 : index
    %112 = vector.load %arg0[%111, %c0_27, %c0_28] : memref<8x2x384xf32, #tpu.memory_space<vmem>>, vector<1x2x384xf32>
    %113 = vector.shape_cast %112 : vector<1x2x384xf32> to vector<2x384xf32>
    %cst_29 = arith.constant dense<0.000000e+00> : vector<2x384xf32>
    %114 = tpu.matmul %106, %0, %cst_29 {dimension_numbers = #tpu.dot_dimension_numbers<[1], [0], [0], [1], [0, 0, 1, 1], [], []>} : vector<2x128xf32>, vector<128x384xf32>, vector<2x384xf32> -> vector<2x384xf32>
    %115 = vector.broadcast %1 : vector<1x384xf32> to vector<2x384xf32>
    %116 = arith.addf %114, %115 : vector<2x384xf32>
    %117 = vector.extract_strided_slice %113 {offsets = [0, 0], sizes = [2, 128], strides = [1, 1]} : vector<2x384xf32> to vector<2x128xf32>
    %118 = vector.extract_strided_slice %116 {offsets = [0, 0], sizes = [2, 128], strides = [1, 1]} : vector<2x384xf32> to vector<2x128xf32>
    %119 = arith.addf %117, %118 : vector<2x128xf32>
    %120 = arith.negf %119 : vector<2x128xf32>
    %121 = math.exp %120 : vector<2x128xf32>
    %cst_30 = arith.constant 1.000000e+00 : f32
    %122 = vector.broadcast %cst_30 : f32 to vector<2x128xf32>
    %123 = arith.addf %122, %121 : vector<2x128xf32>
    %124 = arith.divf %122, %123 : vector<2x128xf32>
    %125 = vector.extract_strided_slice %113 {offsets = [0, 128], sizes = [2, 128], strides = [1, 1]} : vector<2x384xf32> to vector<2x128xf32>
    %126 = vector.extract_strided_slice %116 {offsets = [0, 128], sizes = [2, 128], strides = [1, 1]} : vector<2x384xf32> to vector<2x128xf32>
    %127 = arith.addf %125, %126 : vector<2x128xf32>
    %128 = arith.negf %127 : vector<2x128xf32>
    %129 = math.exp %128 : vector<2x128xf32>
    %cst_31 = arith.constant 1.000000e+00 : f32
    %130 = vector.broadcast %cst_31 : f32 to vector<2x128xf32>
    %131 = arith.addf %130, %129 : vector<2x128xf32>
    %132 = arith.divf %130, %131 : vector<2x128xf32>
    %133 = vector.extract_strided_slice %113 {offsets = [0, 256], sizes = [2, 128], strides = [1, 1]} : vector<2x384xf32> to vector<2x128xf32>
    %134 = vector.extract_strided_slice %116 {offsets = [0, 256], sizes = [2, 128], strides = [1, 1]} : vector<2x384xf32> to vector<2x128xf32>
    %135 = arith.mulf %124, %134 : vector<2x128xf32>
    %136 = arith.addf %133, %135 : vector<2x128xf32>
    %137 = math.tanh %136 : vector<2x128xf32>
    %cst_32 = arith.constant 1.000000e+00 : f32
    %138 = vector.broadcast %cst_32 : f32 to vector<2x128xf32>
    %139 = arith.subf %138, %132 : vector<2x128xf32>
    %140 = arith.mulf %139, %137 : vector<2x128xf32>
    %141 = arith.mulf %132, %106 : vector<2x128xf32>
    %142 = arith.addf %140, %141 : vector<2x128xf32>
    %143 = arith.index_cast %c3_i32 : i32 to index
    %c0_33 = arith.constant 0 : index
    %c0_34 = arith.constant 0 : index
    %144 = vector.load %arg10[%143, %c0_33, %c0_34] : memref<8x2x128xf32, #tpu.memory_space<vmem>>, vector<1x2x128xf32>
    %145 = vector.shape_cast %144 : vector<1x2x128xf32> to vector<2x128xf32>
    %146 = vector.shape_cast %142 : vector<2x128xf32> to vector<1x2x128xf32>
    tpu.vector_store %arg10[%143, %c0_33, %c0_34], %146 {strides = array<i32>} : memref<8x2x128xf32, #tpu.memory_space<vmem>>, vector<1x2x128xf32>,
    %c4_i32 = arith.constant 4 : i32
    %147 = arith.index_cast %c4_i32 : i32 to index
    %c0_35 = arith.constant 0 : index
    %c0_36 = arith.constant 0 : index
    %148 = vector.load %arg0[%147, %c0_35, %c0_36] : memref<8x2x384xf32, #tpu.memory_space<vmem>>, vector<1x2x384xf32>
    %149 = vector.shape_cast %148 : vector<1x2x384xf32> to vector<2x384xf32>
    %cst_37 = arith.constant dense<0.000000e+00> : vector<2x384xf32>
    %150 = tpu.matmul %142, %0, %cst_37 {dimension_numbers = #tpu.dot_dimension_numbers<[1], [0], [0], [1], [0, 0, 1, 1], [], []>} : vector<2x128xf32>, vector<128x384xf32>, vector<2x384xf32> -> vector<2x384xf32>
    %151 = vector.broadcast %1 : vector<1x384xf32> to vector<2x384xf32>
    %152 = arith.addf %150, %151 : vector<2x384xf32>
    %153 = vector.extract_strided_slice %149 {offsets = [0, 0], sizes = [2, 128], strides = [1, 1]} : vector<2x384xf32> to vector<2x128xf32>
    %154 = vector.extract_strided_slice %152 {offsets = [0, 0], sizes = [2, 128], strides = [1, 1]} : vector<2x384xf32> to vector<2x128xf32>
    %155 = arith.addf %153, %154 : vector<2x128xf32>
    %156 = arith.negf %155 : vector<2x128xf32>
    %157 = math.exp %156 : vector<2x128xf32>
    %cst_38 = arith.constant 1.000000e+00 : f32
    %158 = vector.broadcast %cst_38 : f32 to vector<2x128xf32>
    %159 = arith.addf %158, %157 : vector<2x128xf32>
    %160 = arith.divf %158, %159 : vector<2x128xf32>
    %161 = vector.extract_strided_slice %149 {offsets = [0, 128], sizes = [2, 128], strides = [1, 1]} : vector<2x384xf32> to vector<2x128xf32>
    %162 = vector.extract_strided_slice %152 {offsets = [0, 128], sizes = [2, 128], strides = [1, 1]} : vector<2x384xf32> to vector<2x128xf32>
    %163 = arith.addf %161, %162 : vector<2x128xf32>
    %164 = arith.negf %163 : vector<2x128xf32>
    %165 = math.exp %164 : vector<2x128xf32>
    %cst_39 = arith.constant 1.000000e+00 : f32
    %166 = vector.broadcast %cst_39 : f32 to vector<2x128xf32>
    %167 = arith.addf %166, %165 : vector<2x128xf32>
    %168 = arith.divf %166, %167 : vector<2x128xf32>
    %169 = vector.extract_strided_slice %149 {offsets = [0, 256], sizes = [2, 128], strides = [1, 1]} : vector<2x384xf32> to vector<2x128xf32>
    %170 = vector.extract_strided_slice %152 {offsets = [0, 256], sizes = [2, 128], strides = [1, 1]} : vector<2x384xf32> to vector<2x128xf32>
    %171 = arith.mulf %160, %170 : vector<2x128xf32>
    %172 = arith.addf %169, %171 : vector<2x128xf32>
    %173 = math.tanh %172 : vector<2x128xf32>
    %cst_40 = arith.constant 1.000000e+00 : f32
    %174 = vector.broadcast %cst_40 : f32 to vector<2x128xf32>
    %175 = arith.subf %174, %168 : vector<2x128xf32>
    %176 = arith.mulf %175, %173 : vector<2x128xf32>
    %177 = arith.mulf %168, %142 : vector<2x128xf32>
    %178 = arith.addf %176, %177 : vector<2x128xf32>
    %179 = arith.index_cast %c4_i32 : i32 to index
    %c0_41 = arith.constant 0 : index
    %c0_42 = arith.constant 0 : index
    %180 = vector.load %arg10[%179, %c0_41, %c0_42] : memref<8x2x128xf32, #tpu.memory_space<vmem>>, vector<1x2x128xf32>
    %181 = vector.shape_cast %180 : vector<1x2x128xf32> to vector<2x128xf32>
    %182 = vector.shape_cast %178 : vector<2x128xf32> to vector<1x2x128xf32>
    tpu.vector_store %arg10[%179, %c0_41, %c0_42], %182 {strides = array<i32>} : memref<8x2x128xf32, #tpu.memory_space<vmem>>, vector<1x2x128xf32>,
    %c5_i32 = arith.constant 5 : i32
    %183 = arith.index_cast %c5_i32 : i32 to index
    %c0_43 = arith.constant 0 : index
    %c0_44 = arith.constant 0 : index
    %184 = vector.load %arg0[%183, %c0_43, %c0_44] : memref<8x2x384xf32, #tpu.memory_space<vmem>>, vector<1x2x384xf32>
    %185 = vector.shape_cast %184 : vector<1x2x384xf32> to vector<2x384xf32>
    %cst_45 = arith.constant dense<0.000000e+00> : vector<2x384xf32>
    %186 = tpu.matmul %178, %0, %cst_45 {dimension_numbers = #tpu.dot_dimension_numbers<[1], [0], [0], [1], [0, 0, 1, 1], [], []>} : vector<2x128xf32>, vector<128x384xf32>, vector<2x384xf32> -> vector<2x384xf32>
    %187 = vector.broadcast %1 : vector<1x384xf32> to vector<2x384xf32>
    %188 = arith.addf %186, %187 : vector<2x384xf32>
    %189 = vector.extract_strided_slice %185 {offsets = [0, 0], sizes = [2, 128], strides = [1, 1]} : vector<2x384xf32> to vector<2x128xf32>
    %190 = vector.extract_strided_slice %188 {offsets = [0, 0], sizes = [2, 128], strides = [1, 1]} : vector<2x384xf32> to vector<2x128xf32>
    %191 = arith.addf %189, %190 : vector<2x128xf32>
    %192 = arith.negf %191 : vector<2x128xf32>
    %193 = math.exp %192 : vector<2x128xf32>
    %cst_46 = arith.constant 1.000000e+00 : f32
    %194 = vector.broadcast %cst_46 : f32 to vector<2x128xf32>
    %195 = arith.addf %194, %193 : vector<2x128xf32>
    %196 = arith.divf %194, %195 : vector<2x128xf32>
    %197 = vector.extract_strided_slice %185 {offsets = [0, 128], sizes = [2, 128], strides = [1, 1]} : vector<2x384xf32> to vector<2x128xf32>
    %198 = vector.extract_strided_slice %188 {offsets = [0, 128], sizes = [2, 128], strides = [1, 1]} : vector<2x384xf32> to vector<2x128xf32>
    %199 = arith.addf %197, %198 : vector<2x128xf32>
    %200 = arith.negf %199 : vector<2x128xf32>
    %201 = math.exp %200 : vector<2x128xf32>
    %cst_47 = arith.constant 1.000000e+00 : f32
    %202 = vector.broadcast %cst_47 : f32 to vector<2x128xf32>
    %203 = arith.addf %202, %201 : vector<2x128xf32>
    %204 = arith.divf %202, %203 : vector<2x128xf32>
    %205 = vector.extract_strided_slice %185 {offsets = [0, 256], sizes = [2, 128], strides = [1, 1]} : vector<2x384xf32> to vector<2x128xf32>
    %206 = vector.extract_strided_slice %188 {offsets = [0, 256], sizes = [2, 128], strides = [1, 1]} : vector<2x384xf32> to vector<2x128xf32>
    %207 = arith.mulf %196, %206 : vector<2x128xf32>
    %208 = arith.addf %205, %207 : vector<2x128xf32>
    %209 = math.tanh %208 : vector<2x128xf32>
    %cst_48 = arith.constant 1.000000e+00 : f32
    %210 = vector.broadcast %cst_48 : f32 to vector<2x128xf32>
    %211 = arith.subf %210, %204 : vector<2x128xf32>
    %212 = arith.mulf %211, %209 : vector<2x128xf32>
    %213 = arith.mulf %204, %178 : vector<2x128xf32>
    %214 = arith.addf %212, %213 : vector<2x128xf32>
    %215 = arith.index_cast %c5_i32 : i32 to index
    %c0_49 = arith.constant 0 : index
    %c0_50 = arith.constant 0 : index
    %216 = vector.load %arg10[%215, %c0_49, %c0_50] : memref<8x2x128xf32, #tpu.memory_space<vmem>>, vector<1x2x128xf32>
    %217 = vector.shape_cast %216 : vector<1x2x128xf32> to vector<2x128xf32>
    %218 = vector.shape_cast %214 : vector<2x128xf32> to vector<1x2x128xf32>
    tpu.vector_store %arg10[%215, %c0_49, %c0_50], %218 {strides = array<i32>} : memref<8x2x128xf32, #tpu.memory_space<vmem>>, vector<1x2x128xf32>,
    %c6_i32 = arith.constant 6 : i32
    %219 = arith.index_cast %c6_i32 : i32 to index
    %c0_51 = arith.constant 0 : index
    %c0_52 = arith.constant 0 : index
    %220 = vector.load %arg0[%219, %c0_51, %c0_52] : memref<8x2x384xf32, #tpu.memory_space<vmem>>, vector<1x2x384xf32>
    %221 = vector.shape_cast %220 : vector<1x2x384xf32> to vector<2x384xf32>
    %cst_53 = arith.constant dense<0.000000e+00> : vector<2x384xf32>
    %222 = tpu.matmul %214, %0, %cst_53 {dimension_numbers = #tpu.dot_dimension_numbers<[1], [0], [0], [1], [0, 0, 1, 1], [], []>} : vector<2x128xf32>, vector<128x384xf32>, vector<2x384xf32> -> vector<2x384xf32>
    %223 = vector.broadcast %1 : vector<1x384xf32> to vector<2x384xf32>
    %224 = arith.addf %222, %223 : vector<2x384xf32>
    %225 = vector.extract_strided_slice %221 {offsets = [0, 0], sizes = [2, 128], strides = [1, 1]} : vector<2x384xf32> to vector<2x128xf32>
    %226 = vector.extract_strided_slice %224 {offsets = [0, 0], sizes = [2, 128], strides = [1, 1]} : vector<2x384xf32> to vector<2x128xf32>
    %227 = arith.addf %225, %226 : vector<2x128xf32>
    %228 = arith.negf %227 : vector<2x128xf32>
    %229 = math.exp %228 : vector<2x128xf32>
    %cst_54 = arith.constant 1.000000e+00 : f32
    %230 = vector.broadcast %cst_54 : f32 to vector<2x128xf32>
    %231 = arith.addf %230, %229 : vector<2x128xf32>
    %232 = arith.divf %230, %231 : vector<2x128xf32>
    %233 = vector.extract_strided_slice %221 {offsets = [0, 128], sizes = [2, 128], strides = [1, 1]} : vector<2x384xf32> to vector<2x128xf32>
    %234 = vector.extract_strided_slice %224 {offsets = [0, 128], sizes = [2, 128], strides = [1, 1]} : vector<2x384xf32> to vector<2x128xf32>
    %235 = arith.addf %233, %234 : vector<2x128xf32>
    %236 = arith.negf %235 : vector<2x128xf32>
    %237 = math.exp %236 : vector<2x128xf32>
    %cst_55 = arith.constant 1.000000e+00 : f32
    %238 = vector.broadcast %cst_55 : f32 to vector<2x128xf32>
    %239 = arith.addf %238, %237 : vector<2x128xf32>
    %240 = arith.divf %238, %239 : vector<2x128xf32>
    %241 = vector.extract_strided_slice %221 {offsets = [0, 256], sizes = [2, 128], strides = [1, 1]} : vector<2x384xf32> to vector<2x128xf32>
    %242 = vector.extract_strided_slice %224 {offsets = [0, 256], sizes = [2, 128], strides = [1, 1]} : vector<2x384xf32> to vector<2x128xf32>
    %243 = arith.mulf %232, %242 : vector<2x128xf32>
    %244 = arith.addf %241, %243 : vector<2x128xf32>
    %245 = math.tanh %244 : vector<2x128xf32>
    %cst_56 = arith.constant 1.000000e+00 : f32
    %246 = vector.broadcast %cst_56 : f32 to vector<2x128xf32>
    %247 = arith.subf %246, %240 : vector<2x128xf32>
    %248 = arith.mulf %247, %245 : vector<2x128xf32>
    %249 = arith.mulf %240, %214 : vector<2x128xf32>
    %250 = arith.addf %248, %249 : vector<2x128xf32>
    %251 = arith.index_cast %c6_i32 : i32 to index
    %c0_57 = arith.constant 0 : index
    %c0_58 = arith.constant 0 : index
    %252 = vector.load %arg10[%251, %c0_57, %c0_58] : memref<8x2x128xf32, #tpu.memory_space<vmem>>, vector<1x2x128xf32>
    %253 = vector.shape_cast %252 : vector<1x2x128xf32> to vector<2x128xf32>
    %254 = vector.shape_cast %250 : vector<2x128xf32> to vector<1x2x128xf32>
    tpu.vector_store %arg10[%251, %c0_57, %c0_58], %254 {strides = array<i32>} : memref<8x2x128xf32, #tpu.memory_space<vmem>>, vector<1x2x128xf32>,
    %c7_i32 = arith.constant 7 : i32
    %255 = arith.index_cast %c7_i32 : i32 to index
    %c0_59 = arith.constant 0 : index
    %c0_60 = arith.constant 0 : index
    %256 = vector.load %arg0[%255, %c0_59, %c0_60] : memref<8x2x384xf32, #tpu.memory_space<vmem>>, vector<1x2x384xf32>
    %257 = vector.shape_cast %256 : vector<1x2x384xf32> to vector<2x384xf32>
    %cst_61 = arith.constant dense<0.000000e+00> : vector<2x384xf32>
    %258 = tpu.matmul %250, %0, %cst_61 {dimension_numbers = #tpu.dot_dimension_numbers<[1], [0], [0], [1], [0, 0, 1, 1], [], []>} : vector<2x128xf32>, vector<128x384xf32>, vector<2x384xf32> -> vector<2x384xf32>
    %259 = vector.broadcast %1 : vector<1x384xf32> to vector<2x384xf32>
    %260 = arith.addf %258, %259 : vector<2x384xf32>
    %261 = vector.extract_strided_slice %257 {offsets = [0, 0], sizes = [2, 128], strides = [1, 1]} : vector<2x384xf32> to vector<2x128xf32>
    %262 = vector.extract_strided_slice %260 {offsets = [0, 0], sizes = [2, 128], strides = [1, 1]} : vector<2x384xf32> to vector<2x128xf32>
    %263 = arith.addf %261, %262 : vector<2x128xf32>
    %264 = arith.negf %263 : vector<2x128xf32>
    %265 = math.exp %264 : vector<2x128xf32>
    %cst_62 = arith.constant 1.000000e+00 : f32
    %266 = vector.broadcast %cst_62 : f32 to vector<2x128xf32>
    %267 = arith.addf %266, %265 : vector<2x128xf32>
    %268 = arith.divf %266, %267 : vector<2x128xf32>
    %269 = vector.extract_strided_slice %257 {offsets = [0, 128], sizes = [2, 128], strides = [1, 1]} : vector<2x384xf32> to vector<2x128xf32>
    %270 = vector.extract_strided_slice %260 {offsets = [0, 128], sizes = [2, 128], strides = [1, 1]} : vector<2x384xf32> to vector<2x128xf32>
    %271 = arith.addf %269, %270 : vector<2x128xf32>
    %272 = arith.negf %271 : vector<2x128xf32>
    %273 = math.exp %272 : vector<2x128xf32>
    %cst_63 = arith.constant 1.000000e+00 : f32
    %274 = vector.broadcast %cst_63 : f32 to vector<2x128xf32>
    %275 = arith.addf %274, %273 : vector<2x128xf32>
    %276 = arith.divf %274, %275 : vector<2x128xf32>
    %277 = vector.extract_strided_slice %257 {offsets = [0, 256], sizes = [2, 128], strides = [1, 1]} : vector<2x384xf32> to vector<2x128xf32>
    %278 = vector.extract_strided_slice %260 {offsets = [0, 256], sizes = [2, 128], strides = [1, 1]} : vector<2x384xf32> to vector<2x128xf32>
    %279 = arith.mulf %268, %278 : vector<2x128xf32>
    %280 = arith.addf %277, %279 : vector<2x128xf32>
    %281 = math.tanh %280 : vector<2x128xf32>
    %cst_64 = arith.constant 1.000000e+00 : f32
    %282 = vector.broadcast %cst_64 : f32 to vector<2x128xf32>
    %283 = arith.subf %282, %276 : vector<2x128xf32>
    %284 = arith.mulf %283, %281 : vector<2x128xf32>
    %285 = arith.mulf %276, %250 : vector<2x128xf32>
    %286 = arith.addf %284, %285 : vector<2x128xf32>
    %287 = arith.index_cast %c7_i32 : i32 to index
    %c0_65 = arith.constant 0 : index
    %c0_66 = arith.constant 0 : index
    %288 = vector.load %arg10[%287, %c0_65, %c0_66] : memref<8x2x128xf32, #tpu.memory_space<vmem>>, vector<1x2x128xf32>
    %289 = vector.shape_cast %288 : vector<1x2x128xf32> to vector<2x128xf32>
    %290 = vector.shape_cast %286 : vector<2x128xf32> to vector<1x2x128xf32>
    tpu.vector_store %arg10[%287, %c0_65, %c0_66], %290 {strides = array<i32>} : memref<8x2x128xf32, #tpu.memory_space<vmem>>, vector<1x2x128xf32>,
    %c8_i32 = arith.constant 8 : i32
    %c0_67 = arith.constant 0 : index
    %c0_68 = arith.constant 0 : index
    %291 = vector.load %arg3[%c0_67, %c0_68] : memref<128x384xf32, #tpu.memory_space<vmem>>, vector<128x384xf32>
    %c0_69 = arith.constant 0 : index
    %c0_70 = arith.constant 0 : index
    %292 = vector.load %arg4[%c0_69, %c0_70] : memref<1x384xf32, #tpu.memory_space<vmem>>, vector<1x384xf32>
    %c0_71 = arith.constant 0 : index
    %c0_72 = arith.constant 0 : index
    %293 = vector.load %arg5[%c0_71, %c0_72] : memref<128x384xf32, #tpu.memory_space<vmem>>, vector<128x384xf32>
    %c0_73 = arith.constant 0 : index
    %c0_74 = arith.constant 0 : index
    %294 = vector.load %arg6[%c0_73, %c0_74] : memref<1x384xf32, #tpu.memory_space<vmem>>, vector<1x384xf32>
    %c0_75 = arith.constant 0 : index
    %c0_76 = arith.constant 0 : index
    %c0_77 = arith.constant 0 : index
    %295 = vector.load %arg10[%c0_75, %c0_76, %c0_77] : memref<8x2x128xf32, #tpu.memory_space<vmem>>, vector<1x2x128xf32>
    %296 = vector.shape_cast %295 : vector<1x2x128xf32> to vector<2x128xf32>
    %cst_78 = arith.constant dense<0.000000e+00> : vector<2x384xf32>
    %297 = tpu.matmul %296, %291, %cst_78 {dimension_numbers = #tpu.dot_dimension_numbers<[1], [0], [0], [1], [0, 0, 1, 1], [], []>} : vector<2x128xf32>, vector<128x384xf32>, vector<2x384xf32> -> vector<2x384xf32>
    %298 = vector.broadcast %292 : vector<1x384xf32> to vector<2x384xf32>
    %299 = arith.addf %297, %298 : vector<2x384xf32>
    %c0_79 = arith.constant 0 : index
    %c0_80 = arith.constant 0 : index
    %c0_81 = arith.constant 0 : index
    %300 = vector.load %arg11[%c0_79, %c0_80, %c0_81] : memref<8x2x384xf32, #tpu.memory_space<vmem>>, vector<1x2x384xf32>
    %301 = vector.shape_cast %300 : vector<1x2x384xf32> to vector<2x384xf32>
    %302 = vector.shape_cast %299 : vector<2x384xf32> to vector<1x2x384xf32>
    tpu.vector_store %arg11[%c0_79, %c0_80, %c0_81], %302 {strides = array<i32>} : memref<8x2x384xf32, #tpu.memory_space<vmem>>, vector<1x2x384xf32>,
    %c1 = arith.constant 1 : index
    %c0_82 = arith.constant 0 : index
    %c0_83 = arith.constant 0 : index
    %303 = vector.load %arg10[%c1, %c0_82, %c0_83] : memref<8x2x128xf32, #tpu.memory_space<vmem>>, vector<1x2x128xf32>
    %304 = vector.shape_cast %303 : vector<1x2x128xf32> to vector<2x128xf32>
    %cst_84 = arith.constant dense<0.000000e+00> : vector<2x384xf32>
    %305 = tpu.matmul %304, %291, %cst_84 {dimension_numbers = #tpu.dot_dimension_numbers<[1], [0], [0], [1], [0, 0, 1, 1], [], []>} : vector<2x128xf32>, vector<128x384xf32>, vector<2x384xf32> -> vector<2x384xf32>
    %306 = vector.broadcast %292 : vector<1x384xf32> to vector<2x384xf32>
    %307 = arith.addf %305, %306 : vector<2x384xf32>
    %c1_85 = arith.constant 1 : index
    %c0_86 = arith.constant 0 : index
    %c0_87 = arith.constant 0 : index
    %308 = vector.load %arg11[%c1_85, %c0_86, %c0_87] : memref<8x2x384xf32, #tpu.memory_space<vmem>>, vector<1x2x384xf32>
    %309 = vector.shape_cast %308 : vector<1x2x384xf32> to vector<2x384xf32>
    %310 = vector.shape_cast %307 : vector<2x384xf32> to vector<1x2x384xf32>
    tpu.vector_store %arg11[%c1_85, %c0_86, %c0_87], %310 {strides = array<i32>} : memref<8x2x384xf32, #tpu.memory_space<vmem>>, vector<1x2x384xf32>,
    %c2 = arith.constant 2 : index
    %c0_88 = arith.constant 0 : index
    %c0_89 = arith.constant 0 : index
    %311 = vector.load %arg10[%c2, %c0_88, %c0_89] : memref<8x2x128xf32, #tpu.memory_space<vmem>>, vector<1x2x128xf32>
    %312 = vector.shape_cast %311 : vector<1x2x128xf32> to vector<2x128xf32>
    %cst_90 = arith.constant dense<0.000000e+00> : vector<2x384xf32>
    %313 = tpu.matmul %312, %291, %cst_90 {dimension_numbers = #tpu.dot_dimension_numbers<[1], [0], [0], [1], [0, 0, 1, 1], [], []>} : vector<2x128xf32>, vector<128x384xf32>, vector<2x384xf32> -> vector<2x384xf32>
    %314 = vector.broadcast %292 : vector<1x384xf32> to vector<2x384xf32>
    %315 = arith.addf %313, %314 : vector<2x384xf32>
    %c2_91 = arith.constant 2 : index
    %c0_92 = arith.constant 0 : index
    %c0_93 = arith.constant 0 : index
    %316 = vector.load %arg11[%c2_91, %c0_92, %c0_93] : memref<8x2x384xf32, #tpu.memory_space<vmem>>, vector<1x2x384xf32>
    %317 = vector.shape_cast %316 : vector<1x2x384xf32> to vector<2x384xf32>
    %318 = vector.shape_cast %315 : vector<2x384xf32> to vector<1x2x384xf32>
    tpu.vector_store %arg11[%c2_91, %c0_92, %c0_93], %318 {strides = array<i32>} : memref<8x2x384xf32, #tpu.memory_space<vmem>>, vector<1x2x384xf32>,
    %c3 = arith.constant 3 : index
    %c0_94 = arith.constant 0 : index
    %c0_95 = arith.constant 0 : index
    %319 = vector.load %arg10[%c3, %c0_94, %c0_95] : memref<8x2x128xf32, #tpu.memory_space<vmem>>, vector<1x2x128xf32>
    %320 = vector.shape_cast %319 : vector<1x2x128xf32> to vector<2x128xf32>
    %cst_96 = arith.constant dense<0.000000e+00> : vector<2x384xf32>
    %321 = tpu.matmul %320, %291, %cst_96 {dimension_numbers = #tpu.dot_dimension_numbers<[1], [0], [0], [1], [0, 0, 1, 1], [], []>} : vector<2x128xf32>, vector<128x384xf32>, vector<2x384xf32> -> vector<2x384xf32>
    %322 = vector.broadcast %292 : vector<1x384xf32> to vector<2x384xf32>
    %323 = arith.addf %321, %322 : vector<2x384xf32>
    %c3_97 = arith.constant 3 : index
    %c0_98 = arith.constant 0 : index
    %c0_99 = arith.constant 0 : index
    %324 = vector.load %arg11[%c3_97, %c0_98, %c0_99] : memref<8x2x384xf32, #tpu.memory_space<vmem>>, vector<1x2x384xf32>
    %325 = vector.shape_cast %324 : vector<1x2x384xf32> to vector<2x384xf32>
    %326 = vector.shape_cast %323 : vector<2x384xf32> to vector<1x2x384xf32>
    tpu.vector_store %arg11[%c3_97, %c0_98, %c0_99], %326 {strides = array<i32>} : memref<8x2x384xf32, #tpu.memory_space<vmem>>, vector<1x2x384xf32>,
    %c4 = arith.constant 4 : index
    %c0_100 = arith.constant 0 : index
    %c0_101 = arith.constant 0 : index
    %327 = vector.load %arg10[%c4, %c0_100, %c0_101] : memref<8x2x128xf32, #tpu.memory_space<vmem>>, vector<1x2x128xf32>
    %328 = vector.shape_cast %327 : vector<1x2x128xf32> to vector<2x128xf32>
    %cst_102 = arith.constant dense<0.000000e+00> : vector<2x384xf32>
    %329 = tpu.matmul %328, %291, %cst_102 {dimension_numbers = #tpu.dot_dimension_numbers<[1], [0], [0], [1], [0, 0, 1, 1], [], []>} : vector<2x128xf32>, vector<128x384xf32>, vector<2x384xf32> -> vector<2x384xf32>
    %330 = vector.broadcast %292 : vector<1x384xf32> to vector<2x384xf32>
    %331 = arith.addf %329, %330 : vector<2x384xf32>
    %c4_103 = arith.constant 4 : index
    %c0_104 = arith.constant 0 : index
    %c0_105 = arith.constant 0 : index
    %332 = vector.load %arg11[%c4_103, %c0_104, %c0_105] : memref<8x2x384xf32, #tpu.memory_space<vmem>>, vector<1x2x384xf32>
    %333 = vector.shape_cast %332 : vector<1x2x384xf32> to vector<2x384xf32>
    %334 = vector.shape_cast %331 : vector<2x384xf32> to vector<1x2x384xf32>
    tpu.vector_store %arg11[%c4_103, %c0_104, %c0_105], %334 {strides = array<i32>} : memref<8x2x384xf32, #tpu.memory_space<vmem>>, vector<1x2x384xf32>,
    %c5 = arith.constant 5 : index
    %c0_106 = arith.constant 0 : index
    %c0_107 = arith.constant 0 : index
    %335 = vector.load %arg10[%c5, %c0_106, %c0_107] : memref<8x2x128xf32, #tpu.memory_space<vmem>>, vector<1x2x128xf32>
    %336 = vector.shape_cast %335 : vector<1x2x128xf32> to vector<2x128xf32>
    %cst_108 = arith.constant dense<0.000000e+00> : vector<2x384xf32>
    %337 = tpu.matmul %336, %291, %cst_108 {dimension_numbers = #tpu.dot_dimension_numbers<[1], [0], [0], [1], [0, 0, 1, 1], [], []>} : vector<2x128xf32>, vector<128x384xf32>, vector<2x384xf32> -> vector<2x384xf32>
    %338 = vector.broadcast %292 : vector<1x384xf32> to vector<2x384xf32>
    %339 = arith.addf %337, %338 : vector<2x384xf32>
    %c5_109 = arith.constant 5 : index
    %c0_110 = arith.constant 0 : index
    %c0_111 = arith.constant 0 : index
    %340 = vector.load %arg11[%c5_109, %c0_110, %c0_111] : memref<8x2x384xf32, #tpu.memory_space<vmem>>, vector<1x2x384xf32>
    %341 = vector.shape_cast %340 : vector<1x2x384xf32> to vector<2x384xf32>
    %342 = vector.shape_cast %339 : vector<2x384xf32> to vector<1x2x384xf32>
    tpu.vector_store %arg11[%c5_109, %c0_110, %c0_111], %342 {strides = array<i32>} : memref<8x2x384xf32, #tpu.memory_space<vmem>>, vector<1x2x384xf32>,
    %c6 = arith.constant 6 : index
    %c0_112 = arith.constant 0 : index
    %c0_113 = arith.constant 0 : index
    %343 = vector.load %arg10[%c6, %c0_112, %c0_113] : memref<8x2x128xf32, #tpu.memory_space<vmem>>, vector<1x2x128xf32>
    %344 = vector.shape_cast %343 : vector<1x2x128xf32> to vector<2x128xf32>
    %cst_114 = arith.constant dense<0.000000e+00> : vector<2x384xf32>
    %345 = tpu.matmul %344, %291, %cst_114 {dimension_numbers = #tpu.dot_dimension_numbers<[1], [0], [0], [1], [0, 0, 1, 1], [], []>} : vector<2x128xf32>, vector<128x384xf32>, vector<2x384xf32> -> vector<2x384xf32>
    %346 = vector.broadcast %292 : vector<1x384xf32> to vector<2x384xf32>
    %347 = arith.addf %345, %346 : vector<2x384xf32>
    %c6_115 = arith.constant 6 : index
    %c0_116 = arith.constant 0 : index
    %c0_117 = arith.constant 0 : index
    %348 = vector.load %arg11[%c6_115, %c0_116, %c0_117] : memref<8x2x384xf32, #tpu.memory_space<vmem>>, vector<1x2x384xf32>
    %349 = vector.shape_cast %348 : vector<1x2x384xf32> to vector<2x384xf32>
    %350 = vector.shape_cast %347 : vector<2x384xf32> to vector<1x2x384xf32>
    tpu.vector_store %arg11[%c6_115, %c0_116, %c0_117], %350 {strides = array<i32>} : memref<8x2x384xf32, #tpu.memory_space<vmem>>, vector<1x2x384xf32>,
    %c7 = arith.constant 7 : index
    %c0_118 = arith.constant 0 : index
    %c0_119 = arith.constant 0 : index
    %351 = vector.load %arg10[%c7, %c0_118, %c0_119] : memref<8x2x128xf32, #tpu.memory_space<vmem>>, vector<1x2x128xf32>
    %352 = vector.shape_cast %351 : vector<1x2x128xf32> to vector<2x128xf32>
    %cst_120 = arith.constant dense<0.000000e+00> : vector<2x384xf32>
    %353 = tpu.matmul %352, %291, %cst_120 {dimension_numbers = #tpu.dot_dimension_numbers<[1], [0], [0], [1], [0, 0, 1, 1], [], []>} : vector<2x128xf32>, vector<128x384xf32>, vector<2x384xf32> -> vector<2x384xf32>
    %354 = vector.broadcast %292 : vector<1x384xf32> to vector<2x384xf32>
    %355 = arith.addf %353, %354 : vector<2x384xf32>
    %c7_121 = arith.constant 7 : index
    %c0_122 = arith.constant 0 : index
    %c0_123 = arith.constant 0 : index
    %356 = vector.load %arg11[%c7_121, %c0_122, %c0_123] : memref<8x2x384xf32, #tpu.memory_space<vmem>>, vector<1x2x384xf32>
    %357 = vector.shape_cast %356 : vector<1x2x384xf32> to vector<2x384xf32>
    %358 = vector.shape_cast %355 : vector<2x384xf32> to vector<1x2x384xf32>
    tpu.vector_store %arg11[%c7_121, %c0_122, %c0_123], %358 {strides = array<i32>} : memref<8x2x384xf32, #tpu.memory_space<vmem>>, vector<1x2x384xf32>,
    %cst_124 = arith.constant 0.000000e+00 : f32
    %359 = vector.broadcast %cst_124 : f32 to vector<2x128xf32>
    %c0_i32_125 = arith.constant 0 : i32
    %360 = arith.index_cast %c0_i32_125 : i32 to index
    %c0_126 = arith.constant 0 : index
    %c0_127 = arith.constant 0 : index
    %361 = vector.load %arg11[%360, %c0_126, %c0_127] : memref<8x2x384xf32, #tpu.memory_space<vmem>>, vector<1x2x384xf32>
    %362 = vector.shape_cast %361 : vector<1x2x384xf32> to vector<2x384xf32>
    %cst_128 = arith.constant dense<0.000000e+00> : vector<2x384xf32>
    %363 = tpu.matmul %359, %293, %cst_128 {dimension_numbers = #tpu.dot_dimension_numbers<[1], [0], [0], [1], [0, 0, 1, 1], [], []>} : vector<2x128xf32>, vector<128x384xf32>, vector<2x384xf32> -> vector<2x384xf32>
    %364 = vector.broadcast %294 : vector<1x384xf32> to vector<2x384xf32>
    %365 = arith.addf %363, %364 : vector<2x384xf32>
    %366 = vector.extract_strided_slice %362 {offsets = [0, 0], sizes = [2, 128], strides = [1, 1]} : vector<2x384xf32> to vector<2x128xf32>
    %367 = vector.extract_strided_slice %365 {offsets = [0, 0], sizes = [2, 128], strides = [1, 1]} : vector<2x384xf32> to vector<2x128xf32>
    %368 = arith.addf %366, %367 : vector<2x128xf32>
    %369 = arith.negf %368 : vector<2x128xf32>
    %370 = math.exp %369 : vector<2x128xf32>
    %cst_129 = arith.constant 1.000000e+00 : f32
    %371 = vector.broadcast %cst_129 : f32 to vector<2x128xf32>
    %372 = arith.addf %371, %370 : vector<2x128xf32>
    %373 = arith.divf %371, %372 : vector<2x128xf32>
    %374 = vector.extract_strided_slice %362 {offsets = [0, 128], sizes = [2, 128], strides = [1, 1]} : vector<2x384xf32> to vector<2x128xf32>
    %375 = vector.extract_strided_slice %365 {offsets = [0, 128], sizes = [2, 128], strides = [1, 1]} : vector<2x384xf32> to vector<2x128xf32>
    %376 = arith.addf %374, %375 : vector<2x128xf32>
    %377 = arith.negf %376 : vector<2x128xf32>
    %378 = math.exp %377 : vector<2x128xf32>
    %cst_130 = arith.constant 1.000000e+00 : f32
    %379 = vector.broadcast %cst_130 : f32 to vector<2x128xf32>
    %380 = arith.addf %379, %378 : vector<2x128xf32>
    %381 = arith.divf %379, %380 : vector<2x128xf32>
    %382 = vector.extract_strided_slice %362 {offsets = [0, 256], sizes = [2, 128], strides = [1, 1]} : vector<2x384xf32> to vector<2x128xf32>
    %383 = vector.extract_strided_slice %365 {offsets = [0, 256], sizes = [2, 128], strides = [1, 1]} : vector<2x384xf32> to vector<2x128xf32>
    %384 = arith.mulf %373, %383 : vector<2x128xf32>
    %385 = arith.addf %382, %384 : vector<2x128xf32>
    %386 = math.tanh %385 : vector<2x128xf32>
    %cst_131 = arith.constant 1.000000e+00 : f32
    %387 = vector.broadcast %cst_131 : f32 to vector<2x128xf32>
    %388 = arith.subf %387, %381 : vector<2x128xf32>
    %389 = arith.mulf %388, %386 : vector<2x128xf32>
    %390 = arith.mulf %381, %359 : vector<2x128xf32>
    %391 = arith.addf %389, %390 : vector<2x128xf32>
    %c1_i32_132 = arith.constant 1 : i32
    %392 = arith.index_cast %c1_i32_132 : i32 to index
    %c0_133 = arith.constant 0 : index
    %c0_134 = arith.constant 0 : index
    %393 = vector.load %arg11[%392, %c0_133, %c0_134] : memref<8x2x384xf32, #tpu.memory_space<vmem>>, vector<1x2x384xf32>
    %394 = vector.shape_cast %393 : vector<1x2x384xf32> to vector<2x384xf32>
    %cst_135 = arith.constant dense<0.000000e+00> : vector<2x384xf32>
    %395 = tpu.matmul %391, %293, %cst_135 {dimension_numbers = #tpu.dot_dimension_numbers<[1], [0], [0], [1], [0, 0, 1, 1], [], []>} : vector<2x128xf32>, vector<128x384xf32>, vector<2x384xf32> -> vector<2x384xf32>
    %396 = vector.broadcast %294 : vector<1x384xf32> to vector<2x384xf32>
    %397 = arith.addf %395, %396 : vector<2x384xf32>
    %398 = vector.extract_strided_slice %394 {offsets = [0, 0], sizes = [2, 128], strides = [1, 1]} : vector<2x384xf32> to vector<2x128xf32>
    %399 = vector.extract_strided_slice %397 {offsets = [0, 0], sizes = [2, 128], strides = [1, 1]} : vector<2x384xf32> to vector<2x128xf32>
    %400 = arith.addf %398, %399 : vector<2x128xf32>
    %401 = arith.negf %400 : vector<2x128xf32>
    %402 = math.exp %401 : vector<2x128xf32>
    %cst_136 = arith.constant 1.000000e+00 : f32
    %403 = vector.broadcast %cst_136 : f32 to vector<2x128xf32>
    %404 = arith.addf %403, %402 : vector<2x128xf32>
    %405 = arith.divf %403, %404 : vector<2x128xf32>
    %406 = vector.extract_strided_slice %394 {offsets = [0, 128], sizes = [2, 128], strides = [1, 1]} : vector<2x384xf32> to vector<2x128xf32>
    %407 = vector.extract_strided_slice %397 {offsets = [0, 128], sizes = [2, 128], strides = [1, 1]} : vector<2x384xf32> to vector<2x128xf32>
    %408 = arith.addf %406, %407 : vector<2x128xf32>
    %409 = arith.negf %408 : vector<2x128xf32>
    %410 = math.exp %409 : vector<2x128xf32>
    %cst_137 = arith.constant 1.000000e+00 : f32
    %411 = vector.broadcast %cst_137 : f32 to vector<2x128xf32>
    %412 = arith.addf %411, %410 : vector<2x128xf32>
    %413 = arith.divf %411, %412 : vector<2x128xf32>
    %414 = vector.extract_strided_slice %394 {offsets = [0, 256], sizes = [2, 128], strides = [1, 1]} : vector<2x384xf32> to vector<2x128xf32>
    %415 = vector.extract_strided_slice %397 {offsets = [0, 256], sizes = [2, 128], strides = [1, 1]} : vector<2x384xf32> to vector<2x128xf32>
    %416 = arith.mulf %405, %415 : vector<2x128xf32>
    %417 = arith.addf %414, %416 : vector<2x128xf32>
    %418 = math.tanh %417 : vector<2x128xf32>
    %cst_138 = arith.constant 1.000000e+00 : f32
    %419 = vector.broadcast %cst_138 : f32 to vector<2x128xf32>
    %420 = arith.subf %419, %413 : vector<2x128xf32>
    %421 = arith.mulf %420, %418 : vector<2x128xf32>
    %422 = arith.mulf %413, %391 : vector<2x128xf32>
    %423 = arith.addf %421, %422 : vector<2x128xf32>
    %c2_i32_139 = arith.constant 2 : i32
    %424 = arith.index_cast %c2_i32_139 : i32 to index
    %c0_140 = arith.constant 0 : index
    %c0_141 = arith.constant 0 : index
    %425 = vector.load %arg11[%424, %c0_140, %c0_141] : memref<8x2x384xf32, #tpu.memory_space<vmem>>, vector<1x2x384xf32>
    %426 = vector.shape_cast %425 : vector<1x2x384xf32> to vector<2x384xf32>
    %cst_142 = arith.constant dense<0.000000e+00> : vector<2x384xf32>
    %427 = tpu.matmul %423, %293, %cst_142 {dimension_numbers = #tpu.dot_dimension_numbers<[1], [0], [0], [1], [0, 0, 1, 1], [], []>} : vector<2x128xf32>, vector<128x384xf32>, vector<2x384xf32> -> vector<2x384xf32>
    %428 = vector.broadcast %294 : vector<1x384xf32> to vector<2x384xf32>
    %429 = arith.addf %427, %428 : vector<2x384xf32>
    %430 = vector.extract_strided_slice %426 {offsets = [0, 0], sizes = [2, 128], strides = [1, 1]} : vector<2x384xf32> to vector<2x128xf32>
    %431 = vector.extract_strided_slice %429 {offsets = [0, 0], sizes = [2, 128], strides = [1, 1]} : vector<2x384xf32> to vector<2x128xf32>
    %432 = arith.addf %430, %431 : vector<2x128xf32>
    %433 = arith.negf %432 : vector<2x128xf32>
    %434 = math.exp %433 : vector<2x128xf32>
    %cst_143 = arith.constant 1.000000e+00 : f32
    %435 = vector.broadcast %cst_143 : f32 to vector<2x128xf32>
    %436 = arith.addf %435, %434 : vector<2x128xf32>
    %437 = arith.divf %435, %436 : vector<2x128xf32>
    %438 = vector.extract_strided_slice %426 {offsets = [0, 128], sizes = [2, 128], strides = [1, 1]} : vector<2x384xf32> to vector<2x128xf32>
    %439 = vector.extract_strided_slice %429 {offsets = [0, 128], sizes = [2, 128], strides = [1, 1]} : vector<2x384xf32> to vector<2x128xf32>
    %440 = arith.addf %438, %439 : vector<2x128xf32>
    %441 = arith.negf %440 : vector<2x128xf32>
    %442 = math.exp %441 : vector<2x128xf32>
    %cst_144 = arith.constant 1.000000e+00 : f32
    %443 = vector.broadcast %cst_144 : f32 to vector<2x128xf32>
    %444 = arith.addf %443, %442 : vector<2x128xf32>
    %445 = arith.divf %443, %444 : vector<2x128xf32>
    %446 = vector.extract_strided_slice %426 {offsets = [0, 256], sizes = [2, 128], strides = [1, 1]} : vector<2x384xf32> to vector<2x128xf32>
    %447 = vector.extract_strided_slice %429 {offsets = [0, 256], sizes = [2, 128], strides = [1, 1]} : vector<2x384xf32> to vector<2x128xf32>
    %448 = arith.mulf %437, %447 : vector<2x128xf32>
    %449 = arith.addf %446, %448 : vector<2x128xf32>
    %450 = math.tanh %449 : vector<2x128xf32>
    %cst_145 = arith.constant 1.000000e+00 : f32
    %451 = vector.broadcast %cst_145 : f32 to vector<2x128xf32>
    %452 = arith.subf %451, %445 : vector<2x128xf32>
    %453 = arith.mulf %452, %450 : vector<2x128xf32>
    %454 = arith.mulf %445, %423 : vector<2x128xf32>
    %455 = arith.addf %453, %454 : vector<2x128xf32>
    %c3_i32_146 = arith.constant 3 : i32
    %456 = arith.index_cast %c3_i32_146 : i32 to index
    %c0_147 = arith.constant 0 : index
    %c0_148 = arith.constant 0 : index
    %457 = vector.load %arg11[%456, %c0_147, %c0_148] : memref<8x2x384xf32, #tpu.memory_space<vmem>>, vector<1x2x384xf32>
    %458 = vector.shape_cast %457 : vector<1x2x384xf32> to vector<2x384xf32>
    %cst_149 = arith.constant dense<0.000000e+00> : vector<2x384xf32>
    %459 = tpu.matmul %455, %293, %cst_149 {dimension_numbers = #tpu.dot_dimension_numbers<[1], [0], [0], [1], [0, 0, 1, 1], [], []>} : vector<2x128xf32>, vector<128x384xf32>, vector<2x384xf32> -> vector<2x384xf32>
    %460 = vector.broadcast %294 : vector<1x384xf32> to vector<2x384xf32>
    %461 = arith.addf %459, %460 : vector<2x384xf32>
    %462 = vector.extract_strided_slice %458 {offsets = [0, 0], sizes = [2, 128], strides = [1, 1]} : vector<2x384xf32> to vector<2x128xf32>
    %463 = vector.extract_strided_slice %461 {offsets = [0, 0], sizes = [2, 128], strides = [1, 1]} : vector<2x384xf32> to vector<2x128xf32>
    %464 = arith.addf %462, %463 : vector<2x128xf32>
    %465 = arith.negf %464 : vector<2x128xf32>
    %466 = math.exp %465 : vector<2x128xf32>
    %cst_150 = arith.constant 1.000000e+00 : f32
    %467 = vector.broadcast %cst_150 : f32 to vector<2x128xf32>
    %468 = arith.addf %467, %466 : vector<2x128xf32>
    %469 = arith.divf %467, %468 : vector<2x128xf32>
    %470 = vector.extract_strided_slice %458 {offsets = [0, 128], sizes = [2, 128], strides = [1, 1]} : vector<2x384xf32> to vector<2x128xf32>
    %471 = vector.extract_strided_slice %461 {offsets = [0, 128], sizes = [2, 128], strides = [1, 1]} : vector<2x384xf32> to vector<2x128xf32>
    %472 = arith.addf %470, %471 : vector<2x128xf32>
    %473 = arith.negf %472 : vector<2x128xf32>
    %474 = math.exp %473 : vector<2x128xf32>
    %cst_151 = arith.constant 1.000000e+00 : f32
    %475 = vector.broadcast %cst_151 : f32 to vector<2x128xf32>
    %476 = arith.addf %475, %474 : vector<2x128xf32>
    %477 = arith.divf %475, %476 : vector<2x128xf32>
    %478 = vector.extract_strided_slice %458 {offsets = [0, 256], sizes = [2, 128], strides = [1, 1]} : vector<2x384xf32> to vector<2x128xf32>
    %479 = vector.extract_strided_slice %461 {offsets = [0, 256], sizes = [2, 128], strides = [1, 1]} : vector<2x384xf32> to vector<2x128xf32>
    %480 = arith.mulf %469, %479 : vector<2x128xf32>
    %481 = arith.addf %478, %480 : vector<2x128xf32>
    %482 = math.tanh %481 : vector<2x128xf32>
    %cst_152 = arith.constant 1.000000e+00 : f32
    %483 = vector.broadcast %cst_152 : f32 to vector<2x128xf32>
    %484 = arith.subf %483, %477 : vector<2x128xf32>
    %485 = arith.mulf %484, %482 : vector<2x128xf32>
    %486 = arith.mulf %477, %455 : vector<2x128xf32>
    %487 = arith.addf %485, %486 : vector<2x128xf32>
    %c4_i32_153 = arith.constant 4 : i32
    %488 = arith.index_cast %c4_i32_153 : i32 to index
    %c0_154 = arith.constant 0 : index
    %c0_155 = arith.constant 0 : index
    %489 = vector.load %arg11[%488, %c0_154, %c0_155] : memref<8x2x384xf32, #tpu.memory_space<vmem>>, vector<1x2x384xf32>
    %490 = vector.shape_cast %489 : vector<1x2x384xf32> to vector<2x384xf32>
    %cst_156 = arith.constant dense<0.000000e+00> : vector<2x384xf32>
    %491 = tpu.matmul %487, %293, %cst_156 {dimension_numbers = #tpu.dot_dimension_numbers<[1], [0], [0], [1], [0, 0, 1, 1], [], []>} : vector<2x128xf32>, vector<128x384xf32>, vector<2x384xf32> -> vector<2x384xf32>
    %492 = vector.broadcast %294 : vector<1x384xf32> to vector<2x384xf32>
    %493 = arith.addf %491, %492 : vector<2x384xf32>
    %494 = vector.extract_strided_slice %490 {offsets = [0, 0], sizes = [2, 128], strides = [1, 1]} : vector<2x384xf32> to vector<2x128xf32>
    %495 = vector.extract_strided_slice %493 {offsets = [0, 0], sizes = [2, 128], strides = [1, 1]} : vector<2x384xf32> to vector<2x128xf32>
    %496 = arith.addf %494, %495 : vector<2x128xf32>
    %497 = arith.negf %496 : vector<2x128xf32>
    %498 = math.exp %497 : vector<2x128xf32>
    %cst_157 = arith.constant 1.000000e+00 : f32
    %499 = vector.broadcast %cst_157 : f32 to vector<2x128xf32>
    %500 = arith.addf %499, %498 : vector<2x128xf32>
    %501 = arith.divf %499, %500 : vector<2x128xf32>
    %502 = vector.extract_strided_slice %490 {offsets = [0, 128], sizes = [2, 128], strides = [1, 1]} : vector<2x384xf32> to vector<2x128xf32>
    %503 = vector.extract_strided_slice %493 {offsets = [0, 128], sizes = [2, 128], strides = [1, 1]} : vector<2x384xf32> to vector<2x128xf32>
    %504 = arith.addf %502, %503 : vector<2x128xf32>
    %505 = arith.negf %504 : vector<2x128xf32>
    %506 = math.exp %505 : vector<2x128xf32>
    %cst_158 = arith.constant 1.000000e+00 : f32
    %507 = vector.broadcast %cst_158 : f32 to vector<2x128xf32>
    %508 = arith.addf %507, %506 : vector<2x128xf32>
    %509 = arith.divf %507, %508 : vector<2x128xf32>
    %510 = vector.extract_strided_slice %490 {offsets = [0, 256], sizes = [2, 128], strides = [1, 1]} : vector<2x384xf32> to vector<2x128xf32>
    %511 = vector.extract_strided_slice %493 {offsets = [0, 256], sizes = [2, 128], strides = [1, 1]} : vector<2x384xf32> to vector<2x128xf32>
    %512 = arith.mulf %501, %511 : vector<2x128xf32>
    %513 = arith.addf %510, %512 : vector<2x128xf32>
    %514 = math.tanh %513 : vector<2x128xf32>
    %cst_159 = arith.constant 1.000000e+00 : f32
    %515 = vector.broadcast %cst_159 : f32 to vector<2x128xf32>
    %516 = arith.subf %515, %509 : vector<2x128xf32>
    %517 = arith.mulf %516, %514 : vector<2x128xf32>
    %518 = arith.mulf %509, %487 : vector<2x128xf32>
    %519 = arith.addf %517, %518 : vector<2x128xf32>
    %c5_i32_160 = arith.constant 5 : i32
    %520 = arith.index_cast %c5_i32_160 : i32 to index
    %c0_161 = arith.constant 0 : index
    %c0_162 = arith.constant 0 : index
    %521 = vector.load %arg11[%520, %c0_161, %c0_162] : memref<8x2x384xf32, #tpu.memory_space<vmem>>, vector<1x2x384xf32>
    %522 = vector.shape_cast %521 : vector<1x2x384xf32> to vector<2x384xf32>
    %cst_163 = arith.constant dense<0.000000e+00> : vector<2x384xf32>
    %523 = tpu.matmul %519, %293, %cst_163 {dimension_numbers = #tpu.dot_dimension_numbers<[1], [0], [0], [1], [0, 0, 1, 1], [], []>} : vector<2x128xf32>, vector<128x384xf32>, vector<2x384xf32> -> vector<2x384xf32>
    %524 = vector.broadcast %294 : vector<1x384xf32> to vector<2x384xf32>
    %525 = arith.addf %523, %524 : vector<2x384xf32>
    %526 = vector.extract_strided_slice %522 {offsets = [0, 0], sizes = [2, 128], strides = [1, 1]} : vector<2x384xf32> to vector<2x128xf32>
    %527 = vector.extract_strided_slice %525 {offsets = [0, 0], sizes = [2, 128], strides = [1, 1]} : vector<2x384xf32> to vector<2x128xf32>
    %528 = arith.addf %526, %527 : vector<2x128xf32>
    %529 = arith.negf %528 : vector<2x128xf32>
    %530 = math.exp %529 : vector<2x128xf32>
    %cst_164 = arith.constant 1.000000e+00 : f32
    %531 = vector.broadcast %cst_164 : f32 to vector<2x128xf32>
    %532 = arith.addf %531, %530 : vector<2x128xf32>
    %533 = arith.divf %531, %532 : vector<2x128xf32>
    %534 = vector.extract_strided_slice %522 {offsets = [0, 128], sizes = [2, 128], strides = [1, 1]} : vector<2x384xf32> to vector<2x128xf32>
    %535 = vector.extract_strided_slice %525 {offsets = [0, 128], sizes = [2, 128], strides = [1, 1]} : vector<2x384xf32> to vector<2x128xf32>
    %536 = arith.addf %534, %535 : vector<2x128xf32>
    %537 = arith.negf %536 : vector<2x128xf32>
    %538 = math.exp %537 : vector<2x128xf32>
    %cst_165 = arith.constant 1.000000e+00 : f32
    %539 = vector.broadcast %cst_165 : f32 to vector<2x128xf32>
    %540 = arith.addf %539, %538 : vector<2x128xf32>
    %541 = arith.divf %539, %540 : vector<2x128xf32>
    %542 = vector.extract_strided_slice %522 {offsets = [0, 256], sizes = [2, 128], strides = [1, 1]} : vector<2x384xf32> to vector<2x128xf32>
    %543 = vector.extract_strided_slice %525 {offsets = [0, 256], sizes = [2, 128], strides = [1, 1]} : vector<2x384xf32> to vector<2x128xf32>
    %544 = arith.mulf %533, %543 : vector<2x128xf32>
    %545 = arith.addf %542, %544 : vector<2x128xf32>
    %546 = math.tanh %545 : vector<2x128xf32>
    %cst_166 = arith.constant 1.000000e+00 : f32
    %547 = vector.broadcast %cst_166 : f32 to vector<2x128xf32>
    %548 = arith.subf %547, %541 : vector<2x128xf32>
    %549 = arith.mulf %548, %546 : vector<2x128xf32>
    %550 = arith.mulf %541, %519 : vector<2x128xf32>
    %551 = arith.addf %549, %550 : vector<2x128xf32>
    %c6_i32_167 = arith.constant 6 : i32
    %552 = arith.index_cast %c6_i32_167 : i32 to index
    %c0_168 = arith.constant 0 : index
    %c0_169 = arith.constant 0 : index
    %553 = vector.load %arg11[%552, %c0_168, %c0_169] : memref<8x2x384xf32, #tpu.memory_space<vmem>>, vector<1x2x384xf32>
    %554 = vector.shape_cast %553 : vector<1x2x384xf32> to vector<2x384xf32>
    %cst_170 = arith.constant dense<0.000000e+00> : vector<2x384xf32>
    %555 = tpu.matmul %551, %293, %cst_170 {dimension_numbers = #tpu.dot_dimension_numbers<[1], [0], [0], [1], [0, 0, 1, 1], [], []>} : vector<2x128xf32>, vector<128x384xf32>, vector<2x384xf32> -> vector<2x384xf32>
    %556 = vector.broadcast %294 : vector<1x384xf32> to vector<2x384xf32>
    %557 = arith.addf %555, %556 : vector<2x384xf32>
    %558 = vector.extract_strided_slice %554 {offsets = [0, 0], sizes = [2, 128], strides = [1, 1]} : vector<2x384xf32> to vector<2x128xf32>
    %559 = vector.extract_strided_slice %557 {offsets = [0, 0], sizes = [2, 128], strides = [1, 1]} : vector<2x384xf32> to vector<2x128xf32>
    %560 = arith.addf %558, %559 : vector<2x128xf32>
    %561 = arith.negf %560 : vector<2x128xf32>
    %562 = math.exp %561 : vector<2x128xf32>
    %cst_171 = arith.constant 1.000000e+00 : f32
    %563 = vector.broadcast %cst_171 : f32 to vector<2x128xf32>
    %564 = arith.addf %563, %562 : vector<2x128xf32>
    %565 = arith.divf %563, %564 : vector<2x128xf32>
    %566 = vector.extract_strided_slice %554 {offsets = [0, 128], sizes = [2, 128], strides = [1, 1]} : vector<2x384xf32> to vector<2x128xf32>
    %567 = vector.extract_strided_slice %557 {offsets = [0, 128], sizes = [2, 128], strides = [1, 1]} : vector<2x384xf32> to vector<2x128xf32>
    %568 = arith.addf %566, %567 : vector<2x128xf32>
    %569 = arith.negf %568 : vector<2x128xf32>
    %570 = math.exp %569 : vector<2x128xf32>
    %cst_172 = arith.constant 1.000000e+00 : f32
    %571 = vector.broadcast %cst_172 : f32 to vector<2x128xf32>
    %572 = arith.addf %571, %570 : vector<2x128xf32>
    %573 = arith.divf %571, %572 : vector<2x128xf32>
    %574 = vector.extract_strided_slice %554 {offsets = [0, 256], sizes = [2, 128], strides = [1, 1]} : vector<2x384xf32> to vector<2x128xf32>
    %575 = vector.extract_strided_slice %557 {offsets = [0, 256], sizes = [2, 128], strides = [1, 1]} : vector<2x384xf32> to vector<2x128xf32>
    %576 = arith.mulf %565, %575 : vector<2x128xf32>
    %577 = arith.addf %574, %576 : vector<2x128xf32>
    %578 = math.tanh %577 : vector<2x128xf32>
    %cst_173 = arith.constant 1.000000e+00 : f32
    %579 = vector.broadcast %cst_173 : f32 to vector<2x128xf32>
    %580 = arith.subf %579, %573 : vector<2x128xf32>
    %581 = arith.mulf %580, %578 : vector<2x128xf32>
    %582 = arith.mulf %573, %551 : vector<2x128xf32>
    %583 = arith.addf %581, %582 : vector<2x128xf32>
    %c7_i32_174 = arith.constant 7 : i32
    %584 = arith.index_cast %c7_i32_174 : i32 to index
    %c0_175 = arith.constant 0 : index
    %c0_176 = arith.constant 0 : index
    %585 = vector.load %arg11[%584, %c0_175, %c0_176] : memref<8x2x384xf32, #tpu.memory_space<vmem>>, vector<1x2x384xf32>
    %586 = vector.shape_cast %585 : vector<1x2x384xf32> to vector<2x384xf32>
    %cst_177 = arith.constant dense<0.000000e+00> : vector<2x384xf32>
    %587 = tpu.matmul %583, %293, %cst_177 {dimension_numbers = #tpu.dot_dimension_numbers<[1], [0], [0], [1], [0, 0, 1, 1], [], []>} : vector<2x128xf32>, vector<128x384xf32>, vector<2x384xf32> -> vector<2x384xf32>
    %588 = vector.broadcast %294 : vector<1x384xf32> to vector<2x384xf32>
    %589 = arith.addf %587, %588 : vector<2x384xf32>
    %590 = vector.extract_strided_slice %586 {offsets = [0, 0], sizes = [2, 128], strides = [1, 1]} : vector<2x384xf32> to vector<2x128xf32>
    %591 = vector.extract_strided_slice %589 {offsets = [0, 0], sizes = [2, 128], strides = [1, 1]} : vector<2x384xf32> to vector<2x128xf32>
    %592 = arith.addf %590, %591 : vector<2x128xf32>
    %593 = arith.negf %592 : vector<2x128xf32>
    %594 = math.exp %593 : vector<2x128xf32>
    %cst_178 = arith.constant 1.000000e+00 : f32
    %595 = vector.broadcast %cst_178 : f32 to vector<2x128xf32>
    %596 = arith.addf %595, %594 : vector<2x128xf32>
    %597 = arith.divf %595, %596 : vector<2x128xf32>
    %598 = vector.extract_strided_slice %586 {offsets = [0, 128], sizes = [2, 128], strides = [1, 1]} : vector<2x384xf32> to vector<2x128xf32>
    %599 = vector.extract_strided_slice %589 {offsets = [0, 128], sizes = [2, 128], strides = [1, 1]} : vector<2x384xf32> to vector<2x128xf32>
    %600 = arith.addf %598, %599 : vector<2x128xf32>
    %601 = arith.negf %600 : vector<2x128xf32>
    %602 = math.exp %601 : vector<2x128xf32>
    %cst_179 = arith.constant 1.000000e+00 : f32
    %603 = vector.broadcast %cst_179 : f32 to vector<2x128xf32>
    %604 = arith.addf %603, %602 : vector<2x128xf32>
    %605 = arith.divf %603, %604 : vector<2x128xf32>
    %606 = vector.extract_strided_slice %586 {offsets = [0, 256], sizes = [2, 128], strides = [1, 1]} : vector<2x384xf32> to vector<2x128xf32>
    %607 = vector.extract_strided_slice %589 {offsets = [0, 256], sizes = [2, 128], strides = [1, 1]} : vector<2x384xf32> to vector<2x128xf32>
    %608 = arith.mulf %597, %607 : vector<2x128xf32>
    %609 = arith.addf %606, %608 : vector<2x128xf32>
    %610 = math.tanh %609 : vector<2x128xf32>
    %cst_180 = arith.constant 1.000000e+00 : f32
    %611 = vector.broadcast %cst_180 : f32 to vector<2x128xf32>
    %612 = arith.subf %611, %605 : vector<2x128xf32>
    %613 = arith.mulf %612, %610 : vector<2x128xf32>
    %614 = arith.mulf %605, %583 : vector<2x128xf32>
    %615 = arith.addf %613, %614 : vector<2x128xf32>
    %c8_i32_181 = arith.constant 8 : i32
    %c0_182 = arith.constant 0 : index
    %c0_183 = arith.constant 0 : index
    %616 = vector.load %arg7[%c0_182, %c0_183] : memref<128x4xf32, #tpu.memory_space<vmem>>, vector<128x4xf32>
    %cst_184 = arith.constant dense<0.000000e+00> : vector<2x4xf32>
    %617 = tpu.matmul %615, %616, %cst_184 {dimension_numbers = #tpu.dot_dimension_numbers<[1], [0], [0], [1], [0, 0, 1, 1], [], []>} : vector<2x128xf32>, vector<128x4xf32>, vector<2x4xf32> -> vector<2x4xf32>
    %c0_185 = arith.constant 0 : index
    %c0_186 = arith.constant 0 : index
    %618 = vector.load %arg8[%c0_185, %c0_186] : memref<1x4xf32, #tpu.memory_space<vmem>>, vector<1x4xf32>
    %619 = vector.broadcast %618 : vector<1x4xf32> to vector<2x4xf32>
    %620 = arith.addf %617, %619 : vector<2x4xf32>
    %c0_187 = arith.constant 0 : index
    %c0_188 = arith.constant 0 : index
    %621 = vector.load %arg9[%c0_187, %c0_188] : memref<2x4xf32, #tpu.memory_space<vmem>>, vector<2x4xf32>
    tpu.vector_store %arg9[%c0_187, %c0_188], %620 {strides = array<i32>} : memref<2x4xf32, #tpu.memory_space<vmem>>, vector<2x4xf32>,
    return
  }
}

</mosaic_0001>

<bundles_post_ra>
// kernel: gru_model_forward.1
= control target key start
LH: loop header
LB: loop body
LE: loop exit
PB: predicated region body
PF: predicated region fallthrough
CT: control target
= control target key end

     0   :  { %s5881_s0 = inlined_call_operand.vmem [shape: f32[8,2,384], index: 0, kind: input, shape index: {}]   ;;  %s5882_s1 = inlined_call_operand.vmem [shape: f32[128,384], index: 1, kind: input, shape index: {}]   ;;  %s5883_s2 = inlined_call_operand.vmem [shape: f32[1,384], index: 2, kind: input, shape index: {}]   ;;  %s5884_s3 = inlined_call_operand.vmem [shape: f32[128,384], index: 3, kind: input, shape index: {}]   ;;  %s5885_s4 = inlined_call_operand.vmem [shape: f32[1,384], index: 4, kind: input, shape index: {}]   ;;  %s5886_s5 = inlined_call_operand.vmem [shape: f32[128,384], index: 5, kind: input, shape index: {}]   ;;  %s5887_s6 = inlined_call_operand.vmem [shape: f32[1,384], index: 6, kind: input, shape index: {}]   ;;  %s5888_s7 = inlined_call_operand.vmem [shape: f32[128,4], index: 7, kind: input, shape index: {}]   ;;  %s5889_s8 = inlined_call_operand.vmem [shape: f32[1,4], index: 8, kind: input, shape index: {}]   ;;  %s5890_s9 = inlined_call_operand.hbm [shape: f32[2,4], index: 9, kind: output, shape index: {}]  }
   0x1   :  { %v3086_v0 = vld [vmem:[%s5882_s1 + $0x168] sm:$0xff]  ;;  %v3091_v1 = vld [vmem:[%s5882_s1 + $0x170] sm:$0xff]  ;;  %v3103_v3 = vld [vmem:[%s5882_s1 + $0x158] sm:$0xff] }
   0x2   :  { %v3096_v2 = vld [vmem:[%s5882_s1 + $0x150] sm:$0xff]  ;;  %90 = vmatpush.msra.mxu0 %v3086_v0  ;;  %110 = vmatpush.msra.mxu1 %v3091_v1  ;;  %v3108_v4 = vld [vmem:[%s5882_s1 + $0x138] sm:$0xff]  ;;  %v3113_v5 = vld [vmem:[%s5882_s1 + $0x140] sm:$0xff] }
   0x3   :  { %205 = vmatpush.msra.mxu3 %v3086_v0  ;;  %v3121_v6 = vld [vmem:[%s5882_s1 + $0x120] sm:$0xff]  ;;  %v3126_v7 = vld [vmem:[%s5882_s1 + $0x128] sm:$0xff]  ;;  %v3139_v9 = vld [vmem:[%s5882_s1 + $0x110] sm:$0xff] }
   0x4   :  { %91 = vmatpush.msra.mxu0 %v3096_v2  ;;  %111 = vmatpush.msra.mxu1 %v3103_v3  ;;  %v3134_v8 = vld [vmem:[%s5882_s1 + $0x108] sm:$0xff]  ;;  %v3147_v10 = vld [vmem:[%s5882_s1 + $0xf0] sm:$0xff]  ;;  %v3152_v11 = vld [vmem:[%s5882_s1 + $0xf8] sm:$0xff] }
   0x5   :  { %206 = vmatpush.msra.mxu3 %v3096_v2  ;;  %v3157_v12 = vld [vmem:[%s5882_s1 + $0x178] sm:$0xff]  ;;  %v3165_v13 = vld [vmem:[%s5882_s1 + $0x160] sm:$0xff]  ;;  %v3184_v16 = vld [vmem:[%s5882_s1 + $0x148] sm:$0xff] }
   0x6   :  { %92 = vmatpush.msra.mxu0 %v3108_v4  ;;  %112 = vmatpush.msra.mxu1 %v3113_v5  ;;  %v3170_v14 = vld [vmem:[%s5882_s1 + $0xd8] sm:$0xff]  ;;  %v3175_v15 = vld [vmem:[%s5882_s1 + $0xe0] sm:$0xff]  ;;  %v3194_v18 = vld [vmem:[%s5882_s1 + $0xc8] sm:$0xff] }
   0x7   :  { %207 = vmatpush.msra.mxu3 %v3108_v4  ;;  %130 = vmatpush.msra.mxu2 %v3157_v12  ;;  %v3189_v17 = vld [vmem:[%s5882_s1 + $0xc0] sm:$0xff]  ;;  %v3203_v19 = vld [vmem:[%s5882_s1 + $0x130] sm:$0xff]  ;;  %v3208_v20 = vld [vmem:[%s5882_s1 + $0xa8] sm:$0xff] }
   0x8   :  { %93 = vmatpush.msra.mxu0 %v3121_v6  ;;  %113 = vmatpush.msra.mxu1 %v3126_v7  ;;  %v3213_v21 = vld [vmem:[%s5882_s1 + $0xb0] sm:$0xff]  ;;  %v3222_v22 = vld [vmem:[%s5882_s1 + $0x118] sm:$0xff]  ;;  %v3241_v25 = vld [vmem:[%s5882_s1 + $0x100] sm:$0xff] }
   0x9   :  { %208 = vmatpush.msra.mxu3 %v3121_v6  ;;  %131 = vmatpush.msra.mxu2 %v3165_v13  ;;  %v3227_v23 = vld [vmem:[%s5882_s1 + $0x90] sm:$0xff]  ;;  %v3232_v24 = vld [vmem:[%s5882_s1 + $0x98] sm:$0xff] }
   0xa   :  { %94 = vmatpush.msra.mxu0 %v3134_v8  ;;  %114 = vmatpush.msra.mxu1 %v3139_v9 }
   0xb   :  { %209 = vmatpush.msra.mxu3 %v3134_v8  ;;  %132 = vmatpush.msra.mxu2 %v3184_v16 }
   0xc   :  { %95 = vmatpush.msra.mxu0 %v3147_v10  ;;  %115 = vmatpush.msra.mxu1 %v3152_v11 }
   0xd   :  { %210 = vmatpush.msra.mxu3 %v3147_v10  ;;  %133 = vmatpush.msra.mxu2 %v3203_v19 }
   0xe   :  { %96 = vmatpush.msra.mxu0 %v3170_v14  ;;  %116 = vmatpush.msra.mxu1 %v3175_v15 }
   0xf   :  { %211 = vmatpush.msra.mxu3 %v3170_v14 }
  0x10   :  { %97 = vmatpush.msra.mxu0 %v3189_v17  ;;  %117 = vmatpush.msra.mxu1 %v3194_v18 }
  0x11   :  { %212 = vmatpush.msra.mxu3 %v3189_v17 }
  0x12   :  { %98 = vmatpush.msra.mxu0 %v3208_v20  ;;  %118 = vmatpush.msra.mxu1 %v3213_v21 }
  0x13   :  { %14 = vsyncpa [#allocation5], 0  ;;  %v3246_v26 = vld [vmem:[%s5882_s1 + $0x78] sm:$0xff]  ;;  %v3251_v27 = vld [vmem:[%s5882_s1 + $0x80] sm:$0xff]  ;;  %134 = vmatpush.msra.mxu2 %v3222_v22  ;;  %213 = vmatpush.msra.mxu3 %v3208_v20  ;;  %v5891_v44 = vmov 0.0   ;;  %s3032_s21 = smov [#allocation4]  }
  0x14   :  { %99 = vmatpush.msra.mxu0 %v3227_v23  ;;  %119 = vmatpush.msra.mxu1 %v3232_v24  ;;  %v3260_v28 = vld [vmem:[%s5882_s1 + $0xe8] sm:$0xff]  ;;  %v3265_v29 = vld [vmem:[%s5882_s1 + $0x60] sm:$0xff]  ;;  %v3279_v31 = vld [vmem:[%s5882_s1 + $0xd0] sm:$0xff]  ;;  %s2647_s22 = sshll.u32 %s3032_s21, 4  ;;  %s2648_s22 = int_to_ptr.vmem [resolvable:$true] %s2647_s22 }
  0x15   :  { %v3270_v30 = vld [vmem:[%s5882_s1 + $0x68] sm:$0xff]  ;;  %135 = vmatpush.msra.mxu2 %v3241_v25  ;;  %214 = vmatpush.msra.mxu3 %v3227_v23  ;;  %v3289_v33 = vld [vmem:[%s5882_s1 + $0x50] sm:$0xff]  ;;  %v3298_v34 = vld [vmem:[%s5882_s1 + $0xb8] sm:$0xff] }
  0x16   :  { %100 = vmatpush.msra.mxu0 %v3246_v26  ;;  %120 = vmatpush.msra.mxu1 %v3251_v27  ;;  %v3284_v32 = vld [vmem:[%s5882_s1 + $0x48] sm:$0xff]  ;;  %v3303_v35 = vld [vmem:[%s5882_s1 + $0x30] sm:$0xff]  ;;  %v3308_v36 = vld [vmem:[%s5882_s1 + $0x38] sm:$0xff] }
  0x17   :  { %136 = vmatpush.msra.mxu2 %v3260_v28  ;;  %215 = vmatpush.msra.mxu3 %v3246_v26  ;;  %5964 = vst [vmem:[#allocation7_spill] sm:$0xff] %v3303_v35  ;;  %v3317_v37 = vld [vmem:[%s5882_s1 + $0xa0] sm:$0xff]  ;;  %v3322_v38 = vld [vmem:[%s5882_s1 + $0x18] sm:$0xff]  ;;  %v3336_v40 = vld [vmem:[%s5882_s1 + $0x88] sm:$0xff] }
  0x18   :  { %101 = vmatpush.msra.mxu0 %v3265_v29  ;;  %121 = vmatpush.msra.mxu1 %v3270_v30  ;;  %5965 = vst [vmem:[#allocation8_spill] sm:$0xff] %v3308_v36  ;;  %v3327_v39 = vld [vmem:[%s5882_s1 + $0x20] sm:$0xff]  ;;  %v3346_v42 = vld [vmem:[%s5882_s1 + $0x8] sm:$0xff]  ;;  %v3356_v43 = vld [vmem:[%s5882_s1 + $0x70] sm:$0xff] }
  0x19   :  { %137 = vmatpush.msra.mxu2 %v3279_v31  ;;  %216 = vmatpush.msra.mxu3 %v3265_v29  ;;  %5966 = vst [vmem:[#allocation9_spill] sm:$0xff] %v3322_v38  ;;  %v3341_v41 = vld [vmem:[%s5882_s1] sm:$0xff]  ;;  %v3366_v45 = vld [vmem:[%s5882_s1 + $0x58] sm:$0xff]  ;;  %v3382_v47 = vld [vmem:[%s5882_s1 + $0x28] sm:$0xff] }
  0x1a   :  { %102 = vmatpush.msra.mxu0 %v3284_v32  ;;  %122 = vmatpush.msra.mxu1 %v3289_v33  ;;  %5967 = vst [vmem:[#allocation10_spill] sm:$0xff] %v3327_v39  ;;  %v3373_v46 = vld [vmem:[%s5882_s1 + $0x40] sm:$0xff]  ;;  %v3391_v48 = vld [vmem:[%s5882_s1 + $0x10] sm:$0xff] }
  0x1b   :  { %138 = vmatpush.msra.mxu2 %v3298_v34  ;;  %217 = vmatpush.msra.mxu3 %v3284_v32  ;;  %5968 = vst [vmem:[#allocation11_spill] sm:$0xff] %v3341_v41  ;;  %v81_v49 = vld [vmem:[%s5883_s2] sm:$0x7]  ;;  %s2649_s2 = sshll.u32 %s5890_s9, 4  ;;  %s2650_s2 = int_to_ptr.hbm [resolvable:$true] %s2649_s2 }
  0x1c   :  { %103 = vmatpush.msra.mxu0 %v3303_v35  ;;  %123 = vmatpush.msra.mxu1 %v3308_v36  ;;  %5969 = vst [vmem:[#allocation12_spill] sm:$0xff] %v3346_v42  ;;  %v82_v50 = vld [vmem:[%s5881_s0] sm:$0x3f]  ;;  %v3508_v51 = vperm.slane %v81_v49, 0  ;;  %v3510_v52 = vperm.slane %v81_v49, 1 }
  0x1d   :  { %139 = vmatpush.msra.mxu2 %v3317_v37  ;;  %218 = vmatpush.msra.mxu3 %v3303_v35  ;;  %5970 = vst [vmem:[#allocation13_spill] sm:$0xff] %v3373_v46  ;;  %v171_v53 = vrot.slane %v82_v50, 2 }
  0x1e   :  { %104 = vmatpush.msra.mxu0 %v3322_v38  ;;  %124 = vmatpush.msra.mxu1 %v3327_v39  ;;  %5971 = vst [vmem:[#allocation14_spill] sm:$0xff] %v3382_v47 }
  0x1f   :  { %140 = vmatpush.msra.mxu2 %v3336_v40  ;;  %219 = vmatpush.msra.mxu3 %v3322_v38  ;;  %5972 = vst [vmem:[#allocation15_spill] sm:$0xff] %v3391_v48 }
  0x20   :  { %105 = vmatpush.msra.mxu0 %v3341_v41  ;;  %125 = vmatpush.msra.mxu1 %v3346_v42  ;;  %5973 = vst [vmem:[#allocation16_spill] sm:$0xff] %v3508_v51 }
  0x21   :  { %106 = vmatmul.f32.vlgmr.msra.gmra.mxu0 %v5891_v44  ;;  %126 = vmatmul.f32.vlgmr.msra.gmra.mxu1 %v5891_v44  ;;  %5974 = vst [vmem:[#allocation17_spill] sm:$0xff] %v3510_v52 }
  0x22   :  { %141 = vmatpush.msra.mxu2 %v3356_v43  ;;  %225 = vmatpush.msrb.mxu0 %v3091_v1 }
  0x23   :  { %245 = vmatpush.msrb.mxu1 %v3157_v12  ;;  %220 = vmatpush.msra.mxu3 %v3341_v41 }
  0x24   :  { %142 = vmatpush.msra.mxu2 %v3366_v45  ;;  %226 = vmatpush.msrb.mxu0 %v3103_v3 }
  0x25   :  { %246 = vmatpush.msrb.mxu1 %v3165_v13  ;;  %341 = vmatpush.msrb.mxu3 %v3091_v1 }
  0x26   :  { %143 = vmatpush.msra.mxu2 %v3373_v46  ;;  %227 = vmatpush.msrb.mxu0 %v3113_v5 }
  0x27   :  { %247 = vmatpush.msrb.mxu1 %v3184_v16  ;;  %342 = vmatpush.msrb.mxu3 %v3103_v3 }
  0x28   :  { %144 = vmatpush.msra.mxu2 %v3382_v47  ;;  %228 = vmatpush.msrb.mxu0 %v3126_v7 }
  0x29   :  { %248 = vmatpush.msrb.mxu1 %v3203_v19  ;;  %343 = vmatpush.msrb.mxu3 %v3113_v5 }
  0x2a   :  { %145 = vmatpush.msra.mxu2 %v3391_v48  ;;  %229 = vmatpush.msrb.mxu0 %v3139_v9 }
  0x2b   :  { %146 = vmatmul.f32.vlgmr.msra.gmra.mxu2 %v5891_v44  ;;  %249 = vmatpush.msrb.mxu1 %v3222_v22 }
  0x2c   :  { %230 = vmatpush.msrb.mxu0 %v3152_v11  ;;  %321 = vmatpush.msrb.mxu2 %v3086_v0 }
  0x2d   :  { %250 = vmatpush.msrb.mxu1 %v3241_v25  ;;  %344 = vmatpush.msrb.mxu3 %v3126_v7 }
  0x2e   :  { %231 = vmatpush.msrb.mxu0 %v3175_v15  ;;  %322 = vmatpush.msrb.mxu2 %v3096_v2 }
  0x2f   :  { %251 = vmatpush.msrb.mxu1 %v3260_v28  ;;  %345 = vmatpush.msrb.mxu3 %v3139_v9 }
  0x30   :  { %232 = vmatpush.msrb.mxu0 %v3194_v18  ;;  %323 = vmatpush.msrb.mxu2 %v3108_v4 }
  0x31   :  { %252 = vmatpush.msrb.mxu1 %v3279_v31  ;;  %346 = vmatpush.msrb.mxu3 %v3152_v11 }
  0x32   :  { %233 = vmatpush.msrb.mxu0 %v3213_v21  ;;  %324 = vmatpush.msrb.mxu2 %v3121_v6 }
  0x33   :  { %253 = vmatpush.msrb.mxu1 %v3298_v34  ;;  %347 = vmatpush.msrb.mxu3 %v3175_v15 }
  0x34   :  { %234 = vmatpush.msrb.mxu0 %v3232_v24  ;;  %325 = vmatpush.msrb.mxu2 %v3134_v8 }
  0x35   :  { %254 = vmatpush.msrb.mxu1 %v3317_v37  ;;  %348 = vmatpush.msrb.mxu3 %v3194_v18 }
  0x36   :  { %235 = vmatpush.msrb.mxu0 %v3251_v27  ;;  %326 = vmatpush.msrb.mxu2 %v3147_v10 }
  0x37   :  { %255 = vmatpush.msrb.mxu1 %v3336_v40  ;;  %349 = vmatpush.msrb.mxu3 %v3213_v21 }
  0x38   :  { %236 = vmatpush.msrb.mxu0 %v3270_v30  ;;  %327 = vmatpush.msrb.mxu2 %v3170_v14 }
  0x39   :  { %256 = vmatpush.msrb.mxu1 %v3356_v43  ;;  %350 = vmatpush.msrb.mxu3 %v3232_v24 }
  0x3a   :  { %237 = vmatpush.msrb.mxu0 %v3289_v33  ;;  %328 = vmatpush.msrb.mxu2 %v3189_v17 }
  0x3b   :  { %257 = vmatpush.msrb.mxu1 %v3366_v45  ;;  %351 = vmatpush.msrb.mxu3 %v3251_v27 }
  0x3c   :  { %238 = vmatpush.msrb.mxu0 %v3308_v36  ;;  %329 = vmatpush.msrb.mxu2 %v3208_v20 }
  0x3d   :  { %258 = vmatpush.msrb.mxu1 %v3373_v46  ;;  %352 = vmatpush.msrb.mxu3 %v3270_v30 }
  0x3e   :  { %239 = vmatpush.msrb.mxu0 %v3327_v39  ;;  %330 = vmatpush.msrb.mxu2 %v3227_v23 }
  0x3f   :  { %259 = vmatpush.msrb.mxu1 %v3382_v47  ;;  %353 = vmatpush.msrb.mxu3 %v3289_v33 }
  0x40   :  { %240 = vmatpush.msrb.mxu0 %v3346_v42  ;;  %331 = vmatpush.msrb.mxu2 %v3246_v26 }
  0x41   :  { %260 = vmatpush.msrb.mxu1 %v3391_v48  ;;  %354 = vmatpush.msrb.mxu3 %v3308_v36 }
  0x42   :  { %361 = vmatpush.msra.mxu0 %v3157_v12  ;;  %332 = vmatpush.msrb.mxu2 %v3265_v29 }
  0x43   :  { %437 = vmatpush.msra.mxu1 %v3086_v0  ;;  %355 = vmatpush.msrb.mxu3 %v3327_v39 }
  0x44   :  { %362 = vmatpush.msra.mxu0 %v3165_v13  ;;  %333 = vmatpush.msrb.mxu2 %v3284_v32 }
  0x45   :  { %438 = vmatpush.msra.mxu1 %v3096_v2  ;;  %356 = vmatpush.msrb.mxu3 %v3346_v42 }
  0x46   :  { %363 = vmatpush.msra.mxu0 %v3184_v16  ;;  %334 = vmatpush.msrb.mxu2 %v3303_v35 }
  0x47   :  { %439 = vmatpush.msra.mxu1 %v3108_v4 }
  0x48   :  { %364 = vmatpush.msra.mxu0 %v3203_v19  ;;  %335 = vmatpush.msrb.mxu2 %v3322_v38 }
  0x49   :  { %440 = vmatpush.msra.mxu1 %v3121_v6 }
  0x4a   :  { %365 = vmatpush.msra.mxu0 %v3222_v22  ;;  %336 = vmatpush.msrb.mxu2 %v3341_v41 }
  0x4b   :  { %441 = vmatpush.msra.mxu1 %v3134_v8 }
  0x4c   :  { %366 = vmatpush.msra.mxu0 %v3241_v25  ;;  %457 = vmatpush.msra.mxu2 %v3091_v1 }
  0x4d   :  { %442 = vmatpush.msra.mxu1 %v3147_v10 }
  0x4e   :  { %367 = vmatpush.msra.mxu0 %v3260_v28  ;;  %458 = vmatpush.msra.mxu2 %v3103_v3 }
  0x4f   :  { %443 = vmatpush.msra.mxu1 %v3170_v14 }
  0x50   :  { %368 = vmatpush.msra.mxu0 %v3279_v31  ;;  %459 = vmatpush.msra.mxu2 %v3113_v5 }
  0x51   :  { %444 = vmatpush.msra.mxu1 %v3189_v17 }
  0x52   :  { %369 = vmatpush.msra.mxu0 %v3298_v34  ;;  %460 = vmatpush.msra.mxu2 %v3126_v7 }
  0x53   :  { %445 = vmatpush.msra.mxu1 %v3208_v20 }
  0x54   :  { %370 = vmatpush.msra.mxu0 %v3317_v37  ;;  %461 = vmatpush.msra.mxu2 %v3139_v9 }
  0x55   :  { %446 = vmatpush.msra.mxu1 %v3227_v23 }
  0x56   :  { %371 = vmatpush.msra.mxu0 %v3336_v40  ;;  %462 = vmatpush.msra.mxu2 %v3152_v11 }
  0x57   :  { %447 = vmatpush.msra.mxu1 %v3246_v26 }
  0x58   :  { %372 = vmatpush.msra.mxu0 %v3356_v43  ;;  %463 = vmatpush.msra.mxu2 %v3175_v15 }
  0x59   :  { %448 = vmatpush.msra.mxu1 %v3265_v29 }
  0x5a   :  { %373 = vmatpush.msra.mxu0 %v3366_v45  ;;  %464 = vmatpush.msra.mxu2 %v3194_v18 }
  0x5b   :  { %449 = vmatpush.msra.mxu1 %v3284_v32 }
  0x5c   :  { %374 = vmatpush.msra.mxu0 %v3373_v46  ;;  %465 = vmatpush.msra.mxu2 %v3213_v21 }
  0x5d   :  { %450 = vmatpush.msra.mxu1 %v3303_v35 }
  0x5e   :  { %375 = vmatpush.msra.mxu0 %v3382_v47  ;;  %466 = vmatpush.msra.mxu2 %v3232_v24  ;;  %v3514_v47 = vperm.slane %v81_v49, 2 }
  0x5f   :  { %451 = vmatpush.msra.mxu1 %v3322_v38 }
  0x60   :  { %376 = vmatpush.msra.mxu0 %v3391_v48  ;;  %467 = vmatpush.msra.mxu2 %v3251_v27 }
  0x61   :  { %452 = vmatpush.msra.mxu1 %v3341_v41 }
  0x62   :  { %468 = vmatpush.msra.mxu2 %v3270_v30 }
  0x64   :  { %469 = vmatpush.msra.mxu2 %v3289_v33 }
  0x66   :  { %470 = vmatpush.msra.mxu2 %v3308_v36 }
  0x68   :  { %471 = vmatpush.msra.mxu2 %v3327_v39 }
  0x6a   :  { %472 = vmatpush.msra.mxu2 %v3346_v42 }
  0x9e   :  { %v107_v54 = vpop.f32.mrf.mxu0  ;;  %v127_v55 = vpop.f32.mrf.mxu1 }
  0x9f   :  { %v108_v56 = vadd.f32 %v107_v54, %v3508_v51  ;;  %v128_v57 = vadd.f32 %v127_v55, %v3510_v52  ;;  %v194_v51 = vrot.slane %v82_v50, 4 }
  0xa1   :  { %v150_v58 = vadd.f32 %v108_v56, %v82_v50  ;;  %v173_v59 = vadd.f32 %v171_v53, %v128_v57  ;;  %v5979_v50 = vld [vmem:[#allocation10_spill] sm:$0xff] }
  0xa3   :  { %v2658_v60 = vmul.f32 -1.442695, %v150_v58  ;;  %v2659_v61 = vmul.f32 -1.442695, %v173_v59 }
  0xa5   :  { %2700 = vpow2.f32 %v2658_v60 }
  0xa6   :  { %2702 = vpow2.f32 %v2659_v61 }
  0xab   :  { %v2701_v62 = vpop.eup %2700 }
  0xac   :  { %v2703_v63 = vpop.eup %2702  ;;  %v154_v44 = vadd.f32 1.0, %v2701_v62 }
  0xad   :  { %v177_v42 = vadd.f32 1.0, %v2703_v63 }
  0xae   :  { %2704 = vrcp.f32 %v154_v44  ;;  %v147_v56 = vpop.f32.mrf.mxu2  ;;  %v166_v53 = vand.u32 2147483648, %v154_v44  ;;  %v164_v58 = vand.u32 2147483647, %v154_v44  ;;  %vm160_vm1 = vweird.f32 %v154_v44 }
  0xaf   :  { %2706 = vrcp.f32 %v177_v42  ;;  %v148_v60 = vadd.f32 %v147_v56, %v3514_v47  ;;  %vm183_vm4 = vweird.f32 %v177_v42  ;;  %v187_v36 = vand.u32 2147483647, %v177_v42 }
  0xb0   :  { %v167_v62 = vor.u32 1.1754944e-38, %v166_v53  ;;  %vm165_vm3 = vcmp.eq.f32.partialorder %v164_v58, 8.507059e+37 }
  0xb1   :  { %vm188_vm7 = vcmp.eq.f32.partialorder %v187_v36, 8.507059e+37  ;;  %v5976_v36 = vld [vmem:[#allocation8_spill] sm:$0xff] }
  0xb4   :  { %v2705_v41 = vpop.eup %2704 }
  0xb5   :  { %v2707_v48 = vpop.eup %2706  ;;  %v156_v39 = vmul.f32 %v2705_v41, %v154_v44  ;;  %vm161_vm0 = vweird.f32 %v2705_v41 }
  0xb6   :  { %v179_v38 = vmul.f32 %v2707_v48, %v177_v42  ;;  %vm162_vm2 = vmor %vm160_vm1, %vm161_vm0  ;;  %vm184_vm5 = vweird.f32 %v2707_v48 }
  0xb7   :  { %v157_v54 = vsub.f32 1.0, %v156_v39  ;;  %vm185_vm6 = vmor %vm183_vm4, %vm184_vm5 }
  0xb8   :  { %v180_v55 = vsub.f32 1.0, %v179_v38  ;;  %v189_v38 = vand.u32 2147483648, %v177_v42  ;;  %v5977_v42 = vld [vmem:[#allocation14_spill] sm:$0xff] }
  0xb9   :  { %v158_v57 = vmul.f32 %v2705_v41, %v157_v54 }
  0xba   :  { %v181_v59 = vmul.f32 %v2707_v48, %v180_v55  ;;  %v190_v55 = vor.u32 1.1754944e-38, %v189_v38 }
  0xbb   :  { %v159_v61 = vadd.f32 %v2705_v41, %v158_v57 }
  0xbc   :  { %v182_v39 = vadd.f32 %v2707_v48, %v181_v59  ;;  %v5982_v59 = vld [vmem:[#allocation12_spill] sm:$0xff] }
  0xbd   :  { %v163_v63 = vsel %vm162_vm2, %v2705_v41, %v159_v61 }
  0xbe   :  { %v168_v49 = vsel %vm165_vm3, %v167_v62, %v163_v63  ;;  %v186_v35 = vsel %vm185_vm6, %v2707_v48, %v182_v39  ;;  %v5978_v48 = vld [vmem:[#allocation9_spill] sm:$0xff] }
  0xbf   :  { %v193_v52 = vmul.f32 %v168_v49, %v148_v60  ;;  %v191_v56 = vsel %vm188_vm7, %v190_v55, %v186_v35  ;;  %v5975_v35 = vld [vmem:[#allocation7_spill] sm:$0xff]  ;;  %v5983_v63 = vld [vmem:[#allocation17_spill] sm:$0xff]  ;;  %v5984_v55 = vld [vmem:[#allocation16_spill] sm:$0xff] }
  0xc0   :  { %v198_v44 = vsub.f32 1.0, %v191_v56  ;;  %v200_v41 = vmul.f32 0.0, %v191_v56  ;;  %v2660_v60 = vld [vmem:[%s5881_s0 + $0x6] sm:$0x3f] }
  0xc1   :  { %v196_v54 = vadd.f32 %v194_v51, %v193_v52  ;;  %v5980_v51 = vld [vmem:[#allocation15_spill] sm:$0xff]  ;;  %v286_v61 = vrot.slane %v2660_v60, 2 }
  0xc2   :  { %v5981_v52 = vld [vmem:[#allocation11_spill] sm:$0xff] }
  0xc3   :  { %2708 = vtanh.f32 %v196_v54 }
  0xc9   :  { %v2709_v57 = vpop.eup %2708 }
  0xca   :  { %v199_v53 = vmul.f32 %v2709_v57, %v198_v44 }
  0xcc   :  { %v3517_v58 = vadd.f32 %v200_v41, %v199_v53 }
  0xce   :  { %202 = vst [vmem:[#allocation2] sm:$0x3] %v3517_v58  ;;  %221 = vmatmul.f32.vlgmr.msra.gmra.mxu3 %v3517_v58  ;;  %241 = vmatmul.f32.vlgmr.msrb.gmra.mxu0 %v3517_v58 }
  0xcf   :  { %261 = vmatmul.f32.vlgmr.msrb.gmra.mxu1 %v3517_v58  ;;  %477 = vmatpush.msra.mxu3 %v3157_v12 }
  0xd0   :  { %553 = vmatpush.msrb.mxu0 %v3086_v0  ;;  %573 = vmatpush.msrb.mxu1 %v3091_v1 }
  0xd1   :  { %478 = vmatpush.msra.mxu3 %v3165_v13 }
  0xd2   :  { %554 = vmatpush.msrb.mxu0 %v3096_v2  ;;  %574 = vmatpush.msrb.mxu1 %v3103_v3 }
  0xd3   :  { %479 = vmatpush.msra.mxu3 %v3184_v16 }
  0xd4   :  { %555 = vmatpush.msrb.mxu0 %v3108_v4  ;;  %575 = vmatpush.msrb.mxu1 %v3113_v5 }
  0xd5   :  { %480 = vmatpush.msra.mxu3 %v3203_v19 }
  0xd6   :  { %556 = vmatpush.msrb.mxu0 %v3121_v6  ;;  %576 = vmatpush.msrb.mxu1 %v3126_v7 }
  0xd7   :  { %481 = vmatpush.msra.mxu3 %v3222_v22 }
  0xd8   :  { %557 = vmatpush.msrb.mxu0 %v3134_v8  ;;  %577 = vmatpush.msrb.mxu1 %v3139_v9 }
  0xd9   :  { %482 = vmatpush.msra.mxu3 %v3241_v25 }
  0xda   :  { %558 = vmatpush.msrb.mxu0 %v3147_v10  ;;  %578 = vmatpush.msrb.mxu1 %v3152_v11 }
  0xdb   :  { %483 = vmatpush.msra.mxu3 %v3260_v28 }
  0xdc   :  { %559 = vmatpush.msrb.mxu0 %v3170_v14  ;;  %579 = vmatpush.msrb.mxu1 %v3175_v15 }
  0xdd   :  { %484 = vmatpush.msra.mxu3 %v3279_v31 }
  0xde   :  { %560 = vmatpush.msrb.mxu0 %v3189_v17  ;;  %580 = vmatpush.msrb.mxu1 %v3194_v18 }
  0xdf   :  { %485 = vmatpush.msra.mxu3 %v3298_v34 }
  0xe0   :  { %561 = vmatpush.msrb.mxu0 %v3208_v20  ;;  %581 = vmatpush.msrb.mxu1 %v3213_v21 }
  0xe1   :  { %486 = vmatpush.msra.mxu3 %v3317_v37 }
  0xe2   :  { %562 = vmatpush.msrb.mxu0 %v3227_v23  ;;  %582 = vmatpush.msrb.mxu1 %v3232_v24 }
  0xe3   :  { %487 = vmatpush.msra.mxu3 %v3336_v40 }
  0xe4   :  { %563 = vmatpush.msrb.mxu0 %v3246_v26  ;;  %583 = vmatpush.msrb.mxu1 %v3251_v27 }
  0xe5   :  { %488 = vmatpush.msra.mxu3 %v3356_v43 }
  0xe6   :  { %564 = vmatpush.msrb.mxu0 %v3265_v29  ;;  %584 = vmatpush.msrb.mxu1 %v3270_v30 }
  0xe7   :  { %489 = vmatpush.msra.mxu3 %v3366_v45 }
  0xe8   :  { %565 = vmatpush.msrb.mxu0 %v3284_v32  ;;  %585 = vmatpush.msrb.mxu1 %v3289_v33 }
  0xe9   :  { %490 = vmatpush.msra.mxu3 %v3373_v46 }
  0xea   :  { %566 = vmatpush.msrb.mxu0 %v5975_v35  ;;  %586 = vmatpush.msrb.mxu1 %v5976_v36 }
  0xeb   :  { %491 = vmatpush.msra.mxu3 %v5977_v42 }
  0xec   :  { %567 = vmatpush.msrb.mxu0 %v5978_v48  ;;  %587 = vmatpush.msrb.mxu1 %v5979_v50 }
  0xed   :  { %492 = vmatpush.msra.mxu3 %v5980_v51 }
  0xee   :  { %568 = vmatpush.msrb.mxu0 %v5981_v52  ;;  %588 = vmatpush.msrb.mxu1 %v5982_v59 }
 0x14b   :  { %v242_v62 = vpop.f32.mrf.mxu0 }
 0x14c   :  { %v243_v49 = vadd.f32 %v242_v62, %v5983_v63 }
 0x14e   :  { %v288_v39 = vadd.f32 %v286_v61, %v243_v49 }
 0x150   :  { %v2662_v38 = vmul.f32 -1.442695, %v288_v39 }
 0x151   :  { %v222_v54 = vpop.f32.mrf.mxu3 }
 0x152   :  { %2710 = vpow2.f32 %v2662_v38  ;;  %v223_v56 = vadd.f32 %v222_v54, %v5984_v55 }
 0x154   :  { %v265_v44 = vadd.f32 %v2660_v60, %v223_v56  ;;  %v262_v56 = vpop.f32.mrf.mxu1 }
 0x156   :  { %v2661_v57 = vmul.f32 -1.442695, %v265_v44 }
 0x158   :  { %v2711_v53 = vpop.eup %2710  ;;  %2712 = vpow2.f32 %v2661_v57 }
 0x159   :  { %v292_v41 = vadd.f32 1.0, %v2711_v53  ;;  %v309_v53 = vrot.slane %v2660_v60, 4 }
 0x15b   :  { %2714 = vrcp.f32 %v292_v41  ;;  %vm298_vm13 = vweird.f32 %v292_v41 }
 0x15e   :  { %v2713_v59 = vpop.eup %2712 }
 0x15f   :  { %v269_v52 = vadd.f32 1.0, %v2713_v59  ;;  %v263_v59 = vadd.f32 %v262_v56, %v3514_v47 }
 0x161   :  { %2716 = vrcp.f32 %v269_v52  ;;  %v2715_v51 = vpop.eup %2714  ;;  %v281_v49 = vand.u32 2147483648, %v269_v52  ;;  %v279_v38 = vand.u32 2147483647, %v269_v52  ;;  %vm275_vm9 = vweird.f32 %v269_v52 }
 0x162   :  { %v294_v50 = vmul.f32 %v2715_v51, %v292_v41  ;;  %vm299_vm12 = vweird.f32 %v2715_v51 }
 0x163   :  { %v282_v57 = vor.u32 1.1754944e-38, %v281_v49  ;;  %vm280_vm11 = vcmp.eq.f32.partialorder %v279_v38, 8.507059e+37  ;;  %vm300_vm14 = vmor %vm298_vm13, %vm299_vm12 }
 0x164   :  { %v295_v62 = vsub.f32 1.0, %v294_v50  ;;  %v304_v50 = vand.u32 2147483648, %v292_v41 }
 0x166   :  { %v296_v54 = vmul.f32 %v2715_v51, %v295_v62  ;;  %v305_v46 = vor.u32 1.1754944e-38, %v304_v50 }
 0x167   :  { %v2717_v48 = vpop.eup %2716 }
 0x168   :  { %v271_v42 = vmul.f32 %v2717_v48, %v269_v52  ;;  %vm276_vm8 = vweird.f32 %v2717_v48  ;;  %v297_v36 = vadd.f32 %v2715_v51, %v296_v54 }
 0x169   :  { %vm277_vm10 = vmor %vm275_vm9, %vm276_vm8 }
 0x16a   :  { %v272_v61 = vsub.f32 1.0, %v271_v42  ;;  %v301_v62 = vsel %vm300_vm14, %v2715_v51, %v297_v36 }
 0x16c   :  { %v273_v39 = vmul.f32 %v2717_v48, %v272_v61  ;;  %v302_v61 = vand.u32 2147483647, %v292_v41  ;;  %v5995_v41 = vld [vmem:[#allocation17_spill] sm:$0xff] }
 0x16e   :  { %v274_v44 = vadd.f32 %v2717_v48, %v273_v39  ;;  %vm303_vm15 = vcmp.eq.f32.partialorder %v302_v61, 8.507059e+37 }
 0x16f   :  { %v306_v52 = vsel %vm303_vm15, %v305_v46, %v301_v62  ;;  %v5993_v46 = vld [vmem:[#allocation12_spill] sm:$0xff] }
 0x170   :  { %v278_v63 = vsel %vm277_vm10, %v2717_v48, %v274_v44  ;;  %v313_v49 = vsub.f32 1.0, %v306_v52  ;;  %v315_v48 = vmul.f32 %v306_v52, %v3517_v58  ;;  %v2663_v58 = vld [vmem:[%s5881_s0 + $0xc] sm:$0x3f] }
 0x171   :  { %v283_v55 = vsel %vm280_vm11, %v282_v57, %v278_v63  ;;  %v5994_v63 = vld [vmem:[#allocation16_spill] sm:$0xff] }
 0x172   :  { %v308_v42 = vmul.f32 %v283_v55, %v263_v59 }
 0x174   :  { %v311_v35 = vadd.f32 %v309_v53, %v308_v42 }
 0x176   :  { %2718 = vtanh.f32 %v311_v35  ;;  %v402_v35 = vrot.slane %v2663_v58, 2 }
 0x17c   :  { %v2719_v60 = vpop.eup %2718 }
 0x17d   :  { %v314_v39 = vmul.f32 %v2719_v60, %v313_v49 }
 0x17f   :  { %v3578_v38 = vadd.f32 %v315_v48, %v314_v39 }
 0x181   :  { %318 = vst [vmem:[#allocation2 + $0x2] sm:$0x3] %v3578_v38  ;;  %337 = vmatmul.f32.vlgmr.msrb.gmra.mxu2 %v3578_v38  ;;  %357 = vmatmul.f32.vlgmr.msrb.gmra.mxu3 %v3578_v38 }
 0x182   :  { %377 = vmatmul.f32.vlgmr.msra.gmra.mxu0 %v3578_v38  ;;  %593 = vmatpush.msrb.mxu2 %v3157_v12 }
 0x183   :  { %669 = vmatpush.msrb.mxu3 %v3086_v0  ;;  %689 = vmatpush.msra.mxu0 %v3091_v1  ;;  %v5985_v0 = vld [vmem:[#allocation13_spill] sm:$0xff]  ;;  %v5986_v1 = vld [vmem:[#allocation7_spill] sm:$0xff] }
 0x184   :  { %594 = vmatpush.msrb.mxu2 %v3165_v13 }
 0x185   :  { %670 = vmatpush.msrb.mxu3 %v3096_v2  ;;  %690 = vmatpush.msra.mxu0 %v3103_v3  ;;  %v5987_v2 = vld [vmem:[#allocation8_spill] sm:$0xff]  ;;  %v5988_v3 = vld [vmem:[#allocation14_spill] sm:$0xff] }
 0x186   :  { %595 = vmatpush.msrb.mxu2 %v3184_v16 }
 0x187   :  { %671 = vmatpush.msrb.mxu3 %v3108_v4  ;;  %691 = vmatpush.msra.mxu0 %v3113_v5  ;;  %v5989_v4 = vld [vmem:[#allocation9_spill] sm:$0xff]  ;;  %v5990_v5 = vld [vmem:[#allocation10_spill] sm:$0xff] }
 0x188   :  { %596 = vmatpush.msrb.mxu2 %v3203_v19 }
 0x189   :  { %672 = vmatpush.msrb.mxu3 %v3121_v6  ;;  %692 = vmatpush.msra.mxu0 %v3126_v7  ;;  %v5991_v6 = vld [vmem:[#allocation15_spill] sm:$0xff] }
 0x18a   :  { %597 = vmatpush.msrb.mxu2 %v3222_v22  ;;  %v5992_v7 = vld [vmem:[#allocation11_spill] sm:$0xff] }
 0x18b   :  { %673 = vmatpush.msrb.mxu3 %v3134_v8  ;;  %693 = vmatpush.msra.mxu0 %v3139_v9 }
 0x18c   :  { %598 = vmatpush.msrb.mxu2 %v3241_v25 }
 0x18d   :  { %674 = vmatpush.msrb.mxu3 %v3147_v10  ;;  %694 = vmatpush.msra.mxu0 %v3152_v11 }
 0x18e   :  { %599 = vmatpush.msrb.mxu2 %v3260_v28 }
 0x18f   :  { %675 = vmatpush.msrb.mxu3 %v3170_v14  ;;  %695 = vmatpush.msra.mxu0 %v3175_v15 }
 0x190   :  { %600 = vmatpush.msrb.mxu2 %v3279_v31 }
 0x191   :  { %676 = vmatpush.msrb.mxu3 %v3189_v17  ;;  %696 = vmatpush.msra.mxu0 %v3194_v18 }
 0x192   :  { %601 = vmatpush.msrb.mxu2 %v3298_v34 }
 0x193   :  { %677 = vmatpush.msrb.mxu3 %v3208_v20  ;;  %697 = vmatpush.msra.mxu0 %v3213_v21 }
 0x194   :  { %602 = vmatpush.msrb.mxu2 %v3317_v37 }
 0x195   :  { %678 = vmatpush.msrb.mxu3 %v3227_v23  ;;  %698 = vmatpush.msra.mxu0 %v3232_v24 }
 0x196   :  { %603 = vmatpush.msrb.mxu2 %v3336_v40 }
 0x197   :  { %679 = vmatpush.msrb.mxu3 %v3246_v26  ;;  %699 = vmatpush.msra.mxu0 %v3251_v27 }
 0x198   :  { %604 = vmatpush.msrb.mxu2 %v3356_v43 }
 0x199   :  { %680 = vmatpush.msrb.mxu3 %v3265_v29  ;;  %700 = vmatpush.msra.mxu0 %v3270_v30 }
 0x19a   :  { %605 = vmatpush.msrb.mxu2 %v3366_v45 }
 0x19b   :  { %681 = vmatpush.msrb.mxu3 %v3284_v32  ;;  %701 = vmatpush.msra.mxu0 %v3289_v33 }
 0x19c   :  { %606 = vmatpush.msrb.mxu2 %v5985_v0 }
 0x19d   :  { %682 = vmatpush.msrb.mxu3 %v5986_v1  ;;  %702 = vmatpush.msra.mxu0 %v5987_v2 }
 0x19e   :  { %607 = vmatpush.msrb.mxu2 %v5988_v3 }
 0x19f   :  { %683 = vmatpush.msrb.mxu3 %v5989_v4  ;;  %703 = vmatpush.msra.mxu0 %v5990_v5 }
 0x1a0   :  { %608 = vmatpush.msrb.mxu2 %v5991_v6 }
 0x1a1   :  { %684 = vmatpush.msrb.mxu3 %v5992_v7  ;;  %704 = vmatpush.msra.mxu0 %v5993_v46 }
 0x204   :  { %v338_v36 = vpop.f32.mrf.mxu2  ;;  %v358_v51 = vpop.f32.mrf.mxu3 }
 0x205   :  { %v339_v55 = vadd.f32 %v338_v36, %v5994_v63  ;;  %v359_v54 = vadd.f32 %v358_v51, %v5995_v41 }
 0x207   :  { %v381_v56 = vadd.f32 %v2663_v58, %v339_v55  ;;  %v404_v44 = vadd.f32 %v402_v35, %v359_v54  ;;  %v378_v55 = vpop.f32.mrf.mxu0 }
 0x209   :  { %v2664_v57 = vmul.f32 -1.442695, %v381_v56  ;;  %v2665_v53 = vmul.f32 -1.442695, %v404_v44 }
 0x20b   :  { %2720 = vpow2.f32 %v2664_v57  ;;  %v379_v57 = vadd.f32 %v378_v55, %v3514_v47 }
 0x20c   :  { %2722 = vpow2.f32 %v2665_v53 }
 0x211   :  { %v2721_v59 = vpop.eup %2720 }
 0x212   :  { %v2723_v50 = vpop.eup %2722  ;;  %v385_v42 = vadd.f32 1.0, %v2721_v59  ;;  %v425_v59 = vrot.slane %v2663_v58, 4 }
 0x213   :  { %v408_v61 = vadd.f32 1.0, %v2723_v50 }
 0x214   :  { %2724 = vrcp.f32 %v385_v42  ;;  %v397_v48 = vand.u32 2147483648, %v385_v42  ;;  %v395_v35 = vand.u32 2147483647, %v385_v42  ;;  %vm391_vm1 = vweird.f32 %v385_v42 }
 0x215   :  { %2726 = vrcp.f32 %v408_v61  ;;  %v420_v63 = vand.u32 2147483648, %v408_v61  ;;  %vm414_vm5 = vweird.f32 %v408_v61 }
 0x216   :  { %v398_v44 = vor.u32 1.1754944e-38, %v397_v48  ;;  %vm396_vm3 = vcmp.eq.f32.partialorder %v395_v35, 8.507059e+37 }
 0x21a   :  { %v2725_v62 = vpop.eup %2724 }
 0x21b   :  { %v2727_v52 = vpop.eup %2726  ;;  %v387_v49 = vmul.f32 %v2725_v62, %v385_v42  ;;  %vm392_vm0 = vweird.f32 %v2725_v62 }
 0x21c   :  { %v410_v60 = vmul.f32 %v2727_v52, %v408_v61  ;;  %vm393_vm2 = vmor %vm391_vm1, %vm392_vm0  ;;  %vm415_vm4 = vweird.f32 %v2727_v52 }
 0x21d   :  { %v388_v39 = vsub.f32 1.0, %v387_v49  ;;  %vm416_vm6 = vmor %vm414_vm5, %vm415_vm4 }
 0x21e   :  { %v411_v36 = vsub.f32 1.0, %v410_v60  ;;  %v418_v60 = vand.u32 2147483647, %v408_v61  ;;  %v3694_v61 = vld [vmem:[%s5882_s1 + $0x128] sm:$0xff] }
 0x21f   :  { %v389_v51 = vmul.f32 %v2725_v62, %v388_v39 }
 0x220   :  { %v412_v54 = vmul.f32 %v2727_v52, %v411_v36  ;;  %v421_v36 = vor.u32 1.1754944e-38, %v420_v63  ;;  %vm419_vm7 = vcmp.eq.f32.partialorder %v418_v60, 8.507059e+37  ;;  %v3668_v63 = vld [vmem:[%s5882_s1 + $0x158] sm:$0xff] }
 0x221   :  { %v390_v56 = vadd.f32 %v2725_v62, %v389_v51 }
 0x222   :  { %v413_v41 = vadd.f32 %v2727_v52, %v412_v54 }
 0x223   :  { %v394_v53 = vsel %vm393_vm2, %v2725_v62, %v390_v56 }
 0x224   :  { %v399_v50 = vsel %vm396_vm3, %v398_v44, %v394_v53  ;;  %v417_v46 = vsel %vm416_vm6, %v2727_v52, %v413_v41  ;;  %v3681_v41 = vld [vmem:[%s5882_s1 + $0x140] sm:$0xff] }
 0x225   :  { %v424_v49 = vmul.f32 %v399_v50, %v379_v57  ;;  %v422_v42 = vsel %vm419_vm7, %v421_v36, %v417_v46  ;;  %v3649_v46 = vld [vmem:[%s5882_s1 + $0x168] sm:$0xff]  ;;  %v3757_v36 = vld [vmem:[%s5882_s1 + $0x160] sm:$0xff] }
 0x226   :  { %v429_v48 = vsub.f32 1.0, %v422_v42  ;;  %v431_v62 = vmul.f32 %v422_v42, %v3578_v38  ;;  %v3655_v38 = vld [vmem:[%s5882_s1 + $0x170] sm:$0xff]  ;;  %v3765_v42 = vld [vmem:[%s5882_s1 + $0x148] sm:$0xff] }
 0x227   :  { %v427_v39 = vadd.f32 %v425_v59, %v424_v49 }
 0x229   :  { %2728 = vtanh.f32 %v427_v39  ;;  %v3749_v39 = vld [vmem:[%s5882_s1 + $0x178] sm:$0xff] }
 0x22f   :  { %v2729_v51 = vpop.eup %2728 }
 0x230   :  { %v430_v55 = vmul.f32 %v2729_v51, %v429_v48  ;;  %v3773_v48 = vld [vmem:[%s5882_s1 + $0x130] sm:$0xff]  ;;  %v3781_v51 = vld [vmem:[%s5882_s1 + $0x118] sm:$0xff] }
 0x232   :  { %v3639_v58 = vadd.f32 %v431_v62, %v430_v55  ;;  %v2873_v55 = vld [vmem:[%s5882_s1 + $0x108] sm:$0xff]  ;;  %v2874_v62 = vld [vmem:[%s5882_s1 + $0x110] sm:$0xff] }
 0x234   :  { %434 = vst [vmem:[#allocation2 + $0x4] sm:$0x3] %v3639_v58  ;;  %453 = vmatmul.f32.vlgmr.msra.gmra.mxu1 %v3639_v58  ;;  %473 = vmatmul.f32.vlgmr.msra.gmra.mxu2 %v3639_v58 }
 0x235   :  { %493 = vmatmul.f32.vlgmr.msra.gmra.mxu3 %v3639_v58  ;;  %709 = vmatpush.msra.mxu1 %v3157_v12  ;;  %v3662_v12 = vld [vmem:[%s5882_s1 + $0x150] sm:$0xff] }
 0x236   :  { %785 = vmatpush.msra.mxu2 %v3649_v46  ;;  %805 = vmatpush.msra.mxu3 %v3655_v38 }
 0x237   :  { %710 = vmatpush.msra.mxu1 %v3165_v13  ;;  %v3675_v13 = vld [vmem:[%s5882_s1 + $0x138] sm:$0xff] }
 0x238   :  { %786 = vmatpush.msra.mxu2 %v3662_v12  ;;  %806 = vmatpush.msra.mxu3 %v3668_v63 }
 0x239   :  { %711 = vmatpush.msra.mxu1 %v3184_v16  ;;  %v3688_v16 = vld [vmem:[%s5882_s1 + $0x120] sm:$0xff] }
 0x23a   :  { %787 = vmatpush.msra.mxu2 %v3675_v13  ;;  %807 = vmatpush.msra.mxu3 %v3681_v41 }
 0x23b   :  { %712 = vmatpush.msra.mxu1 %v3203_v19 }
 0x23c   :  { %788 = vmatpush.msra.mxu2 %v3688_v16  ;;  %808 = vmatpush.msra.mxu3 %v3694_v61 }
 0x23d   :  { %713 = vmatpush.msra.mxu1 %v3222_v22 }
 0x23e   :  { %789 = vmatpush.msra.mxu2 %v3134_v8  ;;  %809 = vmatpush.msra.mxu3 %v3139_v9  ;;  %v5996_v8 = vld [vmem:[#allocation12_spill] sm:$0xff]  ;;  %v2666_v9 = vld [vmem:[%s5881_s0 + $0x12] sm:$0x3f] }
 0x23f   :  { %714 = vmatpush.msra.mxu1 %v3241_v25 }
 0x240   :  { %790 = vmatpush.msra.mxu2 %v3147_v10  ;;  %810 = vmatpush.msra.mxu3 %v3152_v11  ;;  %v5997_v11 = vld [vmem:[#allocation16_spill] sm:$0xff] }
 0x241   :  { %715 = vmatpush.msra.mxu1 %v3260_v28 }
 0x242   :  { %791 = vmatpush.msra.mxu2 %v3170_v14  ;;  %811 = vmatpush.msra.mxu3 %v3175_v15 }
 0x243   :  { %716 = vmatpush.msra.mxu1 %v3279_v31 }
 0x244   :  { %792 = vmatpush.msra.mxu2 %v3189_v17  ;;  %812 = vmatpush.msra.mxu3 %v3194_v18  ;;  %v518_v18 = vrot.slane %v2666_v9, 2 }
 0x245   :  { %717 = vmatpush.msra.mxu1 %v3298_v34 }
 0x246   :  { %793 = vmatpush.msra.mxu2 %v3208_v20  ;;  %813 = vmatpush.msra.mxu3 %v3213_v21  ;;  %v5998_v20 = vld [vmem:[#allocation17_spill] sm:$0xff] }
 0x247   :  { %718 = vmatpush.msra.mxu1 %v3317_v37 }
 0x248   :  { %794 = vmatpush.msra.mxu2 %v3227_v23  ;;  %814 = vmatpush.msra.mxu3 %v3232_v24 }
 0x249   :  { %719 = vmatpush.msra.mxu1 %v3336_v40 }
 0x24a   :  { %795 = vmatpush.msra.mxu2 %v3246_v26  ;;  %815 = vmatpush.msra.mxu3 %v3251_v27 }
 0x24b   :  { %720 = vmatpush.msra.mxu1 %v3356_v43 }
 0x24c   :  { %796 = vmatpush.msra.mxu2 %v3265_v29  ;;  %816 = vmatpush.msra.mxu3 %v3270_v30 }
 0x24d   :  { %721 = vmatpush.msra.mxu1 %v3366_v45 }
 0x24e   :  { %797 = vmatpush.msra.mxu2 %v3284_v32  ;;  %817 = vmatpush.msra.mxu3 %v3289_v33 }
 0x24f   :  { %722 = vmatpush.msra.mxu1 %v5985_v0  ;;  %v541_v0 = vrot.slane %v2666_v9, 4 }
 0x250   :  { %798 = vmatpush.msra.mxu2 %v5986_v1  ;;  %818 = vmatpush.msra.mxu3 %v5987_v2 }
 0x251   :  { %723 = vmatpush.msra.mxu1 %v5988_v3 }
 0x252   :  { %799 = vmatpush.msra.mxu2 %v5989_v4  ;;  %819 = vmatpush.msra.mxu3 %v5990_v5 }
 0x253   :  { %724 = vmatpush.msra.mxu1 %v5991_v6 }
 0x254   :  { %800 = vmatpush.msra.mxu2 %v5992_v7  ;;  %820 = vmatpush.msra.mxu3 %v5996_v8  ;;  %v3829_v8 = vld [vmem:[%s5882_s1 + $0xb8] sm:$0xff] }
 0x2b1   :  { %v454_v10 = vpop.f32.mrf.mxu1 }
 0x2b2   :  { %v455_v14 = vadd.f32 %v454_v10, %v5997_v11  ;;  %v2886_v10 = vld [vmem:[%s5882_s1 + $0xb0] sm:$0xff] }
 0x2b4   :  { %v497_v15 = vadd.f32 %v2666_v9, %v455_v14  ;;  %v2885_v9 = vld [vmem:[%s5882_s1 + $0xa8] sm:$0xff]  ;;  %v3841_v14 = vld [vmem:[%s5882_s1 + $0xa0] sm:$0xff] }
 0x2b6   :  { %v2667_v17 = vmul.f32 -1.442695, %v497_v15  ;;  %v2888_v15 = vld [vmem:[%s5882_s1 + $0x90] sm:$0xff] }
 0x2b7   :  { %v474_v19 = vpop.f32.mrf.mxu2 }
 0x2b8   :  { %2730 = vpow2.f32 %v2667_v17  ;;  %v475_v21 = vadd.f32 %v474_v19, %v5998_v20  ;;  %v494_v37 = vpop.f32.mrf.mxu3  ;;  %v2889_v17 = vld [vmem:[%s5882_s1 + $0x98] sm:$0xff] }
 0x2b9   :  { %v495_v2 = vadd.f32 %v494_v37, %v3514_v47  ;;  %v2891_v19 = vld [vmem:[%s5882_s1 + $0x78] sm:$0xff]  ;;  %v2906_v37 = vld [vmem:[%s5882_s1] sm:$0xff] }
 0x2ba   :  { %v520_v22 = vadd.f32 %v518_v18, %v475_v21  ;;  %v3853_v18 = vld [vmem:[%s5882_s1 + $0x88] sm:$0xff]  ;;  %v2892_v21 = vld [vmem:[%s5882_s1 + $0x80] sm:$0xff] }
 0x2bc   :  { %v2668_v23 = vmul.f32 -1.442695, %v520_v22  ;;  %v3865_v22 = vld [vmem:[%s5882_s1 + $0x70] sm:$0xff] }
 0x2be   :  { %v2731_v24 = vpop.eup %2730  ;;  %2732 = vpow2.f32 %v2668_v23  ;;  %v2894_v23 = vld [vmem:[%s5882_s1 + $0x60] sm:$0xff] }
 0x2bf   :  { %v501_v25 = vadd.f32 1.0, %v2731_v24  ;;  %v2895_v24 = vld [vmem:[%s5882_s1 + $0x68] sm:$0xff] }
 0x2c1   :  { %2734 = vrcp.f32 %v501_v25  ;;  %v513_v31 = vand.u32 2147483648, %v501_v25  ;;  %v511_v33 = vand.u32 2147483647, %v501_v25  ;;  %vm507_vm9 = vweird.f32 %v501_v25 }
 0x2c3   :  { %v514_v45 = vor.u32 1.1754944e-38, %v513_v31  ;;  %vm512_vm11 = vcmp.eq.f32.partialorder %v511_v33, 8.507059e+37  ;;  %v3901_v31 = vld [vmem:[%s5882_s1 + $0x28] sm:$0xff]  ;;  %v2904_v33 = vld [vmem:[%s5882_s1 + $0x20] sm:$0xff] }
 0x2c4   :  { %v2733_v26 = vpop.eup %2732 }
 0x2c5   :  { %v524_v27 = vadd.f32 1.0, %v2733_v26  ;;  %v2897_v26 = vld [vmem:[%s5882_s1 + $0x48] sm:$0xff] }
 0x2c7   :  { %v2735_v28 = vpop.eup %2734  ;;  %2736 = vrcp.f32 %v524_v27  ;;  %v536_v6 = vand.u32 2147483648, %v524_v27  ;;  %v534_v52 = vand.u32 2147483647, %v524_v27  ;;  %vm530_vm13 = vweird.f32 %v524_v27 }
 0x2c8   :  { %v503_v29 = vmul.f32 %v2735_v28, %v501_v25  ;;  %vm508_vm8 = vweird.f32 %v2735_v28  ;;  %v3877_v25 = vld [vmem:[%s5882_s1 + $0x58] sm:$0xff] }
 0x2c9   :  { %vm509_vm10 = vmor %vm507_vm9, %vm508_vm8  ;;  %v537_v56 = vor.u32 1.1754944e-38, %v536_v6  ;;  %vm535_vm15 = vcmp.eq.f32.partialorder %v534_v52, 8.507059e+37 }
 0x2ca   :  { %v504_v30 = vsub.f32 1.0, %v503_v29  ;;  %v2900_v29 = vld [vmem:[%s5882_s1 + $0x30] sm:$0xff] }
 0x2cc   :  { %v505_v32 = vmul.f32 %v2735_v28, %v504_v30  ;;  %v2901_v30 = vld [vmem:[%s5882_s1 + $0x38] sm:$0xff] }
 0x2cd   :  { %v2737_v34 = vpop.eup %2736 }
 0x2ce   :  { %v526_v40 = vmul.f32 %v2737_v34, %v524_v27  ;;  %v506_v43 = vadd.f32 %v2735_v28, %v505_v32  ;;  %vm531_vm12 = vweird.f32 %v2737_v34  ;;  %v2898_v27 = vld [vmem:[%s5882_s1 + $0x50] sm:$0xff]  ;;  %v2903_v32 = vld [vmem:[%s5882_s1 + $0x18] sm:$0xff] }
 0x2cf   :  { %vm532_vm14 = vmor %vm530_vm13, %vm531_vm12 }
 0x2d0   :  { %v527_v1 = vsub.f32 1.0, %v526_v40  ;;  %v510_v3 = vsel %vm509_vm10, %v2735_v28, %v506_v43  ;;  %v3889_v28 = vld [vmem:[%s5882_s1 + $0x40] sm:$0xff]  ;;  %v2907_v40 = vld [vmem:[%s5882_s1 + $0x8] sm:$0xff]  ;;  %v2669_v43 = vld [vmem:[%s5881_s0 + $0x18] sm:$0x3f] }
 0x2d1   :  { %v515_v4 = vsel %vm512_vm11, %v514_v45, %v510_v3  ;;  %v634_v45 = vrot.slane %v2669_v43, 2 }
 0x2d2   :  { %v528_v5 = vmul.f32 %v2737_v34, %v527_v1  ;;  %v540_v7 = vmul.f32 %v515_v4, %v495_v2 }
 0x2d4   :  { %v529_v35 = vadd.f32 %v2737_v34, %v528_v5  ;;  %v543_v54 = vadd.f32 %v541_v0, %v540_v7 }
 0x2d6   :  { %v533_v44 = vsel %vm532_vm14, %v2737_v34, %v529_v35  ;;  %2738 = vtanh.f32 %v543_v54  ;;  %v3913_v34 = vld [vmem:[%s5882_s1 + $0x10] sm:$0xff] }
 0x2d7   :  { %v538_v57 = vsel %vm535_vm15, %v537_v56, %v533_v44 }
 0x2d8   :  { %v545_v53 = vsub.f32 1.0, %v538_v57  ;;  %v547_v49 = vmul.f32 %v538_v57, %v3639_v58  ;;  %v3793_v58 = vld [vmem:[%s5882_s1 + $0x100] sm:$0xff] }
 0x2dc   :  { %v2739_v59 = vpop.eup %2738 }
 0x2dd   :  { %v546_v50 = vmul.f32 %v2739_v59, %v545_v53 }
 0x2df   :  { %v3740_v60 = vadd.f32 %v547_v49, %v546_v50 }
 0x2e1   :  { %550 = vst [vmem:[#allocation2 + $0x6] sm:$0x3] %v3740_v60  ;;  %569 = vmatmul.f32.vlgmr.msrb.gmra.mxu0 %v3740_v60  ;;  %589 = vmatmul.f32.vlgmr.msrb.gmra.mxu1 %v3740_v60 }
 0x2e2   :  { %609 = vmatmul.f32.vlgmr.msrb.gmra.mxu2 %v3740_v60  ;;  %825 = vmatpush.msrb.mxu0 %v3749_v39 }
 0x2e3   :  { %901 = vmatpush.msrb.mxu1 %v3649_v46  ;;  %921 = vmatpush.msrb.mxu2 %v3655_v38  ;;  %v2876_v46 = vld [vmem:[%s5882_s1 + $0xf0] sm:$0xff]  ;;  %v2877_v38 = vld [vmem:[%s5882_s1 + $0xf8] sm:$0xff] }
 0x2e4   :  { %826 = vmatpush.msrb.mxu0 %v3757_v36 }
 0x2e5   :  { %902 = vmatpush.msrb.mxu1 %v3662_v12  ;;  %922 = vmatpush.msrb.mxu2 %v3668_v63  ;;  %v3805_v12 = vld [vmem:[%s5882_s1 + $0xe8] sm:$0xff]  ;;  %v2879_v63 = vld [vmem:[%s5882_s1 + $0xd8] sm:$0xff] }
 0x2e6   :  { %827 = vmatpush.msrb.mxu0 %v3765_v42 }
 0x2e7   :  { %903 = vmatpush.msrb.mxu1 %v3675_v13  ;;  %923 = vmatpush.msrb.mxu2 %v3681_v41  ;;  %v2880_v13 = vld [vmem:[%s5882_s1 + $0xe0] sm:$0xff]  ;;  %v3817_v41 = vld [vmem:[%s5882_s1 + $0xd0] sm:$0xff] }
 0x2e8   :  { %828 = vmatpush.msrb.mxu0 %v3773_v48 }
 0x2e9   :  { %904 = vmatpush.msrb.mxu1 %v3688_v16  ;;  %924 = vmatpush.msrb.mxu2 %v3694_v61  ;;  %v2882_v16 = vld [vmem:[%s5882_s1 + $0xc0] sm:$0xff]  ;;  %v2883_v61 = vld [vmem:[%s5882_s1 + $0xc8] sm:$0xff] }
 0x2ea   :  { %829 = vmatpush.msrb.mxu0 %v3781_v51 }
 0x2eb   :  { %905 = vmatpush.msrb.mxu1 %v2873_v55  ;;  %925 = vmatpush.msrb.mxu2 %v2874_v62 }
 0x2ec   :  { %830 = vmatpush.msrb.mxu0 %v3793_v58 }
 0x2ed   :  { %906 = vmatpush.msrb.mxu1 %v2876_v46  ;;  %926 = vmatpush.msrb.mxu2 %v2877_v38 }
 0x2ee   :  { %831 = vmatpush.msrb.mxu0 %v3805_v12 }
 0x2ef   :  { %907 = vmatpush.msrb.mxu1 %v2879_v63  ;;  %927 = vmatpush.msrb.mxu2 %v2880_v13 }
 0x2f0   :  { %832 = vmatpush.msrb.mxu0 %v3817_v41 }
 0x2f1   :  { %908 = vmatpush.msrb.mxu1 %v2882_v16  ;;  %928 = vmatpush.msrb.mxu2 %v2883_v61 }
 0x2f2   :  { %833 = vmatpush.msrb.mxu0 %v3829_v8 }
 0x2f3   :  { %909 = vmatpush.msrb.mxu1 %v2885_v9  ;;  %929 = vmatpush.msrb.mxu2 %v2886_v10  ;;  %v657_v10 = vrot.slane %v2669_v43, 4 }
 0x2f4   :  { %834 = vmatpush.msrb.mxu0 %v3841_v14 }
 0x2f5   :  { %910 = vmatpush.msrb.mxu1 %v2888_v15  ;;  %930 = vmatpush.msrb.mxu2 %v2889_v17 }
 0x2f6   :  { %835 = vmatpush.msrb.mxu0 %v3853_v18 }
 0x2f7   :  { %911 = vmatpush.msrb.mxu1 %v2891_v19  ;;  %931 = vmatpush.msrb.mxu2 %v2892_v21 }
 0x2f8   :  { %836 = vmatpush.msrb.mxu0 %v3865_v22 }
 0x2f9   :  { %912 = vmatpush.msrb.mxu1 %v2894_v23  ;;  %932 = vmatpush.msrb.mxu2 %v2895_v24 }
 0x2fa   :  { %837 = vmatpush.msrb.mxu0 %v3877_v25 }
 0x2fb   :  { %913 = vmatpush.msrb.mxu1 %v2897_v26  ;;  %933 = vmatpush.msrb.mxu2 %v2898_v27 }
 0x2fc   :  { %838 = vmatpush.msrb.mxu0 %v3889_v28 }
 0x2fd   :  { %914 = vmatpush.msrb.mxu1 %v2900_v29  ;;  %934 = vmatpush.msrb.mxu2 %v2901_v30 }
 0x2fe   :  { %839 = vmatpush.msrb.mxu0 %v3901_v31 }
 0x2ff   :  { %915 = vmatpush.msrb.mxu1 %v2903_v32  ;;  %935 = vmatpush.msrb.mxu2 %v2904_v33 }
 0x300   :  { %840 = vmatpush.msrb.mxu0 %v3913_v34 }
 0x301   :  { %916 = vmatpush.msrb.mxu1 %v2906_v37  ;;  %936 = vmatpush.msrb.mxu2 %v2907_v40 }
 0x35e   :  { %v570_v0 = vpop.f32.mrf.mxu0  ;;  %v590_v1 = vpop.f32.mrf.mxu1 }
 0x35f   :  { %v571_v2 = vadd.f32 %v570_v0, %v5997_v11  ;;  %v591_v3 = vadd.f32 %v590_v1, %v5998_v20  ;;  %v4022_v0 = vld [vmem:[%s5884_s3 + $0x78] sm:$0xff] }
 0x361   :  { %v613_v4 = vadd.f32 %v2669_v43, %v571_v2  ;;  %v636_v5 = vadd.f32 %v634_v45, %v591_v3  ;;  %v4015_v43 = vld [vmem:[%s5884_s3 + $0x90] sm:$0xff]  ;;  %v4028_v2 = vld [vmem:[%s5884_s3 + $0x60] sm:$0xff] }
 0x363   :  { %v2670_v6 = vmul.f32 -1.442695, %v613_v4  ;;  %v2671_v7 = vmul.f32 -1.442695, %v636_v5  ;;  %v4034_v4 = vld [vmem:[%s5884_s3 + $0x48] sm:$0xff] }
 0x365   :  { %2740 = vpow2.f32 %v2670_v6  ;;  %v610_v63 = vpop.f32.mrf.mxu2  ;;  %v4042_v6 = vld [vmem:[%s5884_s3 + $0x30] sm:$0xff] }
 0x366   :  { %2742 = vpow2.f32 %v2671_v7  ;;  %v611_v61 = vadd.f32 %v610_v63, %v3514_v47  ;;  %v4049_v7 = vld [vmem:[%s5884_s3 + $0x18] sm:$0xff] }
 0x367   :  { %5999 = vst [vmem:[#allocation13_spill] sm:$0xff] %v4049_v7 }
 0x36b   :  { %v2741_v52 = vpop.eup %2740 }
 0x36c   :  { %v2743_v35 = vpop.eup %2742  ;;  %v617_v54 = vadd.f32 1.0, %v2741_v52 }
 0x36d   :  { %v640_v56 = vadd.f32 1.0, %v2743_v35  ;;  %v4055_v35 = vld [vmem:[%s5884_s3] sm:$0xff] }
 0x36e   :  { %2744 = vrcp.f32 %v617_v54  ;;  %v629_v55 = vand.u32 2147483648, %v617_v54  ;;  %v627_v46 = vand.u32 2147483647, %v617_v54  ;;  %vm623_vm1 = vweird.f32 %v617_v54  ;;  %6000 = vst [vmem:[#allocation7_spill] sm:$0xff] %v4055_v35 }
 0x36f   :  { %2746 = vrcp.f32 %v640_v56  ;;  %v652_v19 = vand.u32 2147483648, %v640_v56  ;;  %vm646_vm5 = vweird.f32 %v640_v56  ;;  %v650_v23 = vand.u32 2147483647, %v640_v56 }
 0x370   :  { %v630_v16 = vor.u32 1.1754944e-38, %v629_v55  ;;  %vm628_vm3 = vcmp.eq.f32.partialorder %v627_v46, 8.507059e+37 }
 0x371   :  { %v653_v27 = vor.u32 1.1754944e-38, %v652_v19  ;;  %vm651_vm7 = vcmp.eq.f32.partialorder %v650_v23, 8.507059e+37 }
 0x374   :  { %v2745_v44 = vpop.eup %2744 }
 0x375   :  { %v2747_v57 = vpop.eup %2746  ;;  %v619_v53 = vmul.f32 %v2745_v44, %v617_v54  ;;  %vm624_vm0 = vweird.f32 %v2745_v44 }
 0x376   :  { %v642_v59 = vmul.f32 %v2747_v57, %v640_v56  ;;  %vm625_vm2 = vmor %vm623_vm1, %vm624_vm0  ;;  %vm647_vm4 = vweird.f32 %v2747_v57  ;;  %v4062_v56 = vld [vmem:[%s5884_s3 + $0x170] sm:$0xff] }
 0x377   :  { %v620_v50 = vsub.f32 1.0, %v619_v53  ;;  %vm648_vm6 = vmor %vm646_vm5, %vm647_vm4 }
 0x378   :  { %v643_v49 = vsub.f32 1.0, %v642_v59  ;;  %v4075_v59 = vld [vmem:[%s5884_s3 + $0x140] sm:$0xff] }
 0x379   :  { %v621_v62 = vmul.f32 %v2745_v44, %v620_v50 }
 0x37a   :  { %v644_v38 = vmul.f32 %v2747_v57, %v643_v49  ;;  %v4081_v49 = vld [vmem:[%s5884_s3 + $0x128] sm:$0xff] }
 0x37b   :  { %v622_v13 = vadd.f32 %v2745_v44, %v621_v62 }
 0x37c   :  { %v645_v17 = vadd.f32 %v2747_v57, %v644_v38  ;;  %v4087_v38 = vld [vmem:[%s5884_s3 + $0x110] sm:$0xff] }
 0x37d   :  { %v626_v9 = vsel %vm625_vm2, %v2745_v44, %v622_v13 }
 0x37e   :  { %v631_v15 = vsel %vm628_vm3, %v630_v16, %v626_v9  ;;  %v649_v26 = vsel %vm648_vm6, %v2747_v57, %v645_v17  ;;  %v4068_v57 = vld [vmem:[%s5884_s3 + $0x158] sm:$0xff]  ;;  %v4099_v17 = vld [vmem:[%s5884_s3 + $0xe0] sm:$0xff] }
 0x37f   :  { %v656_v21 = vmul.f32 %v631_v15, %v611_v61  ;;  %v654_v29 = vsel %vm651_vm7, %v653_v27, %v649_v26  ;;  %v4093_v61 = vld [vmem:[%s5884_s3 + $0xf8] sm:$0xff]  ;;  %v4107_v26 = vld [vmem:[%s5884_s3 + $0xc8] sm:$0xff] }
 0x380   :  { %v661_v30 = vsub.f32 1.0, %v654_v29  ;;  %v663_v37 = vmul.f32 %v654_v29, %v3740_v60  ;;  %v3954_v60 = vld [vmem:[%s5884_s3 + $0x168] sm:$0xff] }
 0x381   :  { %v659_v24 = vadd.f32 %v657_v10, %v656_v21 }
 0x383   :  { %2748 = vtanh.f32 %v659_v24 }
 0x389   :  { %v2749_v32 = vpop.eup %2748 }
 0x38a   :  { %v662_v33 = vmul.f32 %v2749_v32, %v661_v30 }
 0x38c   :  { %v3929_v40 = vadd.f32 %v663_v37, %v662_v33  ;;  %v4114_v33 = vld [vmem:[%s5884_s3 + $0xb0] sm:$0xff] }
 0x38e   :  { %666 = vst [vmem:[#allocation2 + $0x8] sm:$0x3] %v3929_v40  ;;  %685 = vmatmul.f32.vlgmr.msrb.gmra.mxu3 %v3929_v40  ;;  %705 = vmatmul.f32.vlgmr.msra.gmra.mxu0 %v3929_v40 }
 0x38f   :  { %725 = vmatmul.f32.vlgmr.msra.gmra.mxu1 %v3929_v40  ;;  %941 = vmatpush.msrb.mxu3 %v3749_v39  ;;  %v3960_v39 = vld [vmem:[%s5884_s3 + $0x150] sm:$0xff] }
 0x390   :  { %1121 = vmatpush.msra.mxu0 %v3954_v60  ;;  %1141 = vmatpush.msra.mxu1 %v4062_v56 }
 0x391   :  { %942 = vmatpush.msrb.mxu3 %v3757_v36  ;;  %v3966_v36 = vld [vmem:[%s5884_s3 + $0x138] sm:$0xff] }
 0x392   :  { %1122 = vmatpush.msra.mxu0 %v3960_v39  ;;  %1142 = vmatpush.msra.mxu1 %v4068_v57 }
 0x393   :  { %943 = vmatpush.msrb.mxu3 %v3765_v42  ;;  %v3971_v42 = vld [vmem:[%s5881_s0 + $0x1e] sm:$0x3f] }
 0x394   :  { %1123 = vmatpush.msra.mxu0 %v3966_v36  ;;  %1143 = vmatpush.msra.mxu1 %v4075_v59  ;;  %v773_v21 = vrot.slane %v3971_v42, 4 }
 0x395   :  { %944 = vmatpush.msrb.mxu3 %v3773_v48  ;;  %v3977_v48 = vld [vmem:[%s5884_s3 + $0x120] sm:$0xff] }
 0x396   :  { %1124 = vmatpush.msra.mxu0 %v3977_v48  ;;  %1144 = vmatpush.msra.mxu1 %v4081_v49 }
 0x397   :  { %945 = vmatpush.msrb.mxu3 %v3781_v51  ;;  %v750_v51 = vrot.slane %v3971_v42, 2 }
 0x398   :  { %1145 = vmatpush.msra.mxu1 %v4087_v38 }
 0x399   :  { %946 = vmatpush.msrb.mxu3 %v3793_v58  ;;  %v3984_v58 = vld [vmem:[%s5884_s3 + $0x108] sm:$0xff] }
 0x39a   :  { %1125 = vmatpush.msra.mxu0 %v3984_v58  ;;  %1146 = vmatpush.msra.mxu1 %v4093_v61 }
 0x39b   :  { %947 = vmatpush.msrb.mxu3 %v3805_v12 }
 0x39c   :  { %1147 = vmatpush.msra.mxu1 %v4099_v17 }
 0x39d   :  { %948 = vmatpush.msrb.mxu3 %v3817_v41 }
 0x39e   :  { %1148 = vmatpush.msra.mxu1 %v4107_v26 }
 0x39f   :  { %949 = vmatpush.msrb.mxu3 %v3829_v8  ;;  %v3991_v8 = vld [vmem:[%s5884_s3 + $0xf0] sm:$0xff] }
 0x3a0   :  { %1126 = vmatpush.msra.mxu0 %v3991_v8  ;;  %1149 = vmatpush.msra.mxu1 %v4114_v33 }
 0x3a1   :  { %950 = vmatpush.msrb.mxu3 %v3841_v14 }
 0x3a3   :  { %951 = vmatpush.msrb.mxu3 %v3853_v18  ;;  %v3997_v18 = vld [vmem:[%s5884_s3 + $0xd8] sm:$0xff] }
 0x3a4   :  { %1127 = vmatpush.msra.mxu0 %v3997_v18 }
 0x3a5   :  { %952 = vmatpush.msrb.mxu3 %v3865_v22 }
 0x3a7   :  { %953 = vmatpush.msrb.mxu3 %v3877_v25  ;;  %v4003_v25 = vld [vmem:[%s5884_s3 + $0xc0] sm:$0xff] }
 0x3a8   :  { %1128 = vmatpush.msra.mxu0 %v4003_v25 }
 0x3a9   :  { %954 = vmatpush.msrb.mxu3 %v3889_v28 }
 0x3ab   :  { %955 = vmatpush.msrb.mxu3 %v3901_v31 }
 0x3ad   :  { %956 = vmatpush.msrb.mxu3 %v3913_v34  ;;  %v4010_v34 = vld [vmem:[%s5884_s3 + $0xa8] sm:$0xff] }
 0x3ae   :  { %1129 = vmatpush.msra.mxu0 %v4010_v34 }
 0x3b0   :  { %1130 = vmatpush.msra.mxu0 %v4015_v43 }
 0x3b2   :  { %1131 = vmatpush.msra.mxu0 %v4022_v0 }
 0x3b4   :  { %1132 = vmatpush.msra.mxu0 %v4028_v2 }
 0x3b6   :  { %1133 = vmatpush.msra.mxu0 %v4034_v4 }
 0x3b8   :  { %1134 = vmatpush.msra.mxu0 %v4042_v6 }
 0x3ba   :  { %1135 = vmatpush.msra.mxu0 %v4049_v7 }
 0x3bc   :  { %1136 = vmatpush.msra.mxu0 %v4055_v35 }
 0x40b   :  { %v706_v12 = vpop.f32.mrf.mxu0 }
 0x40c   :  { %v707_v41 = vadd.f32 %v706_v12, %v5998_v20  ;;  %v726_v10 = vpop.f32.mrf.mxu1 }
 0x40d   :  { %v727_v23 = vadd.f32 %v726_v10, %v3514_v47  ;;  %v4237_v10 = vld [vmem:[%s5884_s3 + $0xb8] sm:$0xff] }
 0x40e   :  { %v752_v14 = vadd.f32 %v750_v51, %v707_v41  ;;  %v4122_v51 = vld [vmem:[%s5884_s3 + $0x98] sm:$0xff] }
 0x40f   :  { %1150 = vmatpush.msra.mxu1 %v4122_v51 }
 0x410   :  { %v2674_v22 = vmul.f32 -1.442695, %v752_v14  ;;  %v4128_v14 = vld [vmem:[%s5884_s3 + $0x80] sm:$0xff] }
 0x411   :  { %v686_v28 = vpop.f32.mrf.mxu3  ;;  %1151 = vmatpush.msra.mxu1 %v4128_v14 }
 0x412   :  { %2750 = vpow2.f32 %v2674_v22  ;;  %v687_v31 = vadd.f32 %v686_v28, %v5997_v11  ;;  %v4134_v28 = vld [vmem:[%s5884_s3 + $0x68] sm:$0xff] }
 0x413   :  { %1152 = vmatpush.msra.mxu1 %v4134_v28 }
 0x414   :  { %v729_v45 = vadd.f32 %v3971_v42, %v687_v31  ;;  %v4140_v31 = vld [vmem:[%s5884_s3 + $0x50] sm:$0xff] }
 0x415   :  { %1153 = vmatpush.msra.mxu1 %v4140_v31 }
 0x416   :  { %v2673_v1 = vmul.f32 -1.442695, %v729_v45 }
 0x418   :  { %v2751_v3 = vpop.eup %2750  ;;  %2752 = vpow2.f32 %v2673_v1 }
 0x419   :  { %v4036_v5 = vadd.f32 1.0, %v2751_v3  ;;  %v4146_v3 = vld [vmem:[%s5884_s3 + $0x38] sm:$0xff] }
 0x41a   :  { %6001 = vst [vmem:[#allocation8_spill] sm:$0xff] %v4146_v3  ;;  %1154 = vmatpush.msra.mxu1 %v4146_v3 }
 0x41b   :  { %2754 = vrcp.f32 %v4036_v5  ;;  %v768_v30 = vand.u32 2147483648, %v4036_v5  ;;  %vm762_vm13 = vweird.f32 %v4036_v5  ;;  %v766_v37 = vand.u32 2147483647, %v4036_v5 }
 0x41d   :  { %v769_v41 = vor.u32 1.1754944e-38, %v768_v30  ;;  %vm767_vm15 = vcmp.eq.f32.partialorder %v766_v37, 8.507059e+37  ;;  %v4298_v30 = vld [vmem:[#allocation2 + $0x2] sm:$0x3]  ;;  %v4337_v37 = vld [vmem:[#allocation2 + $0x8] sm:$0x3] }
 0x41e   :  { %v2753_v52 = vpop.eup %2752  ;;  %6007 = vst [vmem:[#allocation12_spill] sm:$0xff] %v4337_v37 }
 0x41f   :  { %v733_v54 = vadd.f32 1.0, %v2753_v52 }
 0x421   :  { %2756 = vrcp.f32 %v733_v54  ;;  %v2755_v44 = vpop.eup %2754  ;;  %v745_v63 = vand.u32 2147483648, %v733_v54  ;;  %v743_v16 = vand.u32 2147483647, %v733_v54  ;;  %vm739_vm9 = vweird.f32 %v733_v54 }
 0x422   :  { %v758_v53 = vmul.f32 %v2755_v44, %v4036_v5  ;;  %vm763_vm12 = vweird.f32 %v2755_v44 }
 0x423   :  { %v746_v19 = vor.u32 1.1754944e-38, %v745_v63  ;;  %vm744_vm11 = vcmp.eq.f32.partialorder %v743_v16, 8.507059e+37  ;;  %vm764_vm14 = vmor %vm762_vm13, %vm763_vm12  ;;  %v4204_v63 = vld [vmem:[%s5884_s3 + $0x118] sm:$0xff]  ;;  %v4221_v16 = vld [vmem:[%s5884_s3 + $0xe8] sm:$0xff] }
 0x424   :  { %v759_v62 = vsub.f32 1.0, %v758_v53  ;;  %v4172_v53 = vld [vmem:[%s5884_s3 + $0x8] sm:$0xff] }
 0x425   :  { %6003 = vst [vmem:[#allocation9_spill] sm:$0xff] %v4172_v53 }
 0x426   :  { %v760_v9 = vmul.f32 %v2755_v44, %v759_v62  ;;  %v4194_v62 = vld [vmem:[%s5884_s3 + $0x130] sm:$0xff] }
 0x427   :  { %v2757_v50 = vpop.eup %2756 }
 0x428   :  { %v735_v55 = vmul.f32 %v2757_v50, %v733_v54  ;;  %vm740_vm8 = vweird.f32 %v2757_v50  ;;  %v761_v29 = vadd.f32 %v2755_v44, %v760_v9  ;;  %v4153_v54 = vld [vmem:[%s5884_s3 + $0x20] sm:$0xff]  ;;  %v4229_v9 = vld [vmem:[%s5884_s3 + $0xd0] sm:$0xff] }
 0x429   :  { %vm741_vm10 = vmor %vm739_vm9, %vm740_vm8  ;;  %6002 = vst [vmem:[#allocation14_spill] sm:$0xff] %v4153_v54  ;;  %1155 = vmatpush.msra.mxu1 %v4153_v54  ;;  %vm1186_vm8 = vcmask 1041408   ;;  %vm1188_vm9 = vcmask 1043456  }
 0x42a   :  { %v736_v46 = vsub.f32 1.0, %v735_v55  ;;  %v765_v12 = vsel %vm764_vm14, %v2755_v44, %v761_v29  ;;  %v4186_v55 = vld [vmem:[%s5884_s3 + $0x148] sm:$0xff]  ;;  %v4293_v29 = vld [vmem:[%s5884_s3 + $0x10] sm:$0xff] }
 0x42b   :  { %v770_v22 = vsel %vm767_vm15, %v769_v41, %v765_v12  ;;  %1156 = vmatpush.msra.mxu1 %v4172_v53  ;;  %6005 = vst [vmem:[#allocation15_spill] sm:$0xff] %v4293_v29 }
 0x42c   :  { %v737_v13 = vmul.f32 %v2757_v50, %v736_v46  ;;  %v777_v45 = vsub.f32 1.0, %v770_v22  ;;  %v779_v52 = vmul.f32 %v770_v22, %v3929_v40  ;;  %v4164_v40 = vld [vmem:[%s5884_s3 + $0x178] sm:$0xff]  ;;  %v4199_v46 = vld [vmem:[#allocation2] sm:$0x3] }
 0x42e   :  { %v738_v15 = vadd.f32 %v2757_v50, %v737_v13  ;;  %v4213_v13 = vld [vmem:[%s5884_s3 + $0x100] sm:$0xff] }
 0x430   :  { %v742_v24 = vsel %vm741_vm10, %v2757_v50, %v738_v15  ;;  %v4177_v50 = vld [vmem:[%s5884_s3 + $0x160] sm:$0xff] }
 0x431   :  { %v747_v27 = vsel %vm744_vm11, %v746_v19, %v742_v24  ;;  %v4245_v15 = vld [vmem:[%s5884_s3 + $0xa0] sm:$0xff]  ;;  %v4253_v19 = vld [vmem:[%s5884_s3 + $0x88] sm:$0xff] }
 0x432   :  { %v772_v32 = vmul.f32 %v747_v27, %v727_v23  ;;  %v4269_v23 = vld [vmem:[%s5884_s3 + $0x58] sm:$0xff]  ;;  %v4277_v24 = vld [vmem:[%s5884_s3 + $0x40] sm:$0xff]  ;;  %v4285_v27 = vld [vmem:[%s5884_s3 + $0x28] sm:$0xff] }
 0x433   :  { %6004 = vst [vmem:[#allocation10_spill] sm:$0xff] %v4285_v27 }
 0x434   :  { %v775_v42 = vadd.f32 %v773_v21, %v772_v32  ;;  %v4261_v21 = vld [vmem:[%s5884_s3 + $0x70] sm:$0xff]  ;;  %v4318_v32 = vld [vmem:[#allocation2 + $0x4] sm:$0x3] }
 0x435   :  { %6006 = vst [vmem:[#allocation11_spill] sm:$0xff] %v4318_v32 }
 0x436   :  { %2758 = vtanh.f32 %v775_v42  ;;  %v4358_v42 = vld [vmem:[%s5881_s0 + $0x24] sm:$0x3f] }
 0x437   :  { %v866_v41 = vrot.slane %v4358_v42, 2 }
 0x43c   :  { %v2759_v1 = vpop.eup %2758 }
 0x43d   :  { %v778_v5 = vmul.f32 %v2759_v1, %v777_v45 }
 0x43f   :  { %v4155_v44 = vadd.f32 %v779_v52, %v778_v5 }
 0x441   :  { %782 = vst [vmem:[#allocation2 + $0xa] sm:$0x3] %v4155_v44  ;;  %801 = vmatmul.f32.vlgmr.msra.gmra.mxu2 %v4155_v44  ;;  %821 = vmatmul.f32.vlgmr.msra.gmra.mxu3 %v4155_v44 }
 0x442   :  { %841 = vmatmul.f32.vlgmr.msrb.gmra.mxu0 %v4155_v44  ;;  %1161 = vmatpush.msra.mxu2 %v4164_v40 }
 0x443   :  { %1213 = vmatpush.msrb.mxu0 %v4062_v56  ;;  %1193 = vmatpush.msra.mxu3 %v3954_v60 }
 0x444   :  { %1162 = vmatpush.msra.mxu2 %v4177_v50 }
 0x445   :  { %1214 = vmatpush.msrb.mxu0 %v4068_v57  ;;  %1194 = vmatpush.msra.mxu3 %v3960_v39 }
 0x446   :  { %1163 = vmatpush.msra.mxu2 %v4186_v55 }
 0x447   :  { %1215 = vmatpush.msrb.mxu0 %v4075_v59  ;;  %1195 = vmatpush.msra.mxu3 %v3966_v36 }
 0x448   :  { %1164 = vmatpush.msra.mxu2 %v4194_v62  ;;  %v4361_v12 = vld [vmem:[#allocation2 + $0xa] sm:$0x3] }
 0x449   :  { %1216 = vmatpush.msrb.mxu0 %v4081_v49  ;;  %1196 = vmatpush.msra.mxu3 %v3977_v48  ;;  %6008 = vst [vmem:[#allocation18_spill] sm:$0xff] %v4361_v12 }
 0x44a   :  { %1137 = vmatmul.f32.vlgmr.msra.gmra.mxu0 %v4199_v46  ;;  %1165 = vmatpush.msra.mxu2 %v4204_v63 }
 0x44b   :  { %1217 = vmatpush.msrb.mxu0 %v4087_v38  ;;  %1197 = vmatpush.msra.mxu3 %v3984_v58 }
 0x44c   :  { %1166 = vmatpush.msra.mxu2 %v4213_v13 }
 0x44d   :  { %1218 = vmatpush.msrb.mxu0 %v4093_v61  ;;  %1198 = vmatpush.msra.mxu3 %v3991_v8 }
 0x44e   :  { %1167 = vmatpush.msra.mxu2 %v4221_v16 }
 0x44f   :  { %1219 = vmatpush.msrb.mxu0 %v4099_v17  ;;  %1199 = vmatpush.msra.mxu3 %v3997_v18 }
 0x450   :  { %1168 = vmatpush.msra.mxu2 %v4229_v9 }
 0x451   :  { %1220 = vmatpush.msrb.mxu0 %v4107_v26  ;;  %1200 = vmatpush.msra.mxu3 %v4003_v25 }
 0x452   :  { %1169 = vmatpush.msra.mxu2 %v4237_v10 }
 0x453   :  { %1221 = vmatpush.msrb.mxu0 %v4114_v33  ;;  %1201 = vmatpush.msra.mxu3 %v4010_v34 }
 0x454   :  { %1170 = vmatpush.msra.mxu2 %v4245_v15 }
 0x455   :  { %1222 = vmatpush.msrb.mxu0 %v4122_v51  ;;  %1202 = vmatpush.msra.mxu3 %v4015_v43 }
 0x456   :  { %1171 = vmatpush.msra.mxu2 %v4253_v19 }
 0x457   :  { %1223 = vmatpush.msrb.mxu0 %v4128_v14  ;;  %1203 = vmatpush.msra.mxu3 %v4022_v0 }
 0x458   :  { %1172 = vmatpush.msra.mxu2 %v4261_v21 }
 0x459   :  { %1224 = vmatpush.msrb.mxu0 %v4134_v28  ;;  %1204 = vmatpush.msra.mxu3 %v4028_v2 }
 0x45a   :  { %1173 = vmatpush.msra.mxu2 %v4269_v23 }
 0x45b   :  { %1225 = vmatpush.msrb.mxu0 %v4140_v31  ;;  %1205 = vmatpush.msra.mxu3 %v4034_v4 }
 0x45c   :  { %1174 = vmatpush.msra.mxu2 %v4277_v24 }
 0x45d   :  { %1226 = vmatpush.msrb.mxu0 %v4146_v3  ;;  %1206 = vmatpush.msra.mxu3 %v4042_v6 }
 0x45e   :  { %1175 = vmatpush.msra.mxu2 %v4285_v27 }
 0x45f   :  { %1227 = vmatpush.msrb.mxu0 %v4153_v54  ;;  %1207 = vmatpush.msra.mxu3 %v4049_v7 }
 0x460   :  { %1176 = vmatpush.msra.mxu2 %v4293_v29 }
 0x461   :  { %1228 = vmatpush.msrb.mxu0 %v4172_v53  ;;  %1208 = vmatpush.msra.mxu3 %v4055_v35 }
 0x462   :  { %1229 = vmatmul.f32.vlgmr.msrb.gmra.mxu0 %v4298_v30 }
 0x463   :  { %1304 = vmatpush.msra.mxu0 %v4164_v40 }
 0x465   :  { %1305 = vmatpush.msra.mxu0 %v4177_v50 }
 0x467   :  { %1306 = vmatpush.msra.mxu0 %v4186_v55 }
 0x469   :  { %1307 = vmatpush.msra.mxu0 %v4194_v62 }
 0x46b   :  { %1308 = vmatpush.msra.mxu0 %v4204_v63 }
 0x46d   :  { %1309 = vmatpush.msra.mxu0 %v4213_v13 }
 0x46f   :  { %1310 = vmatpush.msra.mxu0 %v4221_v16 }
 0x471   :  { %1311 = vmatpush.msra.mxu0 %v4229_v9 }
 0x473   :  { %1312 = vmatpush.msra.mxu0 %v4237_v10 }
 0x475   :  { %1313 = vmatpush.msra.mxu0 %v4245_v15 }
 0x477   :  { %1314 = vmatpush.msra.mxu0 %v4253_v19 }
 0x479   :  { %1315 = vmatpush.msra.mxu0 %v4261_v21 }
 0x47b   :  { %1316 = vmatpush.msra.mxu0 %v4269_v23 }
 0x47d   :  { %1317 = vmatpush.msra.mxu0 %v4277_v24 }
 0x47f   :  { %1318 = vmatpush.msra.mxu0 %v4285_v27 }
 0x481   :  { %1319 = vmatpush.msra.mxu0 %v4293_v29 }
 0x482   :  { %1320 = vmatmul.f32.vlgmr.msra.gmra.mxu0 %v4318_v32 }
 0x483   :  { %1406 = vmatpush.msrb.mxu0 %v3954_v60 }
 0x485   :  { %1407 = vmatpush.msrb.mxu0 %v3960_v39 }
 0x487   :  { %1408 = vmatpush.msrb.mxu0 %v3966_v36 }
 0x489   :  { %1409 = vmatpush.msrb.mxu0 %v3977_v48 }
 0x48b   :  { %1410 = vmatpush.msrb.mxu0 %v3984_v58 }
 0x48d   :  { %1411 = vmatpush.msrb.mxu0 %v3991_v8 }
 0x48f   :  { %1412 = vmatpush.msrb.mxu0 %v3997_v18 }
 0x491   :  { %1413 = vmatpush.msrb.mxu0 %v4003_v25 }
 0x493   :  { %1414 = vmatpush.msrb.mxu0 %v4010_v34 }
 0x495   :  { %1415 = vmatpush.msrb.mxu0 %v4015_v43 }
 0x497   :  { %1416 = vmatpush.msrb.mxu0 %v4022_v0 }
 0x499   :  { %1417 = vmatpush.msrb.mxu0 %v4028_v2 }
 0x49b   :  { %1418 = vmatpush.msrb.mxu0 %v4034_v4 }
 0x49d   :  { %1419 = vmatpush.msrb.mxu0 %v4042_v6 }
 0x49f   :  { %1420 = vmatpush.msrb.mxu0 %v4049_v7 }
 0x4a1   :  { %1421 = vmatpush.msrb.mxu0 %v4055_v35 }
 0x4a2   :  { %1422 = vmatmul.f32.vlgmr.msrb.gmra.mxu0 %v4337_v37 }
 0x4a3   :  { %1497 = vmatpush.msra.mxu0 %v4062_v56 }
 0x4a5   :  { %1498 = vmatpush.msra.mxu0 %v4068_v57 }
 0x4a7   :  { %1499 = vmatpush.msra.mxu0 %v4075_v59 }
 0x4a9   :  { %1500 = vmatpush.msra.mxu0 %v4081_v49 }
 0x4ab   :  { %1501 = vmatpush.msra.mxu0 %v4087_v38 }
 0x4ad   :  { %1502 = vmatpush.msra.mxu0 %v4093_v61 }
 0x4af   :  { %1503 = vmatpush.msra.mxu0 %v4099_v17 }
 0x4b1   :  { %1504 = vmatpush.msra.mxu0 %v4107_v26 }
 0x4b3   :  { %1505 = vmatpush.msra.mxu0 %v4114_v33 }
 0x4b5   :  { %1506 = vmatpush.msra.mxu0 %v4122_v51 }
 0x4b7   :  { %1507 = vmatpush.msra.mxu0 %v4128_v14 }
 0x4b9   :  { %1508 = vmatpush.msra.mxu0 %v4134_v28 }
 0x4bb   :  { %1509 = vmatpush.msra.mxu0 %v4140_v31 }
 0x4bd   :  { %1510 = vmatpush.msra.mxu0 %v4146_v3  ;;  %v889_v3 = vrot.slane %v4358_v42, 4 }
 0x4bf   :  { %1511 = vmatpush.msra.mxu0 %v4153_v54  ;;  %v842_v35 = vpop.f32.mrf.mxu0 }
 0x4c1   :  { %1512 = vmatpush.msra.mxu0 %v4172_v53 }
 0x4c2   :  { %1513 = vmatmul.f32.vlgmr.msra.gmra.mxu0 %v4361_v12  ;;  %v4386_v12 = vld [vmem:[%s5886_s5 + $0x168] sm:$0xff] }
 0x4c3   :  { %1588 = vmatpush.msrb.mxu0 %v4164_v40 }
 0x4c4   :  { %v802_v22 = vpop.f32.mrf.mxu2  ;;  %v822_v45 = vpop.f32.mrf.mxu3 }
 0x4c5   :  { %v803_v1 = vadd.f32 %v802_v22, %v5997_v11  ;;  %v823_v5 = vadd.f32 %v822_v45, %v5998_v20  ;;  %1589 = vmatpush.msrb.mxu0 %v4177_v50 }
 0x4c7   :  { %v845_v52 = vadd.f32 %v4358_v42, %v803_v1  ;;  %v868_v37 = vadd.f32 %v866_v41, %v823_v5  ;;  %1590 = vmatpush.msrb.mxu0 %v4186_v55 }
 0x4c9   :  { %v2676_v32 = vmul.f32 -1.442695, %v845_v52  ;;  %v2677_v53 = vmul.f32 -1.442695, %v868_v37  ;;  %1591 = vmatpush.msrb.mxu0 %v4194_v62 }
 0x4cb   :  { %2760 = vpow2.f32 %v2676_v32  ;;  %1592 = vmatpush.msrb.mxu0 %v4204_v63 }
 0x4cc   :  { %2762 = vpow2.f32 %v2677_v53 }
 0x4cd   :  { %1593 = vmatpush.msrb.mxu0 %v4213_v13 }
 0x4cf   :  { %1594 = vmatpush.msrb.mxu0 %v4221_v16 }
 0x4d1   :  { %v2761_v22 = vpop.eup %2760  ;;  %1595 = vmatpush.msrb.mxu0 %v4229_v9 }
 0x4d2   :  { %v2763_v45 = vpop.eup %2762  ;;  %v849_v1 = vadd.f32 1.0, %v2761_v22 }
 0x4d3   :  { %v872_v41 = vadd.f32 1.0, %v2763_v45  ;;  %1596 = vmatpush.msrb.mxu0 %v4237_v10 }
 0x4d4   :  { %2764 = vrcp.f32 %v849_v1  ;;  %v861_v22 = vand.u32 2147483648, %v849_v1  ;;  %v859_v11 = vand.u32 2147483647, %v849_v1  ;;  %vm855_vm1 = vweird.f32 %v849_v1 }
 0x4d5   :  { %2766 = vrcp.f32 %v872_v41  ;;  %1597 = vmatpush.msrb.mxu0 %v4245_v15  ;;  %vm878_vm5 = vweird.f32 %v872_v41 }
 0x4d6   :  { %vm860_vm3 = vcmp.eq.f32.partialorder %v859_v11, 8.507059e+37  ;;  %v882_v11 = vand.u32 2147483647, %v872_v41 }
 0x4d7   :  { %1598 = vmatpush.msrb.mxu0 %v4253_v19 }
 0x4d8   :  { %vm883_vm7 = vcmp.eq.f32.partialorder %v882_v11, 8.507059e+37  ;;  %v4449_v11 = vld [vmem:[%s5886_s5 + $0x90] sm:$0xff] }
 0x4d9   :  { %1599 = vmatpush.msrb.mxu0 %v4261_v21 }
 0x4da   :  { %v2765_v53 = vpop.eup %2764 }
 0x4db   :  { %v2767_v32 = vpop.eup %2766  ;;  %v851_v37 = vmul.f32 %v2765_v53, %v849_v1  ;;  %1600 = vmatpush.msrb.mxu0 %v4269_v23  ;;  %vm856_vm0 = vweird.f32 %v2765_v53 }
 0x4dc   :  { %v874_v5 = vmul.f32 %v2767_v32, %v872_v41  ;;  %vm857_vm2 = vmor %vm855_vm1, %vm856_vm0  ;;  %vm879_vm4 = vweird.f32 %v2767_v32 }
 0x4dd   :  { %v852_v52 = vsub.f32 1.0, %v851_v37  ;;  %1601 = vmatpush.msrb.mxu0 %v4277_v24  ;;  %v4392_v37 = vld [vmem:[%s5886_s5 + $0x150] sm:$0xff]  ;;  %vm880_vm6 = vmor %vm878_vm5, %vm879_vm4 }
 0x4de   :  { %v875_v45 = vsub.f32 1.0, %v874_v5  ;;  %v862_v5 = vor.u32 1.1754944e-38, %v861_v22  ;;  %v884_v22 = vand.u32 2147483648, %v872_v41  ;;  %v4430_v41 = vld [vmem:[%s5886_s5 + $0xc0] sm:$0xff] }
 0x4df   :  { %v853_v20 = vmul.f32 %v2765_v53, %v852_v52  ;;  %1602 = vmatpush.msrb.mxu0 %v4285_v27  ;;  %v843_v52 = vadd.f32 %v842_v35, %v3514_v47  ;;  %v4406_v35 = vld [vmem:[%s5886_s5 + $0x120] sm:$0xff] }
 0x4e0   :  { %v876_v54 = vmul.f32 %v2767_v32, %v875_v45 }
 0x4e1   :  { %v854_v7 = vadd.f32 %v2765_v53, %v853_v20  ;;  %1603 = vmatpush.msrb.mxu0 %v4293_v29  ;;  %v4400_v20 = vld [vmem:[%s5886_s5 + $0x138] sm:$0xff] }
 0x4e2   :  { %v877_v45 = vadd.f32 %v2767_v32, %v876_v54  ;;  %v885_v54 = vor.u32 1.1754944e-38, %v884_v22 }
 0x4e3   :  { %1697 = vmatpush.msra.mxu0 %v4386_v12  ;;  %v858_v27 = vsel %vm857_vm2, %v2765_v53, %v854_v7  ;;  %v4418_v53 = vld [vmem:[%s5886_s5 + $0xf0] sm:$0xff] }
 0x4e4   :  { %v863_v1 = vsel %vm860_vm3, %v862_v5, %v858_v27  ;;  %v4412_v27 = vld [vmem:[%s5886_s5 + $0x108] sm:$0xff]  ;;  %v881_v42 = vsel %vm880_vm6, %v2767_v32, %v877_v45 }
 0x4e5   :  { %1698 = vmatpush.msra.mxu0 %v4392_v37  ;;  %v888_v29 = vmul.f32 %v863_v1, %v843_v52  ;;  %v4436_v52 = vld [vmem:[%s5886_s5 + $0xa8] sm:$0xff] }
 0x4e7   :  { %1699 = vmatpush.msra.mxu0 %v4400_v20  ;;  %v891_v7 = vadd.f32 %v889_v3, %v888_v29  ;;  %v886_v3 = vsel %vm883_vm7, %v885_v54, %v881_v42  ;;  %v4424_v29 = vld [vmem:[%s5886_s5 + $0xd8] sm:$0xff]  ;;  %v4488_v54 = vld [vmem:[%s5886_s5 + $0x48] sm:$0xff] }
 0x4e8   :  { %v893_v32 = vsub.f32 1.0, %v886_v3  ;;  %v895_v45 = vmul.f32 %v886_v3, %v4155_v44  ;;  %v4458_v44 = vld [vmem:[%s5886_s5 + $0x78] sm:$0xff]  ;;  %6010 = vst [vmem:[#allocation20_spill] sm:$0xff] %v4488_v54 }
 0x4e9   :  { %1700 = vmatpush.msra.mxu0 %v4406_v35  ;;  %2768 = vtanh.f32 %v891_v7  ;;  %v4467_v7 = vld [vmem:[%s5886_s5 + $0x60] sm:$0xff]  ;;  %v4506_v3 = vld [vmem:[%s5886_s5 + $0x18] sm:$0xff] }
 0x4ea   :  { %6009 = vst [vmem:[#allocation19_spill] sm:$0xff] %v4467_v7 }
 0x4eb   :  { %1701 = vmatpush.msra.mxu0 %v4412_v27  ;;  %6012 = vst [vmem:[#allocation22_spill] sm:$0xff] %v4506_v3 }
 0x4ed   :  { %1702 = vmatpush.msra.mxu0 %v4418_v53 }
 0x4ef   :  { %1703 = vmatpush.msra.mxu0 %v4424_v29  ;;  %v2769_v5 = vpop.eup %2768 }
 0x4f0   :  { %v894_v1 = vmul.f32 %v2769_v5, %v893_v32  ;;  %v4515_v32 = vld [vmem:[%s5886_s5] sm:$0xff]  ;;  %v6014_v5 = vmov 0.0  }
 0x4f1   :  { %1704 = vmatpush.msra.mxu0 %v4430_v41  ;;  %6013 = vst [vmem:[#allocation23_spill] sm:$0xff] %v4515_v32 }
 0x4f2   :  { %v4440_v22 = vadd.f32 %v895_v45, %v894_v1  ;;  %v6015_v1 = vld [vmem:[#allocation8_spill] sm:$0xff]  ;;  %v6016_v45 = vld [vmem:[#allocation10_spill] sm:$0xff] }
 0x4f3   :  { %1705 = vmatpush.msra.mxu0 %v4436_v52 }
 0x4f4   :  { %898 = vst [vmem:[#allocation2 + $0xc] sm:$0x3] %v4440_v22  ;;  %917 = vmatmul.f32.vlgmr.msrb.gmra.mxu1 %v4440_v22  ;;  %937 = vmatmul.f32.vlgmr.msrb.gmra.mxu2 %v4440_v22 }
 0x4f5   :  { %957 = vmatmul.f32.vlgmr.msrb.gmra.mxu3 %v4440_v22  ;;  %1233 = vmatpush.msrb.mxu1 %v4164_v40 }
 0x4f6   :  { %1264 = vmatpush.msrb.mxu2 %v3954_v60  ;;  %1284 = vmatpush.msrb.mxu3 %v4062_v56 }
 0x4f7   :  { %1234 = vmatpush.msrb.mxu1 %v4177_v50  ;;  %1706 = vmatpush.msra.mxu0 %v4449_v11 }
 0x4f8   :  { %1265 = vmatpush.msrb.mxu2 %v3960_v39  ;;  %1285 = vmatpush.msrb.mxu3 %v4068_v57 }
 0x4f9   :  { %1235 = vmatpush.msrb.mxu1 %v4186_v55  ;;  %1707 = vmatpush.msra.mxu0 %v4458_v44 }
 0x4fa   :  { %1266 = vmatpush.msrb.mxu2 %v3966_v36  ;;  %1286 = vmatpush.msrb.mxu3 %v4075_v59 }
 0x4fb   :  { %1236 = vmatpush.msrb.mxu1 %v4194_v62  ;;  %1708 = vmatpush.msra.mxu0 %v4467_v7  ;;  %v4479_v42 = vld [vmem:[#allocation2 + $0xc] sm:$0x3]  ;;  %v6022_v7 = vld [vmem:[#allocation11_spill] sm:$0xff] }
 0x4fc   :  { %1267 = vmatpush.msrb.mxu2 %v3977_v48  ;;  %1287 = vmatpush.msrb.mxu3 %v4081_v49 }
 0x4fd   :  { %1157 = vmatmul.f32.vlgmr.msra.gmra.mxu1 %v4199_v46  ;;  %1177 = vmatmul.f32.vlgmr.msra.gmra.mxu2 %v4199_v46  ;;  %v4497_v46 = vld [vmem:[%s5886_s5 + $0x30] sm:$0xff] }
 0x4fe   :  { %1209 = vmatmul.f32.vlgmr.msra.gmra.mxu3 %v4298_v30  ;;  %1237 = vmatpush.msrb.mxu1 %v4204_v63  ;;  %6011 = vst [vmem:[#allocation21_spill] sm:$0xff] %v4497_v46 }
 0x4ff   :  { %1268 = vmatpush.msrb.mxu2 %v3984_v58  ;;  %1288 = vmatpush.msrb.mxu3 %v4087_v38 }
 0x500   :  { %1604 = vmatmul.f32.vlgmr.msrb.gmra.mxu0 %v4479_v42  ;;  %1238 = vmatpush.msrb.mxu1 %v4213_v13 }
 0x501   :  { %1269 = vmatpush.msrb.mxu2 %v3991_v8  ;;  %1289 = vmatpush.msrb.mxu3 %v4093_v61 }
 0x502   :  { %1239 = vmatpush.msrb.mxu1 %v4221_v16  ;;  %1709 = vmatpush.msra.mxu0 %v4488_v54  ;;  %v6021_v54 = vld [vmem:[#allocation9_spill] sm:$0xff] }
 0x503   :  { %1270 = vmatpush.msrb.mxu2 %v3997_v18  ;;  %1290 = vmatpush.msrb.mxu3 %v4099_v17 }
 0x504   :  { %1240 = vmatpush.msrb.mxu1 %v4229_v9  ;;  %1710 = vmatpush.msra.mxu0 %v4497_v46  ;;  %v6019_v46 = vld [vmem:[#allocation15_spill] sm:$0xff] }
 0x505   :  { %1271 = vmatpush.msrb.mxu2 %v4003_v25  ;;  %1291 = vmatpush.msrb.mxu3 %v4107_v26 }
 0x506   :  { %1241 = vmatpush.msrb.mxu1 %v4237_v10  ;;  %1711 = vmatpush.msra.mxu0 %v4506_v3  ;;  %v6018_v3 = vld [vmem:[#allocation14_spill] sm:$0xff] }
 0x507   :  { %1272 = vmatpush.msrb.mxu2 %v4010_v34  ;;  %1292 = vmatpush.msrb.mxu3 %v4114_v33 }
 0x508   :  { %1242 = vmatpush.msrb.mxu1 %v4245_v15  ;;  %1712 = vmatpush.msra.mxu0 %v4515_v32  ;;  %v6017_v32 = vld [vmem:[#allocation13_spill] sm:$0xff] }
 0x509   :  { %1273 = vmatpush.msrb.mxu2 %v4015_v43  ;;  %1293 = vmatpush.msrb.mxu3 %v4122_v51 }
 0x50a   :  { %1243 = vmatpush.msrb.mxu1 %v4253_v19  ;;  %1713 = vmatmul.f32.vlgmr.msra.gmra.mxu0 %v6014_v5  ;;  %v6020_v5 = vld [vmem:[#allocation7_spill] sm:$0xff] }
 0x50b   :  { %1274 = vmatpush.msrb.mxu2 %v4022_v0  ;;  %1294 = vmatpush.msrb.mxu3 %v4128_v14 }
 0x50c   :  { %1244 = vmatpush.msrb.mxu1 %v4261_v21 }
 0x50d   :  { %1275 = vmatpush.msrb.mxu2 %v4028_v2  ;;  %1295 = vmatpush.msrb.mxu3 %v4134_v28 }
 0x50e   :  { %1245 = vmatpush.msrb.mxu1 %v4269_v23 }
 0x50f   :  { %1276 = vmatpush.msrb.mxu2 %v4034_v4  ;;  %1296 = vmatpush.msrb.mxu3 %v4140_v31 }
 0x510   :  { %1246 = vmatpush.msrb.mxu1 %v4277_v24 }
 0x511   :  { %1277 = vmatpush.msrb.mxu2 %v4042_v6  ;;  %1297 = vmatpush.msrb.mxu3 %v6015_v1 }
 0x512   :  { %1247 = vmatpush.msrb.mxu1 %v6016_v45 }
 0x513   :  { %1278 = vmatpush.msrb.mxu2 %v6017_v32  ;;  %1298 = vmatpush.msrb.mxu3 %v6018_v3 }
 0x514   :  { %1248 = vmatpush.msrb.mxu1 %v6019_v46 }
 0x515   :  { %1279 = vmatpush.msrb.mxu2 %v6020_v5  ;;  %1299 = vmatpush.msrb.mxu3 %v6021_v54 }
 0x516   :  { %1249 = vmatmul.f32.vlgmr.msrb.gmra.mxu1 %v4298_v30  ;;  %1280 = vmatmul.f32.vlgmr.msrb.gmra.mxu2 %v6022_v7  ;;  %v1334_v30 = vld [vmem:[#allocation2 + $0x6] sm:$0x3] }
 0x517   :  { %1300 = vmatmul.f32.vlgmr.msrb.gmra.mxu3 %v6022_v7  ;;  %1335 = vmatpush.msra.mxu1 %v3954_v60 }
 0x518   :  { %1355 = vmatpush.msra.mxu2 %v4062_v56  ;;  %1375 = vmatpush.msra.mxu3 %v4164_v40 }
 0x519   :  { %1336 = vmatpush.msra.mxu1 %v3960_v39 }
 0x51a   :  { %1356 = vmatpush.msra.mxu2 %v4068_v57  ;;  %1376 = vmatpush.msra.mxu3 %v4177_v50 }
 0x51b   :  { %1337 = vmatpush.msra.mxu1 %v3966_v36 }
 0x51c   :  { %1357 = vmatpush.msra.mxu2 %v4075_v59  ;;  %1377 = vmatpush.msra.mxu3 %v4186_v55 }
 0x51d   :  { %1338 = vmatpush.msra.mxu1 %v3977_v48 }
 0x51e   :  { %1358 = vmatpush.msra.mxu2 %v4081_v49  ;;  %1378 = vmatpush.msra.mxu3 %v4194_v62 }
 0x51f   :  { %1339 = vmatpush.msra.mxu1 %v3984_v58 }
 0x520   :  { %1359 = vmatpush.msra.mxu2 %v4087_v38  ;;  %1379 = vmatpush.msra.mxu3 %v4204_v63 }
 0x521   :  { %1340 = vmatpush.msra.mxu1 %v3991_v8 }
 0x522   :  { %1360 = vmatpush.msra.mxu2 %v4093_v61  ;;  %1380 = vmatpush.msra.mxu3 %v4213_v13 }
 0x523   :  { %1341 = vmatpush.msra.mxu1 %v3997_v18 }
 0x524   :  { %1361 = vmatpush.msra.mxu2 %v4099_v17  ;;  %1381 = vmatpush.msra.mxu3 %v4221_v16 }
 0x525   :  { %1342 = vmatpush.msra.mxu1 %v4003_v25 }
 0x526   :  { %1362 = vmatpush.msra.mxu2 %v4107_v26  ;;  %1382 = vmatpush.msra.mxu3 %v4229_v9 }
 0x527   :  { %1343 = vmatpush.msra.mxu1 %v4010_v34 }
 0x528   :  { %1363 = vmatpush.msra.mxu2 %v4114_v33  ;;  %1383 = vmatpush.msra.mxu3 %v4237_v10 }
 0x529   :  { %1344 = vmatpush.msra.mxu1 %v4015_v43 }
 0x52a   :  { %1364 = vmatpush.msra.mxu2 %v4122_v51  ;;  %1384 = vmatpush.msra.mxu3 %v4245_v15 }
 0x52b   :  { %1345 = vmatpush.msra.mxu1 %v4022_v0 }
 0x52c   :  { %1365 = vmatpush.msra.mxu2 %v4128_v14  ;;  %1385 = vmatpush.msra.mxu3 %v4253_v19 }
 0x52d   :  { %1346 = vmatpush.msra.mxu1 %v4028_v2 }
 0x52e   :  { %1366 = vmatpush.msra.mxu2 %v4134_v28  ;;  %1386 = vmatpush.msra.mxu3 %v4261_v21 }
 0x52f   :  { %1347 = vmatpush.msra.mxu1 %v4034_v4 }
 0x530   :  { %1367 = vmatpush.msra.mxu2 %v4140_v31  ;;  %1387 = vmatpush.msra.mxu3 %v4269_v23 }
 0x531   :  { %1348 = vmatpush.msra.mxu1 %v4042_v6 }
 0x532   :  { %1368 = vmatpush.msra.mxu2 %v6015_v1  ;;  %1388 = vmatpush.msra.mxu3 %v4277_v24 }
 0x533   :  { %1349 = vmatpush.msra.mxu1 %v6017_v32 }
 0x534   :  { %1369 = vmatpush.msra.mxu2 %v6018_v3  ;;  %1389 = vmatpush.msra.mxu3 %v6016_v45 }
 0x535   :  { %1350 = vmatpush.msra.mxu1 %v6020_v5 }
 0x536   :  { %1370 = vmatpush.msra.mxu2 %v6021_v54  ;;  %1390 = vmatpush.msra.mxu3 %v6019_v46 }
 0x537   :  { %1351 = vmatmul.f32.vlgmr.msra.gmra.mxu1 %v1334_v30  ;;  %1371 = vmatmul.f32.vlgmr.msra.gmra.mxu2 %v1334_v30 }
 0x538   :  { %1391 = vmatmul.f32.vlgmr.msra.gmra.mxu3 %v1334_v30  ;;  %1426 = vmatpush.msrb.mxu1 %v4062_v56 }
 0x539   :  { %1446 = vmatpush.msrb.mxu2 %v4164_v40  ;;  %1477 = vmatpush.msrb.mxu3 %v3954_v60  ;;  %v6023_v60 = vld [vmem:[#allocation12_spill] sm:$0xff] }
 0x53a   :  { %1427 = vmatpush.msrb.mxu1 %v4068_v57 }
 0x53b   :  { %1447 = vmatpush.msrb.mxu2 %v4177_v50  ;;  %1478 = vmatpush.msrb.mxu3 %v3960_v39  ;;  %v6024_v39 = vld [vmem:[#allocation18_spill] sm:$0xff] }
 0x53c   :  { %1428 = vmatpush.msrb.mxu1 %v4075_v59 }
 0x53d   :  { %1448 = vmatpush.msrb.mxu2 %v4186_v55  ;;  %1479 = vmatpush.msrb.mxu3 %v3966_v36  ;;  %v4650_v36 = vld [vmem:[%s5884_s3 + $0x168] sm:$0xff] }
 0x53e   :  { %1429 = vmatpush.msrb.mxu1 %v4081_v49 }
 0x53f   :  { %1449 = vmatpush.msrb.mxu2 %v4194_v62  ;;  %1480 = vmatpush.msrb.mxu3 %v3977_v48  ;;  %v4658_v48 = vld [vmem:[%s5884_s3 + $0x150] sm:$0xff] }
 0x540   :  { %1430 = vmatpush.msrb.mxu1 %v4087_v38 }
 0x541   :  { %1450 = vmatpush.msrb.mxu2 %v4204_v63  ;;  %1481 = vmatpush.msrb.mxu3 %v3984_v58  ;;  %v4666_v58 = vld [vmem:[%s5884_s3 + $0x138] sm:$0xff] }
 0x542   :  { %1431 = vmatpush.msrb.mxu1 %v4093_v61 }
 0x543   :  { %1451 = vmatpush.msrb.mxu2 %v4213_v13  ;;  %1482 = vmatpush.msrb.mxu3 %v3991_v8  ;;  %v4674_v8 = vld [vmem:[%s5884_s3 + $0x120] sm:$0xff] }
 0x544   :  { %1432 = vmatpush.msrb.mxu1 %v4099_v17 }
 0x545   :  { %1452 = vmatpush.msrb.mxu2 %v4221_v16  ;;  %1483 = vmatpush.msrb.mxu3 %v3997_v18  ;;  %v4682_v18 = vld [vmem:[%s5884_s3 + $0x108] sm:$0xff] }
 0x546   :  { %1433 = vmatpush.msrb.mxu1 %v4107_v26 }
 0x547   :  { %1453 = vmatpush.msrb.mxu2 %v4229_v9  ;;  %1484 = vmatpush.msrb.mxu3 %v4003_v25  ;;  %v4690_v25 = vld [vmem:[%s5884_s3 + $0xf0] sm:$0xff] }
 0x548   :  { %1434 = vmatpush.msrb.mxu1 %v4114_v33 }
 0x549   :  { %1454 = vmatpush.msrb.mxu2 %v4237_v10  ;;  %1485 = vmatpush.msrb.mxu3 %v4010_v34  ;;  %v4698_v34 = vld [vmem:[%s5884_s3 + $0xd8] sm:$0xff] }
 0x54a   :  { %1435 = vmatpush.msrb.mxu1 %v4122_v51 }
 0x54b   :  { %1455 = vmatpush.msrb.mxu2 %v4245_v15  ;;  %1486 = vmatpush.msrb.mxu3 %v4015_v43  ;;  %v4706_v43 = vld [vmem:[%s5884_s3 + $0xc0] sm:$0xff] }
 0x54c   :  { %1436 = vmatpush.msrb.mxu1 %v4128_v14 }
 0x54d   :  { %1456 = vmatpush.msrb.mxu2 %v4253_v19  ;;  %1487 = vmatpush.msrb.mxu3 %v4022_v0  ;;  %v4714_v0 = vld [vmem:[%s5884_s3 + $0xa8] sm:$0xff] }
 0x54e   :  { %1437 = vmatpush.msrb.mxu1 %v4134_v28 }
 0x54f   :  { %1457 = vmatpush.msrb.mxu2 %v4261_v21  ;;  %1488 = vmatpush.msrb.mxu3 %v4028_v2  ;;  %v4722_v2 = vld [vmem:[%s5884_s3 + $0x90] sm:$0xff] }
 0x550   :  { %1438 = vmatpush.msrb.mxu1 %v4140_v31 }
 0x551   :  { %1458 = vmatpush.msrb.mxu2 %v4269_v23  ;;  %1489 = vmatpush.msrb.mxu3 %v4034_v4  ;;  %v4730_v4 = vld [vmem:[%s5884_s3 + $0x78] sm:$0xff] }
 0x552   :  { %1439 = vmatpush.msrb.mxu1 %v6015_v1 }
 0x553   :  { %1459 = vmatpush.msrb.mxu2 %v4277_v24  ;;  %1490 = vmatpush.msrb.mxu3 %v4042_v6  ;;  %v4738_v6 = vld [vmem:[%s5884_s3 + $0x60] sm:$0xff] }
 0x554   :  { %1440 = vmatpush.msrb.mxu1 %v6018_v3 }
 0x555   :  { %1460 = vmatpush.msrb.mxu2 %v6016_v45  ;;  %1491 = vmatpush.msrb.mxu3 %v6017_v32  ;;  %v2925_v32 = vld [vmem:[%s5884_s3 + $0x158] sm:$0xff] }
 0x556   :  { %1441 = vmatpush.msrb.mxu1 %v6021_v54 }
 0x557   :  { %1461 = vmatpush.msrb.mxu2 %v6019_v46  ;;  %1492 = vmatpush.msrb.mxu3 %v6020_v5 }
 0x558   :  { %1442 = vmatmul.f32.vlgmr.msrb.gmra.mxu1 %v6023_v60  ;;  %1462 = vmatmul.f32.vlgmr.msrb.gmra.mxu2 %v6023_v60  ;;  %v2926_v60 = vld [vmem:[%s5884_s3 + $0x140] sm:$0xff] }
 0x559   :  { %1493 = vmatmul.f32.vlgmr.msrb.gmra.mxu3 %v6024_v39  ;;  %1517 = vmatpush.msra.mxu1 %v4164_v40 }
 0x55a   :  { %1548 = vmatpush.msra.mxu2 %v4650_v36  ;;  %1568 = vmatpush.msra.mxu3 %v4062_v56  ;;  %v4746_v56 = vld [vmem:[%s5881_s0 + $0x2a] sm:$0x3f] }
 0x55b   :  { %1518 = vmatpush.msra.mxu1 %v4177_v50 }
 0x55c   :  { %1549 = vmatpush.msra.mxu2 %v4658_v48  ;;  %1569 = vmatpush.msra.mxu3 %v4068_v57 }
 0x55d   :  { %1519 = vmatpush.msra.mxu1 %v4186_v55 }
 0x55e   :  { %1550 = vmatpush.msra.mxu2 %v4666_v58  ;;  %1570 = vmatpush.msra.mxu3 %v4075_v59  ;;  %v4751_v59 = vld [vmem:[%s5884_s3 + $0x48] sm:$0xff] }
 0x55f   :  { %1520 = vmatpush.msra.mxu1 %v4194_v62 }
 0x560   :  { %1551 = vmatpush.msra.mxu2 %v4674_v8  ;;  %1571 = vmatpush.msra.mxu3 %v4081_v49  ;;  %v6025_v49 = vld [vmem:[#allocation16_spill] sm:$0xff] }
 0x561   :  { %1521 = vmatpush.msra.mxu1 %v4204_v63 }
 0x562   :  { %1552 = vmatpush.msra.mxu2 %v4682_v18  ;;  %1572 = vmatpush.msra.mxu3 %v4087_v38 }
 0x563   :  { %1522 = vmatpush.msra.mxu1 %v4213_v13 }
 0x564   :  { %1553 = vmatpush.msra.mxu2 %v4690_v25  ;;  %1573 = vmatpush.msra.mxu3 %v4093_v61  ;;  %v4760_v61 = vld [vmem:[%s5884_s3 + $0x30] sm:$0xff] }
 0x565   :  { %1523 = vmatpush.msra.mxu1 %v4221_v16 }
 0x566   :  { %1554 = vmatpush.msra.mxu2 %v4698_v34  ;;  %1574 = vmatpush.msra.mxu3 %v4099_v17 }
 0x567   :  { %1524 = vmatpush.msra.mxu1 %v4229_v9 }
 0x568   :  { %1555 = vmatpush.msra.mxu2 %v4706_v43  ;;  %1575 = vmatpush.msra.mxu3 %v4107_v26  ;;  %v4769_v26 = vld [vmem:[%s5884_s3 + $0x18] sm:$0xff] }
 0x569   :  { %1525 = vmatpush.msra.mxu1 %v4237_v10 }
 0x56a   :  { %1556 = vmatpush.msra.mxu2 %v4714_v0  ;;  %1576 = vmatpush.msra.mxu3 %v4114_v33 }
 0x56b   :  { %1526 = vmatpush.msra.mxu1 %v4245_v15 }
 0x56c   :  { %1557 = vmatpush.msra.mxu2 %v4722_v2  ;;  %1577 = vmatpush.msra.mxu3 %v4122_v51  ;;  %v982_v51 = vrot.slane %v4746_v56, 2 }
 0x56d   :  { %1527 = vmatpush.msra.mxu1 %v4253_v19 }
 0x56e   :  { %1558 = vmatpush.msra.mxu2 %v4730_v4  ;;  %1578 = vmatpush.msra.mxu3 %v4128_v14 }
 0x56f   :  { %1528 = vmatpush.msra.mxu1 %v4261_v21 }
 0x570   :  { %1559 = vmatpush.msra.mxu2 %v4738_v6  ;;  %1579 = vmatpush.msra.mxu3 %v4134_v28  ;;  %v4778_v28 = vld [vmem:[%s5884_s3] sm:$0xff] }
 0x571   :  { %1529 = vmatpush.msra.mxu1 %v4269_v23  ;;  %v918_v57 = vpop.f32.mrf.mxu1  ;;  %v1063_v23 = vld [vmem:[%s5885_s4] sm:$0x7] }
 0x572   :  { %1560 = vmatpush.msra.mxu2 %v4751_v59  ;;  %1580 = vmatpush.msra.mxu3 %v4140_v31  ;;  %v919_v38 = vadd.f32 %v918_v57, %v6025_v49  ;;  %v6026_v31 = vld [vmem:[#allocation17_spill] sm:$0xff]  ;;  %v4840_v57 = vld [vmem:[%s5886_s5 + $0x128] sm:$0xff] }
 0x573   :  { %1530 = vmatpush.msra.mxu1 %v4277_v24 }
 0x574   :  { %1561 = vmatpush.msra.mxu2 %v4760_v61  ;;  %1581 = vmatpush.msra.mxu3 %v6015_v1  ;;  %v961_v17 = vadd.f32 %v4746_v56, %v919_v38  ;;  %v2928_v38 = vld [vmem:[%s5884_s3 + $0x110] sm:$0xff] }
 0x575   :  { %1531 = vmatpush.msra.mxu1 %v6016_v45  ;;  %v4815_v45 = vperm.slane %v1063_v23, 0 }
 0x576   :  { %1562 = vmatpush.msra.mxu2 %v4769_v26  ;;  %1582 = vmatpush.msra.mxu3 %v6018_v3  ;;  %v2679_v33 = vmul.f32 -1.442695, %v961_v17  ;;  %v4799_v3 = vld [vmem:[%s5886_s5 + $0x170] sm:$0xff] }
 0x577   :  { %1532 = vmatpush.msra.mxu1 %v6019_v46  ;;  %v938_v14 = vpop.f32.mrf.mxu2  ;;  %v4790_v46 = vperm.slane %v1063_v23, 1  ;;  %1830 = vmatpush.msrb.mxu0 %v4799_v3 }
 0x578   :  { %1563 = vmatpush.msra.mxu2 %v4778_v28  ;;  %1583 = vmatpush.msra.mxu3 %v6021_v54  ;;  %2770 = vpow2.f32 %v2679_v33  ;;  %v939_v21 = vadd.f32 %v938_v14, %v6026_v31  ;;  %v2924_v54 = vld [vmem:[%s5884_s3 + $0x170] sm:$0xff]  ;;  %v2929_v14 = vld [vmem:[%s5884_s3 + $0xf8] sm:$0xff] }
 0x579   :  { %1533 = vmatmul.f32.vlgmr.msra.gmra.mxu1 %v6024_v39  ;;  %1564 = vmatmul.f32.vlgmr.msra.gmra.mxu2 %v4479_v42  ;;  %v1138_v39 = vpop.f32.mrf.mxu0 }
 0x57a   :  { %1584 = vmatmul.f32.vlgmr.msra.gmra.mxu3 %v4479_v42  ;;  %1619 = vmatpush.msrb.mxu1 %v4650_v36  ;;  %v984_v24 = vadd.f32 %v982_v51, %v939_v21  ;;  %v1158_v7 = vpop.f32.mrf.mxu1  ;;  %v4828_v36 = vperm.slane %v1063_v23, 2  ;;  %v1139_v49 = vadd.f32 %v1138_v39, %v4815_v45  ;;  %v4880_v23 = vld [vmem:[%s5886_s5 + $0xe0] sm:$0xff] }
 0x57b   :  { %1639 = vmatpush.msrb.mxu2 %v2924_v54  ;;  %1659 = vmatpush.msrb.mxu3 %v4164_v40  ;;  %v1159_v5 = vadd.f32 %v1158_v7, %v4790_v46  ;;  %v4811_v40 = vld [vmem:[%s5886_s5 + $0x158] sm:$0xff]  ;;  %v2932_v54 = vld [vmem:[%s5884_s3 + $0xb0] sm:$0xff]  ;;  %v2941_v39 = vld [vmem:[%s5884_s3 + $0x20] sm:$0xff] }
 0x57c   :  { %1620 = vmatpush.msrb.mxu1 %v4658_v48  ;;  %v2680_v42 = vmul.f32 -1.442695, %v984_v24  ;;  %1831 = vmatpush.msrb.mxu0 %v4811_v40  ;;  %v2931_v24 = vld [vmem:[%s5884_s3 + $0xc8] sm:$0xff] }
 0x57d   :  { %1640 = vmatpush.msrb.mxu2 %v2925_v32  ;;  %1660 = vmatpush.msrb.mxu3 %v4177_v50  ;;  %v4826_v50 = vld [vmem:[%s5886_s5 + $0x140] sm:$0xff] }
 0x57e   :  { %v2771_v1 = vpop.eup %2770  ;;  %2772 = vpow2.f32 %v2680_v42  ;;  %1621 = vmatpush.msrb.mxu1 %v4666_v58  ;;  %1832 = vmatpush.msrb.mxu0 %v4826_v50  ;;  %v1184_v58 = vrot.slane %v1159_v5, 6  ;;  %v2933_v5 = vld [vmem:[%s5884_s3 + $0x98] sm:$0xff] }
 0x57f   :  { %v4817_v30 = vadd.f32 1.0, %v2771_v1  ;;  %1641 = vmatpush.msrb.mxu2 %v2926_v60  ;;  %1661 = vmatpush.msrb.mxu3 %v4186_v55  ;;  %v2927_v55 = vld [vmem:[%s5884_s3 + $0x128] sm:$0xff] }
 0x580   :  { %1622 = vmatpush.msrb.mxu1 %v4674_v8  ;;  %v1178_v48 = vpop.f32.mrf.mxu2  ;;  %1833 = vmatpush.msrb.mxu0 %v4840_v57  ;;  %v1187_v51 = vsel %vm1186_vm8, %v1139_v49, %v1184_v58  ;;  %v2934_v58 = vld [vmem:[%s5884_s3 + $0x80] sm:$0xff] }
 0x581   :  { %2774 = vrcp.f32 %v4817_v30  ;;  %1642 = vmatpush.msrb.mxu2 %v2927_v55  ;;  %1662 = vmatpush.msrb.mxu3 %v4194_v62  ;;  %v1179_v8 = vadd.f32 %v1178_v48, %v4828_v36  ;;  %v4853_v62 = vld [vmem:[%s5886_s5 + $0x110] sm:$0xff]  ;;  %v1230_v1 = vpop.f32.mrf.mxu0  ;;  %vm971_vm11 = vweird.f32 %v4817_v30  ;;  %v1005_v48 = vrot.slane %v4746_v56, 4 }
 0x582   :  { %1623 = vmatpush.msrb.mxu1 %v4682_v18  ;;  %1834 = vmatpush.msrb.mxu0 %v4853_v62  ;;  %v1231_v49 = vadd.f32 %v1230_v1, %v4790_v46 }
 0x583   :  { %1643 = vmatpush.msrb.mxu2 %v2928_v38  ;;  %1663 = vmatpush.msrb.mxu3 %v4204_v63  ;;  %v1185_v17 = vrot.slane %v1179_v8, 4  ;;  %v4867_v63 = vld [vmem:[%s5886_s5 + $0xf8] sm:$0xff]  ;;  %v2935_v38 = vld [vmem:[%s5884_s3 + $0x68] sm:$0xff] }
 0x584   :  { %v2773_v18 = vpop.eup %2772  ;;  %1624 = vmatpush.msrb.mxu1 %v4690_v25  ;;  %v958_v25 = vpop.f32.mrf.mxu3  ;;  %1835 = vmatpush.msrb.mxu0 %v4867_v63 }
 0x585   :  { %v4857_v33 = vadd.f32 1.0, %v2773_v18  ;;  %1644 = vmatpush.msrb.mxu2 %v2929_v14  ;;  %1664 = vmatpush.msrb.mxu3 %v4213_v13  ;;  %v1189_v31 = vsel %vm1188_vm9, %v1187_v51, %v1185_v17  ;;  %v2930_v13 = vld [vmem:[%s5884_s3 + $0xe0] sm:$0xff]  ;;  %v959_v55 = vadd.f32 %v958_v25, %v3514_v47  ;;  %v2936_v47 = vld [vmem:[%s5884_s3 + $0x70] sm:$0xff]  ;;  %v4955_v18 = vld [vmem:[%s5886_s5 + $0x68] sm:$0xff] }
 0x586   :  { %1625 = vmatpush.msrb.mxu1 %v4698_v34  ;;  %1191 = vst [vmem:[#allocation3] sm:$0x3f] %v1189_v31  ;;  %1836 = vmatpush.msrb.mxu0 %v4880_v23  ;;  %v2937_v31 = vld [vmem:[%s5884_s3 + $0x50] sm:$0xff] }
 0x587   :  { %v2775_v21 = vpop.eup %2774  ;;  %2776 = vrcp.f32 %v4857_v33  ;;  %1645 = vmatpush.msrb.mxu2 %v2930_v13  ;;  %1665 = vmatpush.msrb.mxu3 %v4221_v16  ;;  %v4892_v16 = vld [vmem:[%s5886_s5 + $0xc8] sm:$0xff]  ;;  %v1000_v17 = vand.u32 2147483648, %v4857_v33  ;;  %v998_v14 = vand.u32 2147483647, %v4857_v33  ;;  %v2938_v13 = vld [vmem:[%s5884_s3 + $0x58] sm:$0xff]  ;;  %vm994_vm15 = vweird.f32 %v4857_v33 }
 0x588   :  { %v967_v34 = vmul.f32 %v2775_v21, %v4817_v30  ;;  %1626 = vmatpush.msrb.mxu1 %v4706_v43  ;;  %1837 = vmatpush.msrb.mxu0 %v4892_v16  ;;  %v977_v43 = vand.u32 2147483648, %v4817_v30  ;;  %vm972_vm10 = vweird.f32 %v2775_v21 }
 0x589   :  { %1646 = vmatpush.msrb.mxu2 %v2931_v24  ;;  %1666 = vmatpush.msrb.mxu3 %v4229_v9  ;;  %v4904_v9 = vld [vmem:[%s5886_s5 + $0xb0] sm:$0xff]  ;;  %vm4926_vm12 = vmor %vm971_vm11, %vm972_vm10  ;;  %vm999_vm1 = vcmp.eq.f32.partialorder %v998_v14, 8.507059e+37 }
 0x58a   :  { %v968_v7 = vsub.f32 1.0, %v967_v34  ;;  %1627 = vmatpush.msrb.mxu1 %v4714_v0  ;;  %v975_v0 = vand.u32 2147483647, %v4817_v30  ;;  %1838 = vmatpush.msrb.mxu0 %v4904_v9 }
 0x58b   :  { %1647 = vmatpush.msrb.mxu2 %v2932_v54  ;;  %1667 = vmatpush.msrb.mxu3 %v4237_v10  ;;  %v4918_v10 = vld [vmem:[%s5886_s5 + $0x98] sm:$0xff] }
 0x58c   :  { %v969_v42 = vmul.f32 %v2775_v21, %v968_v7  ;;  %1628 = vmatpush.msrb.mxu1 %v4722_v2  ;;  %1839 = vmatpush.msrb.mxu0 %v4918_v10  ;;  %vm976_vm13 = vcmp.eq.f32.partialorder %v975_v0, 8.507059e+37  ;;  %v1210_v56 = vpop.f32.mrf.mxu3  ;;  %v1001_v0 = vor.u32 1.1754944e-38, %v1000_v17  ;;  %v5137_v54 = vld [vmem:[%s5886_s5 + $0x58] sm:$0xff] }
 0x58d   :  { %v4909_v32 = vpop.eup %2776  ;;  %1648 = vmatpush.msrb.mxu2 %v2933_v5  ;;  %1668 = vmatpush.msrb.mxu3 %v4245_v15  ;;  %v978_v15 = vor.u32 1.1754944e-38, %v977_v43  ;;  %v1211_v25 = vadd.f32 %v1210_v56, %v4815_v45  ;;  %v1256_v43 = vrot.slane %v1231_v49, 6  ;;  %v2944_v49 = vld [vmem:[%s5884_s3 + $0x10] sm:$0xff] }
 0x58e   :  { %v990_v2 = vmul.f32 %v4909_v32, %v4857_v33  ;;  %v970_v60 = vadd.f32 %v2775_v21, %v969_v42  ;;  %1629 = vmatpush.msrb.mxu1 %v4730_v4  ;;  %v4938_v4 = vld [vmem:[%s5886_s5 + $0x80] sm:$0xff]  ;;  %vm995_vm14 = vweird.f32 %v4909_v32  ;;  %v2939_v33 = vld [vmem:[%s5884_s3 + $0x38] sm:$0xff] }
 0x58f   :  { %1649 = vmatpush.msrb.mxu2 %v2934_v58  ;;  %1669 = vmatpush.msrb.mxu3 %v4253_v19  ;;  %vm4982_vm0 = vmor %vm994_vm15, %vm995_vm14  ;;  %v4995_v42 = vld [vmem:[%s5886_s5 + $0x38] sm:$0xff] }
 0x590   :  { %v991_v30 = vsub.f32 1.0, %v990_v2  ;;  %v974_v8 = vsel %vm4926_vm12, %v2775_v21, %v970_v60  ;;  %1630 = vmatpush.msrb.mxu1 %v4738_v6  ;;  %1840 = vmatpush.msrb.mxu0 %v4938_v4  ;;  %6031 = vst [vmem:[#allocation8_spill] sm:$0xff] %v4995_v42  ;;  %v1321_v2 = vpop.f32.mrf.mxu0  ;;  %v1258_v60 = vsel %vm1186_vm8, %v1211_v25, %v1256_v43  ;;  %v5128_v43 = vld [vmem:[%s5886_s5 + $0x70] sm:$0xff] }
 0x591   :  { %v979_v19 = vsel %vm976_vm13, %v978_v15, %v974_v8  ;;  %1650 = vmatpush.msrb.mxu2 %v2935_v38  ;;  %1670 = vmatpush.msrb.mxu3 %v2936_v47  ;;  %v5009_v15 = vld [vmem:[%s5886_s5 + $0x178] sm:$0xff]  ;;  %v1322_v8 = vadd.f32 %v1321_v2, %v4828_v36  ;;  %v5041_v47 = vld [vmem:[%s5886_s5 + $0x148] sm:$0xff] }
 0x592   :  { %v992_v6 = vmul.f32 %v4909_v32, %v991_v30  ;;  %v1004_v51 = vmul.f32 %v979_v19, %v959_v55  ;;  %1631 = vmatpush.msrb.mxu1 %v4751_v59  ;;  %1841 = vmatpush.msrb.mxu0 %v4955_v18  ;;  %v4973_v59 = vld [vmem:[%s5886_s5 + $0x50] sm:$0xff]  ;;  %v2943_v30 = vld [vmem:[%s5884_s3 + $0x8] sm:$0xff]  ;;  %v5029_v55 = vld [vmem:[%s5886_s5 + $0x160] sm:$0xff] }
 0x593   :  { %1651 = vmatpush.msrb.mxu2 %v2937_v31  ;;  %v1250_v21 = vpop.f32.mrf.mxu1  ;;  %1671 = vmatpush.msrb.mxu3 %v2938_v13  ;;  %v5179_v2 = vld [vmem:[%s5886_s5 + $0x168] sm:$0xff] }
 0x594   :  { %v993_v34 = vadd.f32 %v4909_v32, %v992_v6  ;;  %v1007_v24 = vadd.f32 %v1005_v48, %v1004_v51  ;;  %1632 = vmatpush.msrb.mxu1 %v4760_v61  ;;  %v1251_v7 = vadd.f32 %v1250_v21, %v4828_v36  ;;  %1842 = vmatpush.msrb.mxu0 %v4973_v59  ;;  %v2940_v61 = vld [vmem:[%s5884_s3 + $0x40] sm:$0xff]  ;;  %v5046_v6 = vld [vmem:[%s5886_s5 + $0x8] sm:$0xff]  ;;  %v5057_v21 = vld [vmem:[%s5886_s5 + $0x130] sm:$0xff] }
 0x595   :  { %1652 = vmatpush.msrb.mxu2 %v2939_v33  ;;  %1672 = vmatpush.msrb.mxu3 %v2940_v61  ;;  %6033 = vst [vmem:[#allocation13_spill] sm:$0xff] %v5046_v6  ;;  %v5164_v33 = vld [vmem:[%s5886_s5 + $0x10] sm:$0xff]  ;;  %v6038_v61 = vmov 0.0  }
 0x596   :  { %v997_v5 = vsel %vm4982_vm0, %v4909_v32, %v993_v34  ;;  %2778 = vtanh.f32 %v1007_v24  ;;  %1633 = vmatpush.msrb.mxu1 %v4769_v26  ;;  %v1257_v1 = vrot.slane %v1251_v7, 4  ;;  %1843 = vmatpush.msrb.mxu0 %v4995_v42  ;;  %v2942_v26 = vld [vmem:[%s5884_s3 + $0x28] sm:$0xff]  ;;  %v5017_v32 = vld [vmem:[%s5886_s5 + $0x20] sm:$0xff]  ;;  %v5067_v34 = vld [vmem:[%s5886_s5 + $0x118] sm:$0xff]  ;;  %6036 = vst [vmem:[#allocation15_spill] sm:$0xff] %v5164_v33 }
 0x597   :  { %1653 = vmatpush.msrb.mxu2 %v2941_v39  ;;  %1673 = vmatpush.msrb.mxu3 %v2942_v26  ;;  %6032 = vst [vmem:[#allocation10_spill] sm:$0xff] %v5017_v32  ;;  %v1002_v48 = vsel %vm999_vm1, %v1001_v0, %v997_v5 }
 0x598   :  { %v1259_v58 = vsel %vm1188_vm9, %v1258_v60, %v1257_v1  ;;  %1634 = vmatpush.msrb.mxu1 %v4778_v28  ;;  %1844 = vmatpush.msrb.mxu0 %v5017_v32  ;;  %v1009_v19 = vsub.f32 1.0, %v1002_v48  ;;  %v1011_v14 = vmul.f32 %v1002_v48, %v4440_v22  ;;  %v6039_v1 = vld [vmem:[#allocation21_spill] sm:$0xff]  ;;  %v6040_v48 = vld [vmem:[#allocation22_spill] sm:$0xff] }
 0x599   :  { %1262 = vst [vmem:[#allocation3 + $0x6] sm:$0x3f] %v1259_v58  ;;  %1654 = vmatpush.msrb.mxu2 %v2943_v30  ;;  %v1281_v28 = vpop.f32.mrf.mxu2  ;;  %1674 = vmatpush.msrb.mxu3 %v2944_v49  ;;  %v5190_v58 = vld [vmem:[%s5886_s5 + $0x150] sm:$0xff]  ;;  %v5200_v49 = vld [vmem:[%s5886_s5 + $0x138] sm:$0xff] }
 0x59a   :  { %1717 = vmatpush.msra.mxu1 %v4799_v3  ;;  %v1301_v56 = vpop.f32.mrf.mxu3  ;;  %1845 = vmatpush.msrb.mxu0 %v5046_v6  ;;  %v1282_v25 = vadd.f32 %v1281_v28, %v4815_v45 }
 0x59b   :  { %1737 = vmatpush.msra.mxu2 %v5009_v15  ;;  %v1302_v38 = vadd.f32 %v1301_v56, %v4790_v46  ;;  %1810 = vmatpush.msra.mxu3 %v4386_v12  ;;  %v1328_v12 = vrot.slane %v1322_v8, 4  ;;  %v6041_v56 = vld [vmem:[#allocation23_spill] sm:$0xff] }
 0x59c   :  { %1718 = vmatpush.msra.mxu1 %v4811_v40  ;;  %v2779_v17 = vpop.eup %2778  ;;  %1963 = vmatpush.msra.mxu0 %v5009_v15 }
 0x59d   :  { %1738 = vmatpush.msra.mxu2 %v5029_v55  ;;  %v1010_v51 = vmul.f32 %v2779_v17, %v1009_v19  ;;  %v1327_v31 = vrot.slane %v1302_v38, 6  ;;  %1811 = vmatpush.msra.mxu3 %v4392_v37  ;;  %v5077_v37 = vld [vmem:[%s5886_s5 + $0x100] sm:$0xff] }
 0x59e   :  { %1719 = vmatpush.msra.mxu1 %v4826_v50  ;;  %1964 = vmatpush.msra.mxu0 %v5029_v55  ;;  %v5210_v17 = vld [vmem:[%s5886_s5 + $0x120] sm:$0xff] }
 0x59f   :  { %1739 = vmatpush.msra.mxu2 %v5041_v47  ;;  %v1012_v13 = vadd.f32 %v1011_v14, %v1010_v51  ;;  %v1329_v22 = vsel %vm1186_vm8, %v1282_v25, %v1327_v31  ;;  %1812 = vmatpush.msra.mxu3 %v4400_v20  ;;  %v5086_v20 = vld [vmem:[%s5886_s5 + $0xe8] sm:$0xff]  ;;  %v5228_v14 = vld [vmem:[%s5886_s5 + $0xf0] sm:$0xff]  ;;  %v5236_v25 = vld [vmem:[%s5886_s5 + $0xd8] sm:$0xff] }
 0x5a0   :  { %1720 = vmatpush.msra.mxu1 %v4840_v57  ;;  %v1330_v24 = vsel %vm1188_vm9, %v1329_v22, %v1328_v12  ;;  %1965 = vmatpush.msra.mxu0 %v5041_v47  ;;  %v5219_v51 = vld [vmem:[%s5886_s5 + $0x108] sm:$0xff]  ;;  %v5244_v31 = vld [vmem:[%s5886_s5 + $0xc0] sm:$0xff]  ;;  %v5268_v22 = vld [vmem:[%s5886_s5 + $0x78] sm:$0xff] }
 0x5a1   :  { %1740 = vmatpush.msra.mxu2 %v5057_v21  ;;  %1014 = vst [vmem:[#allocation2 + $0xe] sm:$0x3] %v1012_v13  ;;  %1813 = vmatpush.msra.mxu3 %v4406_v35  ;;  %v5095_v35 = vld [vmem:[%s5886_s5 + $0xd0] sm:$0xff]  ;;  %v5252_v12 = vld [vmem:[%s5886_s5 + $0xa8] sm:$0xff] }
 0x5a2   :  { %1721 = vmatpush.msra.mxu1 %v4853_v62  ;;  %1333 = vst [vmem:[#allocation3 + $0xc] sm:$0x3f] %v1330_v24  ;;  %1966 = vmatpush.msra.mxu0 %v5057_v21  ;;  %v5260_v13 = vld [vmem:[%s5886_s5 + $0x90] sm:$0xff]  ;;  %v5276_v24 = vld [vmem:[%s5886_s5 + $0x60] sm:$0xff] }
 0x5a3   :  { %1741 = vmatpush.msra.mxu2 %v5067_v34  ;;  %1814 = vmatpush.msra.mxu3 %v4412_v27  ;;  %v5104_v27 = vld [vmem:[%s5886_s5 + $0xb8] sm:$0xff] }
 0x5a4   :  { %1722 = vmatpush.msra.mxu1 %v4867_v63  ;;  %1967 = vmatpush.msra.mxu0 %v5067_v34 }
 0x5a5   :  { %1742 = vmatpush.msra.mxu2 %v5077_v37  ;;  %1815 = vmatpush.msra.mxu3 %v4418_v53  ;;  %v5113_v53 = vld [vmem:[%s5886_s5 + $0xa0] sm:$0xff] }
 0x5a6   :  { %1723 = vmatpush.msra.mxu1 %v4880_v23  ;;  %1968 = vmatpush.msra.mxu0 %v5077_v37 }
 0x5a7   :  { %1743 = vmatpush.msra.mxu2 %v5086_v20  ;;  %1816 = vmatpush.msra.mxu3 %v4424_v29  ;;  %v5120_v29 = vld [vmem:[%s5886_s5 + $0x88] sm:$0xff] }
 0x5a8   :  { %1724 = vmatpush.msra.mxu1 %v4892_v16  ;;  %v1618_v7 = vld [vmem:[#allocation2 + $0xe] sm:$0x3]  ;;  %1969 = vmatpush.msra.mxu0 %v5086_v20 }
 0x5a9   :  { %1744 = vmatpush.msra.mxu2 %v5095_v35  ;;  %1635 = vmatmul.f32.vlgmr.msrb.gmra.mxu1 %v1618_v7 }
 0x5aa   :  { %1725 = vmatpush.msra.mxu1 %v4904_v9  ;;  %1655 = vmatmul.f32.vlgmr.msrb.gmra.mxu2 %v1618_v7 }
 0x5ab   :  { %1745 = vmatpush.msra.mxu2 %v5104_v27  ;;  %1675 = vmatmul.f32.vlgmr.msrb.gmra.mxu3 %v1618_v7 }
 0x5ac   :  { %1726 = vmatpush.msra.mxu1 %v4918_v10  ;;  %1817 = vmatpush.msra.mxu3 %v4430_v41  ;;  %v5146_v41 = vld [vmem:[%s5886_s5 + $0x40] sm:$0xff] }
 0x5ad   :  { %1746 = vmatpush.msra.mxu2 %v5113_v53  ;;  %1970 = vmatpush.msra.mxu0 %v5095_v35 }
 0x5ae   :  { %1727 = vmatpush.msra.mxu1 %v4938_v4  ;;  %1818 = vmatpush.msra.mxu3 %v4436_v52  ;;  %v5155_v52 = vld [vmem:[%s5886_s5 + $0x28] sm:$0xff] }
 0x5af   :  { %1747 = vmatpush.msra.mxu2 %v5120_v29  ;;  %1971 = vmatpush.msra.mxu0 %v5104_v27  ;;  %6034 = vst [vmem:[#allocation14_spill] sm:$0xff] %v5155_v52 }
 0x5b0   :  { %1728 = vmatpush.msra.mxu1 %v4955_v18  ;;  %1819 = vmatpush.msra.mxu3 %v4449_v11  ;;  %v6035_v11 = vld [vmem:[#allocation19_spill] sm:$0xff] }
 0x5b1   :  { %1748 = vmatpush.msra.mxu2 %v5128_v43  ;;  %1972 = vmatpush.msra.mxu0 %v5113_v53 }
 0x5b2   :  { %1729 = vmatpush.msra.mxu1 %v4973_v59  ;;  %1820 = vmatpush.msra.mxu3 %v4458_v44  ;;  %v6037_v44 = vld [vmem:[#allocation20_spill] sm:$0xff] }
 0x5b3   :  { %1749 = vmatpush.msra.mxu2 %v5137_v54  ;;  %1973 = vmatpush.msra.mxu0 %v5120_v29 }
 0x5b4   :  { %1730 = vmatpush.msra.mxu1 %v4995_v42  ;;  %1821 = vmatpush.msra.mxu3 %v6035_v11  ;;  %v1352_v0 = vpop.f32.mrf.mxu1 }
 0x5b5   :  { %1750 = vmatpush.msra.mxu2 %v5146_v41  ;;  %1974 = vmatpush.msra.mxu0 %v5128_v43  ;;  %v1353_v30 = vadd.f32 %v1352_v0, %v4815_v45 }
 0x5b6   :  { %1731 = vmatpush.msra.mxu1 %v5017_v32  ;;  %1822 = vmatpush.msra.mxu3 %v6037_v44 }
 0x5b7   :  { %1751 = vmatpush.msra.mxu2 %v5155_v52  ;;  %1975 = vmatpush.msra.mxu0 %v5137_v54 }
 0x5b8   :  { %1732 = vmatpush.msra.mxu1 %v5046_v6  ;;  %1823 = vmatpush.msra.mxu3 %v6039_v1 }
 0x5b9   :  { %1752 = vmatpush.msra.mxu2 %v5164_v33  ;;  %1733 = vmatmul.f32.vlgmr.msra.gmra.mxu1 %v6038_v61 }
 0x5ba   :  { %1753 = vmatmul.f32.vlgmr.msra.gmra.mxu2 %v6038_v61  ;;  %1850 = vmatpush.msrb.mxu1 %v5009_v15  ;;  %v1372_v5 = vpop.f32.mrf.mxu2 }
 0x5bb   :  { %1923 = vmatpush.msrb.mxu2 %v5179_v2  ;;  %v1373_v60 = vadd.f32 %v1372_v5, %v4790_v46  ;;  %v1392_v39 = vpop.f32.mrf.mxu3  ;;  %1824 = vmatpush.msra.mxu3 %v6040_v48 }
 0x5bc   :  { %1851 = vmatpush.msrb.mxu1 %v5029_v55  ;;  %v1393_v26 = vadd.f32 %v1392_v39, %v4828_v36  ;;  %1976 = vmatpush.msra.mxu0 %v5146_v41 }
 0x5bd   :  { %1924 = vmatpush.msrb.mxu2 %v5190_v58  ;;  %v1398_v8 = vrot.slane %v1373_v60, 6  ;;  %1825 = vmatpush.msra.mxu3 %v6041_v56 }
 0x5be   :  { %1852 = vmatpush.msrb.mxu1 %v5041_v47  ;;  %v1399_v28 = vrot.slane %v1393_v26, 4  ;;  %1977 = vmatpush.msra.mxu0 %v5155_v52 }
 0x5bf   :  { %1925 = vmatpush.msrb.mxu2 %v5200_v49  ;;  %v1400_v19 = vsel %vm1186_vm8, %v1353_v30, %v1398_v8  ;;  %1943 = vmatpush.msrb.mxu3 %v4799_v3  ;;  %v5333_v8 = vld [vmem:[%s5886_s5 + $0x30] sm:$0xff] }
 0x5c0   :  { %1853 = vmatpush.msrb.mxu1 %v5057_v21  ;;  %v1401_v38 = vsel %vm1188_vm9, %v1400_v19, %v1399_v28  ;;  %1978 = vmatpush.msra.mxu0 %v5164_v33  ;;  %v5341_v19 = vld [vmem:[%s5886_s5 + $0x18] sm:$0xff] }
 0x5c1   :  { %1926 = vmatpush.msrb.mxu2 %v5210_v17  ;;  %1404 = vst [vmem:[#allocation3 + $0x12] sm:$0x3f] %v1401_v38  ;;  %1944 = vmatpush.msrb.mxu3 %v4811_v40 }
 0x5c2   :  { %1854 = vmatpush.msrb.mxu1 %v5067_v34  ;;  %6042 = vst [vmem:[#allocation7_spill] sm:$0xff] %v5341_v19 }
 0x5c3   :  { %1927 = vmatpush.msrb.mxu2 %v5219_v51  ;;  %1945 = vmatpush.msrb.mxu3 %v4826_v50 }
 0x5c4   :  { %1855 = vmatpush.msrb.mxu1 %v5077_v37 }
 0x5c5   :  { %1928 = vmatpush.msrb.mxu2 %v5228_v14  ;;  %1946 = vmatpush.msrb.mxu3 %v4840_v57 }
 0x5c6   :  { %1856 = vmatpush.msrb.mxu1 %v5086_v20 }
 0x5c7   :  { %1929 = vmatpush.msrb.mxu2 %v5236_v25  ;;  %1947 = vmatpush.msrb.mxu3 %v4853_v62 }
 0x5c8   :  { %1857 = vmatpush.msrb.mxu1 %v5095_v35 }
 0x5c9   :  { %1930 = vmatpush.msrb.mxu2 %v5244_v31  ;;  %1948 = vmatpush.msrb.mxu3 %v4867_v63 }
 0x5ca   :  { %1858 = vmatpush.msrb.mxu1 %v5104_v27 }
 0x5cb   :  { %1931 = vmatpush.msrb.mxu2 %v5252_v12  ;;  %1949 = vmatpush.msrb.mxu3 %v4880_v23 }
 0x5cc   :  { %1859 = vmatpush.msrb.mxu1 %v5113_v53 }
 0x5cd   :  { %1932 = vmatpush.msrb.mxu2 %v5260_v13  ;;  %1950 = vmatpush.msrb.mxu3 %v4892_v16 }
 0x5ce   :  { %1860 = vmatpush.msrb.mxu1 %v5120_v29 }
 0x5cf   :  { %1933 = vmatpush.msrb.mxu2 %v5268_v22  ;;  %1951 = vmatpush.msrb.mxu3 %v4904_v9 }
 0x5d0   :  { %1861 = vmatpush.msrb.mxu1 %v5128_v43 }
 0x5d1   :  { %1934 = vmatpush.msrb.mxu2 %v5276_v24  ;;  %1952 = vmatpush.msrb.mxu3 %v4918_v10 }
 0x5d2   :  { %1862 = vmatpush.msrb.mxu1 %v5137_v54 }
 0x5d3   :  { %1935 = vmatpush.msrb.mxu2 %v6037_v44  ;;  %1953 = vmatpush.msrb.mxu3 %v4938_v4  ;;  %v1423_v44 = vpop.f32.mrf.mxu0 }
 0x5d4   :  { %1863 = vmatpush.msrb.mxu1 %v5146_v41 }
 0x5d5   :  { %1936 = vmatpush.msrb.mxu2 %v6039_v1  ;;  %v1443_v7 = vpop.f32.mrf.mxu1  ;;  %1954 = vmatpush.msrb.mxu3 %v4955_v18  ;;  %v1424_v1 = vadd.f32 %v1423_v44, %v4815_v45 }
 0x5d6   :  { %1864 = vmatpush.msrb.mxu1 %v5155_v52  ;;  %v1444_v11 = vadd.f32 %v1443_v7, %v4790_v46 }
 0x5d7   :  { %1937 = vmatpush.msrb.mxu2 %v6040_v48  ;;  %1955 = vmatpush.msrb.mxu3 %v4973_v59  ;;  %v5326_v48 = vld [vmem:[%s5886_s5 + $0x48] sm:$0xff] }
 0x5d8   :  { %1865 = vmatpush.msrb.mxu1 %v5164_v33  ;;  %v1469_v61 = vrot.slane %v1444_v11, 6  ;;  %v5349_v11 = vld [vmem:[%s5886_s5] sm:$0xff] }
 0x5d9   :  { %1938 = vmatpush.msrb.mxu2 %v6041_v56  ;;  %1956 = vmatpush.msrb.mxu3 %v4995_v42  ;;  %6043 = vst [vmem:[#allocation9_spill] sm:$0xff] %v5349_v11 }
 0x5da   :  { %2036 = vmatpush.msra.mxu1 %v5179_v2  ;;  %v1471_v39 = vsel %vm1186_vm8, %v1424_v1, %v1469_v61 }
 0x5db   :  { %2056 = vmatpush.msra.mxu2 %v4799_v3  ;;  %v1463_v0 = vpop.f32.mrf.mxu2  ;;  %1957 = vmatpush.msrb.mxu3 %v5017_v32  ;;  %v1514_v30 = vpop.f32.mrf.mxu0 }
 0x5dc   :  { %2037 = vmatpush.msra.mxu1 %v5190_v58  ;;  %v1464_v5 = vadd.f32 %v1463_v0, %v4828_v36  ;;  %v1494_v28 = vpop.f32.mrf.mxu3  ;;  %v1515_v56 = vadd.f32 %v1514_v30, %v4790_v46 }
 0x5dd   :  { %2057 = vmatpush.msra.mxu2 %v4811_v40  ;;  %1958 = vmatpush.msrb.mxu3 %v5046_v6  ;;  %v1495_v38 = vadd.f32 %v1494_v28, %v4815_v45 }
 0x5de   :  { %2038 = vmatpush.msra.mxu1 %v5200_v49  ;;  %v1470_v60 = vrot.slane %v1464_v5, 4  ;;  %v1540_v61 = vrot.slane %v1515_v56, 6 }
 0x5df   :  { %2058 = vmatpush.msra.mxu2 %v4826_v50 }
 0x5e0   :  { %2039 = vmatpush.msra.mxu1 %v5210_v17  ;;  %v1472_v26 = vsel %vm1188_vm9, %v1471_v39, %v1470_v60  ;;  %v1542_v1 = vsel %vm1186_vm8, %v1495_v38, %v1540_v61  ;;  %v1112_v38 = vld [vmem:[%s5887_s6] sm:$0x7] }
 0x5e1   :  { %2059 = vmatpush.msra.mxu2 %v4840_v57  ;;  %1475 = vst [vmem:[#allocation3 + $0x18] sm:$0x3f] %v1472_v26 }
 0x5e2   :  { %2040 = vmatpush.msra.mxu1 %v5219_v51 }
 0x5e3   :  { %2060 = vmatpush.msra.mxu2 %v4853_v62  ;;  %v1605_v5 = vpop.f32.mrf.mxu0 }
 0x5e4   :  { %2041 = vmatpush.msra.mxu1 %v5228_v14  ;;  %v1606_v39 = vadd.f32 %v1605_v5, %v4828_v36  ;;  %v1689_v5 = vld [vmem:[#allocation3] sm:$0x3f] }
 0x5e5   :  { %2061 = vmatpush.msra.mxu2 %v4867_v63 }
 0x5e6   :  { %2042 = vmatpush.msra.mxu1 %v5236_v25 }
 0x5e7   :  { %2062 = vmatpush.msra.mxu2 %v4880_v23 }
 0x5e8   :  { %2043 = vmatpush.msra.mxu1 %v5244_v31 }
 0x5e9   :  { %2063 = vmatpush.msra.mxu2 %v4892_v16 }
 0x5ea   :  { %2044 = vmatpush.msra.mxu1 %v5252_v12 }
 0x5eb   :  { %2064 = vmatpush.msra.mxu2 %v4904_v9  ;;  %v1714_v61 = vpop.f32.mrf.mxu0 }
 0x5ec   :  { %2045 = vmatpush.msra.mxu1 %v5260_v13 }
 0x5ed   :  { %2065 = vmatpush.msra.mxu2 %v4918_v10 }
 0x5ee   :  { %2046 = vmatpush.msra.mxu1 %v5268_v22 }
 0x5ef   :  { %2066 = vmatpush.msra.mxu2 %v4938_v4 }
 0x5f0   :  { %2047 = vmatpush.msra.mxu1 %v5276_v24 }
 0x5f1   :  { %2067 = vmatpush.msra.mxu2 %v4955_v18 }
 0x5f2   :  { %2048 = vmatpush.msra.mxu1 %v5326_v48 }
 0x5f3   :  { %2068 = vmatpush.msra.mxu2 %v4973_v59 }
 0x5f4   :  { %2049 = vmatpush.msra.mxu1 %v5333_v8 }
 0x5f5   :  { %2069 = vmatpush.msra.mxu2 %v4995_v42 }
 0x5f6   :  { %2050 = vmatpush.msra.mxu1 %v5341_v19  ;;  %v1534_v7 = vpop.f32.mrf.mxu1 }
 0x5f7   :  { %2070 = vmatpush.msra.mxu2 %v5017_v32  ;;  %v1535_v44 = vadd.f32 %v1534_v7, %v4828_v36  ;;  %v1612_v7 = vrot.slane %v1606_v39, 4 }
 0x5f8   :  { %2051 = vmatpush.msra.mxu1 %v5349_v11 }
 0x5f9   :  { %2071 = vmatpush.msra.mxu2 %v5046_v6  ;;  %v1541_v0 = vrot.slane %v1535_v44, 4  ;;  %v5364_v44 = vperm.slane %v1112_v38, 0 }
 0x5fb   :  { %v1543_v60 = vsel %vm1188_vm9, %v1542_v1, %v1541_v0  ;;  %6044 = vst [vmem:[#allocation11_spill] sm:$0xff] %v5364_v44  ;;  %v1715_v0 = vadd.f32 %v1714_v61, %v5364_v44 }
 0x5fc   :  { %1546 = vst [vmem:[#allocation3 + $0x1e] sm:$0x3f] %v1543_v60  ;;  %v1565_v26 = vpop.f32.mrf.mxu2 }
 0x5fd   :  { %v1585_v30 = vpop.f32.mrf.mxu3  ;;  %v1566_v11 = vadd.f32 %v1565_v26, %v4815_v45  ;;  %v1757_v1 = vadd.f32 %v1715_v0, %v1689_v5  ;;  %v5371_v0 = vperm.slane %v1112_v38, 1 }
 0x5fe   :  { %v1586_v28 = vadd.f32 %v1585_v30, %v4790_v46 }
 0x5ff   :  { %v2681_v60 = vmul.f32 -1.442695, %v1757_v1  ;;  %6045 = vst [vmem:[#allocation12_spill] sm:$0xff] %v5371_v0 }
 0x600   :  { %v1611_v33 = vrot.slane %v1586_v28, 6 }
 0x601   :  { %2780 = vpow2.f32 %v2681_v60 }
 0x602   :  { %v1613_v6 = vsel %vm1186_vm8, %v1566_v11, %v1611_v33 }
 0x603   :  { %v1614_v56 = vsel %vm1188_vm9, %v1613_v6, %v1612_v7 }
 0x604   :  { %1617 = vst [vmem:[#allocation3 + $0x24] sm:$0x3f] %v1614_v56 }
 0x607   :  { %v2781_v26 = vpop.eup %2780 }
 0x608   :  { %v1761_v39 = vadd.f32 1.0, %v2781_v26 }
 0x60a   :  { %2782 = vrcp.f32 %v1761_v39  ;;  %vm1767_vm3 = vweird.f32 %v1761_v39 }
 0x610   :  { %v2783_v44 = vpop.eup %2782 }
 0x611   :  { %v1763_v26 = vmul.f32 %v2783_v44, %v1761_v39  ;;  %vm1768_vm2 = vweird.f32 %v2783_v44 }
 0x612   :  { %vm1769_vm4 = vmor %vm1767_vm3, %vm1768_vm2 }
 0x613   :  { %v1764_v52 = vsub.f32 1.0, %v1763_v26 }
 0x626   :  { %v1636_v30 = vpop.f32.mrf.mxu1 }
 0x627   :  { %v1637_v28 = vadd.f32 %v1636_v30, %v4815_v45  ;;  %v1765_v30 = vmul.f32 %v2783_v44, %v1764_v52 }
 0x62d   :  { %v1656_v33 = vpop.f32.mrf.mxu2 }
 0x62e   :  { %v1657_v6 = vadd.f32 %v1656_v33, %v4790_v46  ;;  %v1676_v11 = vpop.f32.mrf.mxu3  ;;  %v1778_v46 = vrot.slane %v1689_v5, 2 }
 0x62f   :  { %v1677_v56 = vadd.f32 %v1676_v11, %v4828_v36  ;;  %v5375_v36 = vperm.slane %v1112_v38, 2  ;;  %v1801_v38 = vrot.slane %v1689_v5, 4 }
 0x630   :  { %v1682_v7 = vrot.slane %v1657_v6, 6  ;;  %v1766_v6 = vadd.f32 %v2783_v44, %v1765_v30 }
 0x631   :  { %v1683_v61 = vrot.slane %v1677_v56, 4 }
 0x632   :  { %v1684_v32 = vsel %vm1186_vm8, %v1637_v28, %v1682_v7  ;;  %v1773_v7 = vand.u32 2147483648, %v1761_v39 }
 0x633   :  { %v1685_v1 = vsel %vm1188_vm9, %v1684_v32, %v1683_v61  ;;  %v1771_v32 = vand.u32 2147483647, %v1761_v39 }
 0x634   :  { %1688 = vst [vmem:[#allocation3 + $0x2a] sm:$0x3f] %v1685_v1  ;;  %v1770_v1 = vsel %vm1769_vm4, %v2783_v44, %v1766_v6 }
 0x635   :  { %vm1772_vm5 = vcmp.eq.f32.partialorder %v1771_v32, 8.507059e+37 }
 0x636   :  { %v1734_v60 = vpop.f32.mrf.mxu1 }
 0x637   :  { %v1735_v19 = vadd.f32 %v1734_v60, %v5371_v0 }
 0x639   :  { %v1780_v33 = vadd.f32 %v1778_v46, %v1735_v19  ;;  %v1774_v19 = vor.u32 1.1754944e-38, %v1773_v7 }
 0x63b   :  { %v2682_v45 = vmul.f32 -1.442695, %v1780_v33  ;;  %v1775_v60 = vsel %vm1772_vm5, %v1774_v19, %v1770_v1 }
 0x63d   :  { %2784 = vpow2.f32 %v2682_v45  ;;  %v1754_v28 = vpop.f32.mrf.mxu2 }
 0x63e   :  { %v1755_v61 = vadd.f32 %v1754_v28, %v5375_v36 }
 0x640   :  { %v1800_v26 = vmul.f32 %v1775_v60, %v1755_v61 }
 0x642   :  { %v1803_v33 = vadd.f32 %v1801_v38, %v1800_v26  ;;  %v6054_v26 = vld [vmem:[#allocation11_spill] sm:$0xff] }
 0x643   :  { %v2785_v11 = vpop.eup %2784 }
 0x644   :  { %v1784_v56 = vadd.f32 1.0, %v2785_v11 }
 0x646   :  { %2786 = vrcp.f32 %v1784_v56  ;;  %v1796_v30 = vand.u32 2147483648, %v1784_v56  ;;  %v1794_v11 = vand.u32 2147483647, %v1784_v56  ;;  %vm1790_vm7 = vweird.f32 %v1784_v56 }
 0x647   :  { %2788 = vtanh.f32 %v1803_v33 }
 0x648   :  { %v1797_v42 = vor.u32 1.1754944e-38, %v1796_v30  ;;  %vm1795_vm9 = vcmp.eq.f32.partialorder %v1794_v11, 8.507059e+37 }
 0x64c   :  { %v2787_v52 = vpop.eup %2786 }
 0x64d   :  { %v1786_v46 = vmul.f32 %v2787_v52, %v1784_v56  ;;  %vm1791_vm6 = vweird.f32 %v2787_v52  ;;  %v2789_v7 = vpop.eup %2788 }
 0x64e   :  { %vm1792_vm8 = vmor %vm1790_vm7, %vm1791_vm6 }
 0x64f   :  { %v1787_v45 = vsub.f32 1.0, %v1786_v46 }
 0x651   :  { %v1788_v0 = vmul.f32 %v2787_v52, %v1787_v45 }
 0x653   :  { %v1789_v39 = vadd.f32 %v2787_v52, %v1788_v0 }
 0x655   :  { %v1793_v28 = vsel %vm1792_vm8, %v2787_v52, %v1789_v39 }
 0x656   :  { %v1798_v44 = vsel %vm1795_vm9, %v1797_v42, %v1793_v28  ;;  %v6053_v42 = vld [vmem:[#allocation12_spill] sm:$0xff] }
 0x657   :  { %v1805_v6 = vsub.f32 1.0, %v1798_v44  ;;  %v1807_v61 = vmul.f32 0.0, %v1798_v44 }
 0x659   :  { %v1806_v32 = vmul.f32 %v2789_v7, %v1805_v6 }
 0x65b   :  { %v5378_v5 = vadd.f32 %v1807_v61, %v1806_v32 }
 0x65d   :  { %1826 = vmatmul.f32.vlgmr.msra.gmra.mxu3 %v5378_v5  ;;  %1846 = vmatmul.f32.vlgmr.msrb.gmra.mxu0 %v5378_v5 }
 0x65e   :  { %1866 = vmatmul.f32.vlgmr.msrb.gmra.mxu1 %v5378_v5  ;;  %2076 = vmatpush.msra.mxu3 %v5009_v15 }
 0x65f   :  { %2149 = vmatpush.msrb.mxu0 %v5179_v2  ;;  %2169 = vmatpush.msrb.mxu1 %v4799_v3  ;;  %v6046_v3 = vld [vmem:[#allocation8_spill] sm:$0xff] }
 0x660   :  { %2077 = vmatpush.msra.mxu3 %v5029_v55 }
 0x661   :  { %2150 = vmatpush.msrb.mxu0 %v5190_v58  ;;  %2170 = vmatpush.msrb.mxu1 %v4811_v40  ;;  %v6047_v40 = vld [vmem:[#allocation14_spill] sm:$0xff] }
 0x662   :  { %2078 = vmatpush.msra.mxu3 %v5041_v47 }
 0x663   :  { %2151 = vmatpush.msrb.mxu0 %v5200_v49  ;;  %2171 = vmatpush.msrb.mxu1 %v4826_v50  ;;  %v6048_v50 = vld [vmem:[#allocation7_spill] sm:$0xff] }
 0x664   :  { %2079 = vmatpush.msra.mxu3 %v5057_v21 }
 0x665   :  { %2152 = vmatpush.msrb.mxu0 %v5210_v17  ;;  %2172 = vmatpush.msrb.mxu1 %v4840_v57  ;;  %v6049_v57 = vld [vmem:[#allocation10_spill] sm:$0xff] }
 0x666   :  { %2080 = vmatpush.msra.mxu3 %v5067_v34 }
 0x667   :  { %2153 = vmatpush.msrb.mxu0 %v5219_v51  ;;  %2173 = vmatpush.msrb.mxu1 %v4853_v62  ;;  %v6050_v62 = vld [vmem:[#allocation15_spill] sm:$0xff] }
 0x668   :  { %2081 = vmatpush.msra.mxu3 %v5077_v37 }
 0x669   :  { %2154 = vmatpush.msrb.mxu0 %v5228_v14  ;;  %2174 = vmatpush.msrb.mxu1 %v4867_v63  ;;  %v6051_v63 = vld [vmem:[#allocation9_spill] sm:$0xff] }
 0x66a   :  { %2082 = vmatpush.msra.mxu3 %v5086_v20 }
 0x66b   :  { %2155 = vmatpush.msrb.mxu0 %v5236_v25  ;;  %2175 = vmatpush.msrb.mxu1 %v4880_v23  ;;  %v6052_v23 = vld [vmem:[#allocation13_spill] sm:$0xff] }
 0x66c   :  { %2083 = vmatpush.msra.mxu3 %v5095_v35 }
 0x66d   :  { %2156 = vmatpush.msrb.mxu0 %v5244_v31  ;;  %2176 = vmatpush.msrb.mxu1 %v4892_v16  ;;  %v1809_v16 = vld [vmem:[#allocation3 + $0x6] sm:$0x3f] }
 0x66e   :  { %2084 = vmatpush.msra.mxu3 %v5104_v27  ;;  %v1891_v56 = vrot.slane %v1809_v16, 2 }
 0x66f   :  { %2157 = vmatpush.msrb.mxu0 %v5252_v12  ;;  %2177 = vmatpush.msrb.mxu1 %v4904_v9 }
 0x670   :  { %2085 = vmatpush.msra.mxu3 %v5113_v53 }
 0x671   :  { %2158 = vmatpush.msrb.mxu0 %v5260_v13  ;;  %2178 = vmatpush.msrb.mxu1 %v4918_v10 }
 0x672   :  { %2086 = vmatpush.msra.mxu3 %v5120_v29 }
 0x673   :  { %2159 = vmatpush.msrb.mxu0 %v5268_v22  ;;  %2179 = vmatpush.msrb.mxu1 %v4938_v4 }
 0x674   :  { %2087 = vmatpush.msra.mxu3 %v5128_v43 }
 0x675   :  { %2160 = vmatpush.msrb.mxu0 %v5276_v24  ;;  %2180 = vmatpush.msrb.mxu1 %v4955_v18 }
 0x676   :  { %2088 = vmatpush.msra.mxu3 %v5137_v54 }
 0x677   :  { %2161 = vmatpush.msrb.mxu0 %v5326_v48  ;;  %2181 = vmatpush.msrb.mxu1 %v4973_v59 }
 0x678   :  { %2089 = vmatpush.msra.mxu3 %v5146_v41 }
 0x679   :  { %2162 = vmatpush.msrb.mxu0 %v5333_v8  ;;  %2182 = vmatpush.msrb.mxu1 %v6046_v3 }
 0x67a   :  { %2090 = vmatpush.msra.mxu3 %v6047_v40 }
 0x67b   :  { %2163 = vmatpush.msrb.mxu0 %v6048_v50  ;;  %2183 = vmatpush.msrb.mxu1 %v6049_v57 }
 0x67c   :  { %2091 = vmatpush.msra.mxu3 %v6050_v62 }
 0x67d   :  { %2164 = vmatpush.msrb.mxu0 %v6051_v63  ;;  %2184 = vmatpush.msrb.mxu1 %v6052_v23 }
 0x6da   :  { %v1847_v9 = vpop.f32.mrf.mxu0 }
 0x6db   :  { %v1848_v0 = vadd.f32 %v1847_v9, %v6053_v42 }
 0x6dd   :  { %v1893_v1 = vadd.f32 %v1891_v56, %v1848_v0  ;;  %v1867_v56 = vpop.f32.mrf.mxu1 }
 0x6df   :  { %v2684_v19 = vmul.f32 -1.442695, %v1893_v1 }
 0x6e0   :  { %v1827_v60 = vpop.f32.mrf.mxu3 }
 0x6e1   :  { %2790 = vpow2.f32 %v2684_v19  ;;  %v1828_v52 = vadd.f32 %v1827_v60, %v6054_v26 }
 0x6e3   :  { %v1870_v38 = vadd.f32 %v1828_v52, %v1809_v16  ;;  %v1868_v52 = vadd.f32 %v1867_v56, %v5375_v36 }
 0x6e5   :  { %v2683_v46 = vmul.f32 -1.442695, %v1870_v38 }
 0x6e7   :  { %v2791_v33 = vpop.eup %2790  ;;  %2792 = vpow2.f32 %v2683_v46 }
 0x6e8   :  { %v1897_v45 = vadd.f32 1.0, %v2791_v33 }
 0x6ea   :  { %2794 = vrcp.f32 %v1897_v45  ;;  %vm1903_vm15 = vweird.f32 %v1897_v45 }
 0x6ed   :  { %v2793_v30 = vpop.eup %2792 }
 0x6ee   :  { %v1874_v11 = vadd.f32 1.0, %v2793_v30  ;;  %v1914_v30 = vrot.slane %v1809_v16, 4  ;;  %v5445_v16 = vld [vmem:[%s5886_s5 + $0x170] sm:$0xff] }
 0x6f0   :  { %2796 = vrcp.f32 %v1874_v11  ;;  %v2795_v39 = vpop.eup %2794  ;;  %v1886_v61 = vand.u32 2147483648, %v1874_v11  ;;  %v1884_v0 = vand.u32 2147483647, %v1874_v11  ;;  %vm1880_vm11 = vweird.f32 %v1874_v11 }
 0x6f1   :  { %v1899_v28 = vmul.f32 %v2795_v39, %v1897_v45  ;;  %vm1904_vm14 = vweird.f32 %v2795_v39 }
 0x6f2   :  { %v1887_v60 = vor.u32 1.1754944e-38, %v1886_v61  ;;  %vm1885_vm13 = vcmp.eq.f32.partialorder %v1884_v0, 8.507059e+37  ;;  %vm1905_vm0 = vmor %vm1903_vm15, %vm1904_vm14 }
 0x6f3   :  { %v1900_v7 = vsub.f32 1.0, %v1899_v28  ;;  %v1909_v28 = vand.u32 2147483648, %v1897_v45 }
 0x6f5   :  { %v1901_v1 = vmul.f32 %v2795_v39, %v1900_v7  ;;  %v1910_v7 = vor.u32 1.1754944e-38, %v1909_v28 }
 0x6f6   :  { %v2797_v44 = vpop.eup %2796 }
 0x6f7   :  { %v1876_v6 = vmul.f32 %v2797_v44, %v1874_v11  ;;  %vm1881_vm10 = vweird.f32 %v2797_v44  ;;  %v1902_v33 = vadd.f32 %v2795_v39, %v1901_v1 }
 0x6f8   :  { %vm1882_vm12 = vmor %vm1880_vm11, %vm1881_vm10 }
 0x6f9   :  { %v1877_v32 = vsub.f32 1.0, %v1876_v6  ;;  %v1906_v26 = vsel %vm1905_vm0, %v2795_v39, %v1902_v33  ;;  %v5509_v39 = vld [vmem:[%s5886_s5 + $0xb0] sm:$0xff] }
 0x6fb   :  { %v1878_v9 = vmul.f32 %v2797_v44, %v1877_v32  ;;  %v1907_v32 = vand.u32 2147483647, %v1897_v45  ;;  %v5501_v45 = vld [vmem:[%s5886_s5 + $0xc8] sm:$0xff] }
 0x6fd   :  { %v1879_v19 = vadd.f32 %v2797_v44, %v1878_v9  ;;  %vm1908_vm1 = vcmp.eq.f32.partialorder %v1907_v32, 8.507059e+37 }
 0x6fe   :  { %v1911_v11 = vsel %vm1908_vm1, %v1910_v7, %v1906_v26  ;;  %v5493_v26 = vld [vmem:[%s5886_s5 + $0xe0] sm:$0xff] }
 0x6ff   :  { %v1883_v38 = vsel %vm1882_vm12, %v2797_v44, %v1879_v19  ;;  %v1918_v61 = vsub.f32 1.0, %v1911_v11  ;;  %v1920_v44 = vmul.f32 %v1911_v11, %v5378_v5  ;;  %v5453_v5 = vld [vmem:[%s5886_s5 + $0x158] sm:$0xff]  ;;  %v6056_v19 = vld [vmem:[#allocation12_spill] sm:$0xff] }
 0x700   :  { %v1888_v46 = vsel %vm1885_vm13, %v1887_v60, %v1883_v38 }
 0x701   :  { %v1913_v6 = vmul.f32 %v1888_v46, %v1868_v52 }
 0x703   :  { %v1916_v42 = vadd.f32 %v1914_v30, %v1913_v6 }
 0x705   :  { %2798 = vtanh.f32 %v1916_v42  ;;  %v5485_v42 = vld [vmem:[%s5886_s5 + $0xf8] sm:$0xff] }
 0x70b   :  { %v2799_v9 = vpop.eup %2798 }
 0x70c   :  { %v1919_v56 = vmul.f32 %v2799_v9, %v1918_v61 }
 0x70e   :  { %v5435_v0 = vadd.f32 %v1920_v44, %v1919_v56 }
 0x710   :  { %1939 = vmatmul.f32.vlgmr.msrb.gmra.mxu2 %v5435_v0  ;;  %1959 = vmatmul.f32.vlgmr.msrb.gmra.mxu3 %v5435_v0 }
 0x711   :  { %1979 = vmatmul.f32.vlgmr.msra.gmra.mxu0 %v5435_v0  ;;  %2189 = vmatpush.msrb.mxu2 %v5009_v15  ;;  %v5461_v15 = vld [vmem:[%s5886_s5 + $0x140] sm:$0xff] }
 0x712   :  { %2262 = vmatpush.msrb.mxu3 %v5179_v2  ;;  %2282 = vmatpush.msra.mxu0 %v5445_v16 }
 0x713   :  { %2190 = vmatpush.msrb.mxu2 %v5029_v55  ;;  %v5469_v55 = vld [vmem:[%s5886_s5 + $0x128] sm:$0xff] }
 0x714   :  { %2263 = vmatpush.msrb.mxu3 %v5190_v58  ;;  %2283 = vmatpush.msra.mxu0 %v5453_v5 }
 0x715   :  { %2191 = vmatpush.msrb.mxu2 %v5041_v47  ;;  %v5477_v47 = vld [vmem:[%s5886_s5 + $0x110] sm:$0xff] }
 0x716   :  { %2264 = vmatpush.msrb.mxu3 %v5200_v49  ;;  %2284 = vmatpush.msra.mxu0 %v5461_v15 }
 0x717   :  { %2192 = vmatpush.msrb.mxu2 %v5057_v21 }
 0x718   :  { %2265 = vmatpush.msrb.mxu3 %v5210_v17  ;;  %2285 = vmatpush.msra.mxu0 %v5469_v55 }
 0x719   :  { %2193 = vmatpush.msrb.mxu2 %v5067_v34 }
 0x71a   :  { %2266 = vmatpush.msrb.mxu3 %v5219_v51  ;;  %2286 = vmatpush.msra.mxu0 %v5477_v47 }
 0x71b   :  { %2194 = vmatpush.msrb.mxu2 %v5077_v37 }
 0x71c   :  { %2267 = vmatpush.msrb.mxu3 %v5228_v14  ;;  %2287 = vmatpush.msra.mxu0 %v5485_v42 }
 0x71d   :  { %2195 = vmatpush.msrb.mxu2 %v5086_v20 }
 0x71e   :  { %2268 = vmatpush.msrb.mxu3 %v5236_v25  ;;  %2288 = vmatpush.msra.mxu0 %v5493_v26 }
 0x71f   :  { %2196 = vmatpush.msrb.mxu2 %v5095_v35 }
 0x720   :  { %2269 = vmatpush.msrb.mxu3 %v5244_v31  ;;  %2289 = vmatpush.msra.mxu0 %v5501_v45 }
 0x721   :  { %2197 = vmatpush.msrb.mxu2 %v5104_v27 }
 0x722   :  { %2270 = vmatpush.msrb.mxu3 %v5252_v12  ;;  %2290 = vmatpush.msra.mxu0 %v5509_v39 }
 0x723   :  { %2198 = vmatpush.msrb.mxu2 %v5113_v53 }
 0x724   :  { %2271 = vmatpush.msrb.mxu3 %v5260_v13  ;;  %2291 = vmatpush.msra.mxu0 %v4918_v10  ;;  %v1922_v10 = vld [vmem:[#allocation3 + $0xc] sm:$0x3f] }
 0x725   :  { %2199 = vmatpush.msrb.mxu2 %v5120_v29 }
 0x726   :  { %2272 = vmatpush.msrb.mxu3 %v5268_v22  ;;  %2292 = vmatpush.msra.mxu0 %v4938_v4 }
 0x727   :  { %2200 = vmatpush.msrb.mxu2 %v5128_v43 }
 0x728   :  { %2273 = vmatpush.msrb.mxu3 %v5276_v24  ;;  %2293 = vmatpush.msra.mxu0 %v4955_v18 }
 0x729   :  { %2201 = vmatpush.msrb.mxu2 %v5137_v54 }
 0x72a   :  { %2274 = vmatpush.msrb.mxu3 %v5326_v48  ;;  %2294 = vmatpush.msra.mxu0 %v4973_v59  ;;  %v6055_v59 = vld [vmem:[#allocation11_spill] sm:$0xff] }
 0x72b   :  { %2202 = vmatpush.msrb.mxu2 %v5146_v41 }
 0x72c   :  { %2275 = vmatpush.msrb.mxu3 %v5333_v8  ;;  %2295 = vmatpush.msra.mxu0 %v6046_v3  ;;  %v2004_v3 = vrot.slane %v1922_v10, 2 }
 0x72d   :  { %2203 = vmatpush.msrb.mxu2 %v6047_v40 }
 0x72e   :  { %2276 = vmatpush.msrb.mxu3 %v6048_v50  ;;  %2296 = vmatpush.msra.mxu0 %v6049_v57 }
 0x72f   :  { %2204 = vmatpush.msrb.mxu2 %v6050_v62 }
 0x730   :  { %2277 = vmatpush.msrb.mxu3 %v6051_v63  ;;  %2297 = vmatpush.msra.mxu0 %v6052_v23 }
 0x793   :  { %v1940_v4 = vpop.f32.mrf.mxu2  ;;  %v1960_v18 = vpop.f32.mrf.mxu3 }
 0x794   :  { %v1941_v1 = vadd.f32 %v1940_v4, %v6055_v59  ;;  %v1961_v60 = vadd.f32 %v1960_v18, %v6056_v19  ;;  %v1980_v18 = vpop.f32.mrf.mxu0 }
 0x796   :  { %v1983_v52 = vadd.f32 %v1941_v1, %v1922_v10  ;;  %v2006_v38 = vadd.f32 %v2004_v3, %v1961_v60 }
 0x798   :  { %v2685_v46 = vmul.f32 -1.442695, %v1983_v52  ;;  %v2686_v33 = vmul.f32 -1.442695, %v2006_v38  ;;  %v1981_v52 = vadd.f32 %v1980_v18, %v5375_v36 }
 0x79a   :  { %2800 = vpow2.f32 %v2685_v46 }
 0x79b   :  { %2802 = vpow2.f32 %v2686_v33 }
 0x7a0   :  { %v2801_v57 = vpop.eup %2800 }
 0x7a1   :  { %v2803_v30 = vpop.eup %2802  ;;  %v1987_v28 = vadd.f32 1.0, %v2801_v57 }
 0x7a2   :  { %v2010_v6 = vadd.f32 1.0, %v2803_v30  ;;  %v2027_v30 = vrot.slane %v1922_v10, 4  ;;  %v5545_v10 = vld [vmem:[%s5886_s5 + $0x178] sm:$0xff] }
 0x7a3   :  { %2804 = vrcp.f32 %v1987_v28  ;;  %v1999_v9 = vand.u32 2147483648, %v1987_v28  ;;  %v1997_v4 = vand.u32 2147483647, %v1987_v28  ;;  %vm1993_vm3 = vweird.f32 %v1987_v28 }
 0x7a4   :  { %2806 = vrcp.f32 %v2010_v6  ;;  %vm2016_vm7 = vweird.f32 %v2010_v6 }
 0x7a5   :  { %v2000_v3 = vor.u32 1.1754944e-38, %v1999_v9  ;;  %vm1998_vm5 = vcmp.eq.f32.partialorder %v1997_v4, 8.507059e+37 }
 0x7a9   :  { %v2805_v23 = vpop.eup %2804 }
 0x7aa   :  { %v2807_v32 = vpop.eup %2806  ;;  %v1989_v7 = vmul.f32 %v2805_v23, %v1987_v28  ;;  %vm1994_vm2 = vweird.f32 %v2805_v23 }
 0x7ab   :  { %v2012_v11 = vmul.f32 %v2807_v32, %v2010_v6  ;;  %vm1995_vm4 = vmor %vm1993_vm3, %vm1994_vm2  ;;  %vm2017_vm6 = vweird.f32 %v2807_v32 }
 0x7ac   :  { %v1990_v61 = vsub.f32 1.0, %v1989_v7  ;;  %v2022_v7 = vand.u32 2147483648, %v2010_v6  ;;  %vm2018_vm8 = vmor %vm2016_vm7, %vm2017_vm6 }
 0x7ad   :  { %v2013_v56 = vsub.f32 1.0, %v2012_v11  ;;  %v2020_v11 = vand.u32 2147483647, %v2010_v6 }
 0x7ae   :  { %v1991_v44 = vmul.f32 %v2805_v23, %v1990_v61 }
 0x7af   :  { %v2014_v1 = vmul.f32 %v2807_v32, %v2013_v56  ;;  %v2023_v56 = vor.u32 1.1754944e-38, %v2022_v7  ;;  %vm2021_vm9 = vcmp.eq.f32.partialorder %v2020_v11, 8.507059e+37 }
 0x7b0   :  { %v1992_v60 = vadd.f32 %v2805_v23, %v1991_v44 }
 0x7b1   :  { %v2015_v33 = vadd.f32 %v2807_v32, %v2014_v1 }
 0x7b2   :  { %v1996_v38 = vsel %vm1995_vm4, %v2805_v23, %v1992_v60 }
 0x7b3   :  { %v2001_v46 = vsel %vm1998_vm5, %v2000_v3, %v1996_v38  ;;  %v2019_v19 = vsel %vm2018_vm8, %v2807_v32, %v2015_v33 }
 0x7b4   :  { %v2026_v57 = vmul.f32 %v2001_v46, %v1981_v52  ;;  %v2024_v28 = vsel %vm2021_vm9, %v2023_v56, %v2019_v19  ;;  %v5561_v19 = vld [vmem:[%s5886_s5 + $0x148] sm:$0xff] }
 0x7b5   :  { %v2031_v9 = vsub.f32 1.0, %v2024_v28  ;;  %v2033_v23 = vmul.f32 %v2024_v28, %v5435_v0  ;;  %v5553_v0 = vld [vmem:[%s5886_s5 + $0x160] sm:$0xff] }
 0x7b6   :  { %v2029_v61 = vadd.f32 %v2027_v30, %v2026_v57 }
 0x7b8   :  { %2808 = vtanh.f32 %v2029_v61 }
 0x7be   :  { %v2809_v44 = vpop.eup %2808 }
 0x7bf   :  { %v2032_v18 = vmul.f32 %v2809_v44, %v2031_v9 }
 0x7c1   :  { %v5537_v4 = vadd.f32 %v2033_v23, %v2032_v18 }
 0x7c3   :  { %2052 = vmatmul.f32.vlgmr.msra.gmra.mxu1 %v5537_v4  ;;  %2072 = vmatmul.f32.vlgmr.msra.gmra.mxu2 %v5537_v4 }
 0x7c4   :  { %2092 = vmatmul.f32.vlgmr.msra.gmra.mxu3 %v5537_v4  ;;  %2302 = vmatpush.msra.mxu1 %v5545_v10 }
 0x7c5   :  { %2375 = vmatpush.msra.mxu2 %v5179_v2  ;;  %2395 = vmatpush.msra.mxu3 %v5445_v16 }
 0x7c6   :  { %2303 = vmatpush.msra.mxu1 %v5553_v0 }
 0x7c7   :  { %2376 = vmatpush.msra.mxu2 %v5190_v58  ;;  %2396 = vmatpush.msra.mxu3 %v5453_v5 }
 0x7c8   :  { %2304 = vmatpush.msra.mxu1 %v5561_v19 }
 0x7c9   :  { %2377 = vmatpush.msra.mxu2 %v5200_v49  ;;  %2397 = vmatpush.msra.mxu3 %v5461_v15  ;;  %v6057_v49 = vld [vmem:[#allocation12_spill] sm:$0xff] }
 0x7ca   :  { %2305 = vmatpush.msra.mxu1 %v5057_v21  ;;  %v5589_v21 = vld [vmem:[%s5886_s5 + $0x98] sm:$0xff] }
 0x7cb   :  { %2378 = vmatpush.msra.mxu2 %v5210_v17  ;;  %2398 = vmatpush.msra.mxu3 %v5469_v55 }
 0x7cc   :  { %2306 = vmatpush.msra.mxu1 %v5067_v34  ;;  %v5597_v34 = vld [vmem:[%s5886_s5 + $0x80] sm:$0xff] }
 0x7cd   :  { %2379 = vmatpush.msra.mxu2 %v5219_v51  ;;  %2399 = vmatpush.msra.mxu3 %v5477_v47 }
 0x7ce   :  { %2307 = vmatpush.msra.mxu1 %v5077_v37  ;;  %v5605_v37 = vld [vmem:[%s5886_s5 + $0x68] sm:$0xff] }
 0x7cf   :  { %2380 = vmatpush.msra.mxu2 %v5228_v14  ;;  %2400 = vmatpush.msra.mxu3 %v5485_v42 }
 0x7d0   :  { %2308 = vmatpush.msra.mxu1 %v5086_v20  ;;  %v5613_v20 = vld [vmem:[%s5886_s5 + $0x50] sm:$0xff] }
 0x7d1   :  { %2381 = vmatpush.msra.mxu2 %v5236_v25  ;;  %2401 = vmatpush.msra.mxu3 %v5493_v26 }
 0x7d2   :  { %2309 = vmatpush.msra.mxu1 %v5095_v35  ;;  %v5621_v35 = vld [vmem:[%s5886_s5 + $0x38] sm:$0xff] }
 0x7d3   :  { %2382 = vmatpush.msra.mxu2 %v5244_v31  ;;  %2402 = vmatpush.msra.mxu3 %v5501_v45 }
 0x7d4   :  { %2310 = vmatpush.msra.mxu1 %v5104_v27  ;;  %v5629_v27 = vld [vmem:[%s5886_s5 + $0x20] sm:$0xff] }
 0x7d5   :  { %2383 = vmatpush.msra.mxu2 %v5252_v12  ;;  %2403 = vmatpush.msra.mxu3 %v5509_v39 }
 0x7d6   :  { %2311 = vmatpush.msra.mxu1 %v5113_v53  ;;  %v5637_v53 = vld [vmem:[%s5886_s5 + $0x8] sm:$0xff] }
 0x7d7   :  { %2384 = vmatpush.msra.mxu2 %v5260_v13  ;;  %2404 = vmatpush.msra.mxu3 %v5589_v21 }
 0x7d8   :  { %2312 = vmatpush.msra.mxu1 %v5120_v29 }
 0x7d9   :  { %2385 = vmatpush.msra.mxu2 %v5268_v22  ;;  %2405 = vmatpush.msra.mxu3 %v5597_v34 }
 0x7da   :  { %2313 = vmatpush.msra.mxu1 %v5128_v43 }
 0x7db   :  { %2386 = vmatpush.msra.mxu2 %v5276_v24  ;;  %2406 = vmatpush.msra.mxu3 %v5605_v37 }
 0x7dc   :  { %2314 = vmatpush.msra.mxu1 %v5137_v54  ;;  %v2035_v54 = vld [vmem:[#allocation3 + $0x12] sm:$0x3f] }
 0x7dd   :  { %2387 = vmatpush.msra.mxu2 %v5326_v48  ;;  %2407 = vmatpush.msra.mxu3 %v5613_v20  ;;  %v2117_v51 = vrot.slane %v2035_v54, 2  ;;  %v2140_v11 = vrot.slane %v2035_v54, 4 }
 0x7de   :  { %2315 = vmatpush.msra.mxu1 %v5146_v41 }
 0x7df   :  { %2388 = vmatpush.msra.mxu2 %v5333_v8  ;;  %2408 = vmatpush.msra.mxu3 %v5621_v35 }
 0x7e0   :  { %2316 = vmatpush.msra.mxu1 %v6047_v40 }
 0x7e1   :  { %2389 = vmatpush.msra.mxu2 %v6048_v50  ;;  %2409 = vmatpush.msra.mxu3 %v5629_v27 }
 0x7e2   :  { %2317 = vmatpush.msra.mxu1 %v6050_v62 }
 0x7e3   :  { %2390 = vmatpush.msra.mxu2 %v6051_v63  ;;  %2410 = vmatpush.msra.mxu3 %v5637_v53 }
 0x840   :  { %v2053_v29 = vpop.f32.mrf.mxu1 }
 0x841   :  { %v2054_v43 = vadd.f32 %v2053_v29, %v6055_v59 }
 0x843   :  { %v2096_v41 = vadd.f32 %v2054_v43, %v2035_v54 }
 0x845   :  { %v2687_v2 = vmul.f32 -1.442695, %v2096_v41 }
 0x846   :  { %v2073_v58 = vpop.f32.mrf.mxu2 }
 0x847   :  { %2810 = vpow2.f32 %v2687_v2  ;;  %v2074_v17 = vadd.f32 %v2073_v58, %v6057_v49  ;;  %v2093_v3 = vpop.f32.mrf.mxu3 }
 0x848   :  { %v2094_v57 = vadd.f32 %v2093_v3, %v5375_v36 }
 0x849   :  { %v2119_v14 = vadd.f32 %v2117_v51, %v2074_v17  ;;  %v2980_v51 = vld [vmem:[%s5886_s5 + $0x168] sm:$0xff] }
 0x84b   :  { %v2688_v25 = vmul.f32 -1.442695, %v2119_v14  ;;  %v2982_v14 = vld [vmem:[%s5886_s5 + $0x138] sm:$0xff] }
 0x84d   :  { %v2811_v31 = vpop.eup %2810  ;;  %2812 = vpow2.f32 %v2688_v25  ;;  %v5677_v25 = vld [vmem:[%s5886_s5 + $0x118] sm:$0xff] }
 0x84e   :  { %v2100_v12 = vadd.f32 1.0, %v2811_v31  ;;  %v5687_v31 = vld [vmem:[%s5886_s5 + $0x100] sm:$0xff] }
 0x850   :  { %2814 = vrcp.f32 %v2100_v12  ;;  %v2112_v6 = vand.u32 2147483648, %v2100_v12  ;;  %v2110_v1 = vand.u32 2147483647, %v2100_v12  ;;  %vm2106_vm11 = vweird.f32 %v2100_v12 }
 0x852   :  { %v2113_v46 = vor.u32 1.1754944e-38, %v2112_v6  ;;  %vm2111_vm13 = vcmp.eq.f32.partialorder %v2110_v1, 8.507059e+37  ;;  %v5757_v6 = vld [vmem:[%s5886_s5 + $0x58] sm:$0xff] }
 0x853   :  { %v2813_v13 = vpop.eup %2812 }
 0x854   :  { %v2123_v22 = vadd.f32 1.0, %v2813_v13  ;;  %v5707_v13 = vld [vmem:[%s5886_s5 + $0xd0] sm:$0xff] }
 0x856   :  { %v2815_v24 = vpop.eup %2814  ;;  %2816 = vrcp.f32 %v2123_v22  ;;  %v2135_v28 = vand.u32 2147483648, %v2123_v22  ;;  %v2133_v9 = vand.u32 2147483647, %v2123_v22  ;;  %vm2129_vm15 = vweird.f32 %v2123_v22 }
 0x857   :  { %v2102_v40 = vmul.f32 %v2815_v24, %v2100_v12  ;;  %vm2107_vm10 = vweird.f32 %v2815_v24  ;;  %v5697_v12 = vld [vmem:[%s5886_s5 + $0xe8] sm:$0xff] }
 0x858   :  { %vm2108_vm12 = vmor %vm2106_vm11, %vm2107_vm10  ;;  %v2136_v29 = vor.u32 1.1754944e-38, %v2135_v28  ;;  %vm2134_vm1 = vcmp.eq.f32.partialorder %v2133_v9, 8.507059e+37 }
 0x859   :  { %v2103_v62 = vsub.f32 1.0, %v2102_v40  ;;  %v5737_v40 = vld [vmem:[%s5886_s5 + $0x88] sm:$0xff] }
 0x85b   :  { %v2104_v32 = vmul.f32 %v2815_v24, %v2103_v62  ;;  %v5747_v62 = vld [vmem:[%s5886_s5 + $0x70] sm:$0xff] }
 0x85c   :  { %v2817_v60 = vpop.eup %2816 }
 0x85d   :  { %v2125_v52 = vmul.f32 %v2817_v60, %v2123_v22  ;;  %v2105_v38 = vadd.f32 %v2815_v24, %v2104_v32  ;;  %vm2130_vm14 = vweird.f32 %v2817_v60  ;;  %v5717_v22 = vld [vmem:[%s5886_s5 + $0xb8] sm:$0xff] }
 0x85e   :  { %vm2131_vm0 = vmor %vm2129_vm15, %vm2130_vm14 }
 0x85f   :  { %v2126_v33 = vsub.f32 1.0, %v2125_v52  ;;  %v2109_v30 = vsel %vm2108_vm12, %v2815_v24, %v2105_v38  ;;  %v5727_v24 = vld [vmem:[%s5886_s5 + $0xa0] sm:$0xff] }
 0x860   :  { %v2114_v7 = vsel %vm2111_vm13, %v2113_v46, %v2109_v30 }
 0x861   :  { %v2139_v61 = vmul.f32 %v2114_v7, %v2094_v57  ;;  %v2127_v56 = vmul.f32 %v2817_v60, %v2126_v33 }
 0x863   :  { %v2142_v44 = vadd.f32 %v2140_v11, %v2139_v61  ;;  %v2128_v18 = vadd.f32 %v2817_v60, %v2127_v56 }
 0x865   :  { %2818 = vtanh.f32 %v2142_v44  ;;  %v2132_v23 = vsel %vm2131_vm0, %v2817_v60, %v2128_v18 }
 0x866   :  { %v2137_v43 = vsel %vm2134_vm1, %v2136_v29, %v2132_v23 }
 0x867   :  { %v2144_v41 = vsub.f32 1.0, %v2137_v43  ;;  %v2146_v17 = vmul.f32 %v2137_v43, %v5537_v4  ;;  %v2981_v4 = vld [vmem:[%s5886_s5 + $0x150] sm:$0xff] }
 0x86b   :  { %v2819_v2 = vpop.eup %2818 }
 0x86c   :  { %v2145_v58 = vmul.f32 %v2819_v2, %v2144_v41 }
 0x86e   :  { %v5644_v54 = vadd.f32 %v2146_v17, %v2145_v58 }
 0x870   :  { %2165 = vmatmul.f32.vlgmr.msrb.gmra.mxu0 %v5644_v54  ;;  %2185 = vmatmul.f32.vlgmr.msrb.gmra.mxu1 %v5644_v54 }
 0x871   :  { %2205 = vmatmul.f32.vlgmr.msrb.gmra.mxu2 %v5644_v54  ;;  %2415 = vmatpush.msrb.mxu0 %v5545_v10 }
 0x872   :  { %2488 = vmatpush.msrb.mxu1 %v2980_v51  ;;  %2508 = vmatpush.msrb.mxu2 %v5445_v16  ;;  %v5667_v16 = vld [vmem:[%s5886_s5 + $0x130] sm:$0xff] }
 0x873   :  { %2416 = vmatpush.msrb.mxu0 %v5553_v0 }
 0x874   :  { %2489 = vmatpush.msrb.mxu1 %v2981_v4  ;;  %2509 = vmatpush.msrb.mxu2 %v5453_v5  ;;  %v2984_v5 = vld [vmem:[%s5886_s5 + $0x120] sm:$0xff] }
 0x875   :  { %2417 = vmatpush.msrb.mxu0 %v5561_v19 }
 0x876   :  { %2490 = vmatpush.msrb.mxu1 %v2982_v14  ;;  %2510 = vmatpush.msrb.mxu2 %v5461_v15  ;;  %v2986_v15 = vld [vmem:[%s5886_s5 + $0x108] sm:$0xff] }
 0x877   :  { %2418 = vmatpush.msrb.mxu0 %v5667_v16 }
 0x878   :  { %2491 = vmatpush.msrb.mxu1 %v2984_v5  ;;  %2511 = vmatpush.msrb.mxu2 %v5469_v55  ;;  %v2988_v55 = vld [vmem:[%s5886_s5 + $0xf0] sm:$0xff] }
 0x879   :  { %2419 = vmatpush.msrb.mxu0 %v5677_v25 }
 0x87a   :  { %2492 = vmatpush.msrb.mxu1 %v2986_v15  ;;  %2512 = vmatpush.msrb.mxu2 %v5477_v47  ;;  %v2990_v47 = vld [vmem:[%s5886_s5 + $0xd8] sm:$0xff] }
 0x87b   :  { %2420 = vmatpush.msrb.mxu0 %v5687_v31 }
 0x87c   :  { %2493 = vmatpush.msrb.mxu1 %v2988_v55  ;;  %2513 = vmatpush.msrb.mxu2 %v5485_v42  ;;  %v2992_v42 = vld [vmem:[%s5886_s5 + $0xc0] sm:$0xff] }
 0x87d   :  { %2421 = vmatpush.msrb.mxu0 %v5697_v12 }
 0x87e   :  { %2494 = vmatpush.msrb.mxu1 %v2990_v47  ;;  %2514 = vmatpush.msrb.mxu2 %v5493_v26  ;;  %v2994_v26 = vld [vmem:[%s5886_s5 + $0xa8] sm:$0xff] }
 0x87f   :  { %2422 = vmatpush.msrb.mxu0 %v5707_v13 }
 0x880   :  { %2495 = vmatpush.msrb.mxu1 %v2992_v42  ;;  %2515 = vmatpush.msrb.mxu2 %v5501_v45  ;;  %v2996_v45 = vld [vmem:[%s5886_s5 + $0x90] sm:$0xff] }
 0x881   :  { %2423 = vmatpush.msrb.mxu0 %v5717_v22 }
 0x882   :  { %2496 = vmatpush.msrb.mxu1 %v2994_v26  ;;  %2516 = vmatpush.msrb.mxu2 %v5509_v39  ;;  %v2998_v39 = vld [vmem:[%s5886_s5 + $0x78] sm:$0xff] }
 0x883   :  { %2424 = vmatpush.msrb.mxu0 %v5727_v24 }
 0x884   :  { %2497 = vmatpush.msrb.mxu1 %v2996_v45  ;;  %2517 = vmatpush.msrb.mxu2 %v5589_v21  ;;  %v3000_v21 = vld [vmem:[%s5886_s5 + $0x60] sm:$0xff] }
 0x885   :  { %2425 = vmatpush.msrb.mxu0 %v5737_v40 }
 0x886   :  { %2498 = vmatpush.msrb.mxu1 %v2998_v39  ;;  %2518 = vmatpush.msrb.mxu2 %v5597_v34  ;;  %v5765_v34 = vld [vmem:[%s5886_s5 + $0x40] sm:$0xff] }
 0x887   :  { %2426 = vmatpush.msrb.mxu0 %v5747_v62 }
 0x888   :  { %2499 = vmatpush.msrb.mxu1 %v3000_v21  ;;  %2519 = vmatpush.msrb.mxu2 %v5605_v37  ;;  %v5773_v37 = vld [vmem:[%s5886_s5 + $0x28] sm:$0xff] }
 0x889   :  { %2427 = vmatpush.msrb.mxu0 %v5757_v6 }
 0x88a   :  { %2500 = vmatpush.msrb.mxu1 %v5326_v48  ;;  %2520 = vmatpush.msrb.mxu2 %v5613_v20  ;;  %v5781_v48 = vld [vmem:[%s5886_s5 + $0x10] sm:$0xff] }
 0x88b   :  { %2428 = vmatpush.msrb.mxu0 %v5765_v34 }
 0x88c   :  { %2501 = vmatpush.msrb.mxu1 %v5333_v8  ;;  %2521 = vmatpush.msrb.mxu2 %v5621_v35  ;;  %v2148_v8 = vld [vmem:[#allocation3 + $0x18] sm:$0x3f] }
 0x88d   :  { %2429 = vmatpush.msrb.mxu0 %v5773_v37  ;;  %v2230_v1 = vrot.slane %v2148_v8, 2  ;;  %v2253_v51 = vrot.slane %v2148_v8, 4 }
 0x88e   :  { %2502 = vmatpush.msrb.mxu1 %v6048_v50  ;;  %2522 = vmatpush.msrb.mxu2 %v5629_v27 }
 0x88f   :  { %2430 = vmatpush.msrb.mxu0 %v5781_v48 }
 0x890   :  { %2503 = vmatpush.msrb.mxu1 %v6051_v63  ;;  %2523 = vmatpush.msrb.mxu2 %v5637_v53 }
 0x8ed   :  { %v2166_v20 = vpop.f32.mrf.mxu0  ;;  %v2186_v35 = vpop.f32.mrf.mxu1 }
 0x8ee   :  { %v2167_v32 = vadd.f32 %v2166_v20, %v6055_v59  ;;  %v2187_v50 = vadd.f32 %v2186_v35, %v6057_v49 }
 0x8f0   :  { %v2209_v27 = vadd.f32 %v2167_v32, %v2148_v8  ;;  %v2232_v60 = vadd.f32 %v2230_v1, %v2187_v50 }
 0x8f2   :  { %v2689_v3 = vmul.f32 -1.442695, %v2209_v27  ;;  %v2690_v52 = vmul.f32 -1.442695, %v2232_v60 }
 0x8f4   :  { %2820 = vpow2.f32 %v2689_v3  ;;  %v2206_v44 = vpop.f32.mrf.mxu2 }
 0x8f5   :  { %2822 = vpow2.f32 %v2690_v52  ;;  %v2207_v43 = vadd.f32 %v2206_v44, %v5375_v36 }
 0x8fa   :  { %v2821_v38 = vpop.eup %2820 }
 0x8fb   :  { %v2823_v46 = vpop.eup %2822  ;;  %v2213_v33 = vadd.f32 1.0, %v2821_v38 }
 0x8fc   :  { %v2236_v63 = vadd.f32 1.0, %v2823_v46 }
 0x8fd   :  { %2824 = vrcp.f32 %v2213_v33  ;;  %v2225_v56 = vand.u32 2147483648, %v2213_v33  ;;  %v2223_v9 = vand.u32 2147483647, %v2213_v33  ;;  %vm2219_vm3 = vweird.f32 %v2213_v33 }
 0x8fe   :  { %2826 = vrcp.f32 %v2236_v63  ;;  %v2248_v4 = vand.u32 2147483648, %v2236_v63  ;;  %vm2242_vm7 = vweird.f32 %v2236_v63  ;;  %v2246_v14 = vand.u32 2147483647, %v2236_v63 }
 0x8ff   :  { %v2226_v29 = vor.u32 1.1754944e-38, %v2225_v56  ;;  %vm2224_vm5 = vcmp.eq.f32.partialorder %v2223_v9, 8.507059e+37 }
 0x900   :  { %v2249_v55 = vor.u32 1.1754944e-38, %v2248_v4  ;;  %vm2247_vm9 = vcmp.eq.f32.partialorder %v2246_v14, 8.507059e+37 }
 0x903   :  { %v2825_v53 = vpop.eup %2824 }
 0x904   :  { %v2827_v57 = vpop.eup %2826  ;;  %v2215_v30 = vmul.f32 %v2825_v53, %v2213_v33  ;;  %vm2220_vm2 = vweird.f32 %v2825_v53 }
 0x905   :  { %v2238_v7 = vmul.f32 %v2827_v57, %v2236_v63  ;;  %vm2221_vm4 = vmor %vm2219_vm3, %vm2220_vm2  ;;  %vm2243_vm6 = vweird.f32 %v2827_v57 }
 0x906   :  { %v2216_v11 = vsub.f32 1.0, %v2215_v30  ;;  %vm2244_vm8 = vmor %vm2242_vm7, %vm2243_vm6 }
 0x907   :  { %v2239_v61 = vsub.f32 1.0, %v2238_v7 }
 0x908   :  { %v2217_v28 = vmul.f32 %v2825_v53, %v2216_v11 }
 0x909   :  { %v2240_v18 = vmul.f32 %v2827_v57, %v2239_v61 }
 0x90a   :  { %v2218_v23 = vadd.f32 %v2825_v53, %v2217_v28 }
 0x90b   :  { %v2241_v58 = vadd.f32 %v2827_v57, %v2240_v18 }
 0x90c   :  { %v2222_v41 = vsel %vm2221_vm4, %v2825_v53, %v2218_v23 }
 0x90d   :  { %v2227_v2 = vsel %vm2224_vm5, %v2226_v29, %v2222_v41  ;;  %v2245_v15 = vsel %vm2244_vm8, %v2827_v57, %v2241_v58 }
 0x90e   :  { %v2252_v17 = vmul.f32 %v2227_v2, %v2207_v43  ;;  %v2250_v47 = vsel %vm2247_vm9, %v2249_v55, %v2245_v15  ;;  %v2374_v43 = vld [vmem:[#allocation3 + $0x24] sm:$0x3f] }
 0x90f   :  { %v2257_v42 = vsub.f32 1.0, %v2250_v47  ;;  %v2259_v39 = vmul.f32 %v2250_v47, %v5644_v54 }
 0x910   :  { %v2255_v5 = vadd.f32 %v2253_v51, %v2252_v17  ;;  %v2456_v51 = vrot.slane %v2374_v43, 2 }
 0x912   :  { %2828 = vtanh.f32 %v2255_v5 }
 0x918   :  { %v2829_v26 = vpop.eup %2828 }
 0x919   :  { %v2258_v45 = vmul.f32 %v2829_v26, %v2257_v42 }
 0x91b   :  { %v5790_v21 = vadd.f32 %v2259_v39, %v2258_v45 }
 0x91d   :  { %2278 = vmatmul.f32.vlgmr.msrb.gmra.mxu3 %v5790_v21  ;;  %2298 = vmatmul.f32.vlgmr.msra.gmra.mxu0 %v5790_v21 }
 0x91e   :  { %2318 = vmatmul.f32.vlgmr.msra.gmra.mxu1 %v5790_v21  ;;  %2528 = vmatpush.msrb.mxu3 %v5545_v10  ;;  %v2261_v10 = vld [vmem:[#allocation3 + $0x1e] sm:$0x3f] }
 0x91f   :  { %v2343_v54 = vrot.slane %v2261_v10, 2  ;;  %v2366_v53 = vrot.slane %v2261_v10, 4 }
 0x920   :  { %2529 = vmatpush.msrb.mxu3 %v5553_v0 }
 0x922   :  { %2530 = vmatpush.msrb.mxu3 %v5561_v19 }
 0x924   :  { %2531 = vmatpush.msrb.mxu3 %v5667_v16 }
 0x926   :  { %2532 = vmatpush.msrb.mxu3 %v5677_v25 }
 0x928   :  { %2533 = vmatpush.msrb.mxu3 %v5687_v31 }
 0x92a   :  { %2534 = vmatpush.msrb.mxu3 %v5697_v12 }
 0x92c   :  { %2535 = vmatpush.msrb.mxu3 %v5707_v13 }
 0x92e   :  { %2536 = vmatpush.msrb.mxu3 %v5717_v22 }
 0x930   :  { %2537 = vmatpush.msrb.mxu3 %v5727_v24 }
 0x932   :  { %2538 = vmatpush.msrb.mxu3 %v5737_v40 }
 0x934   :  { %2539 = vmatpush.msrb.mxu3 %v5747_v62 }
 0x936   :  { %2540 = vmatpush.msrb.mxu3 %v5757_v6 }
 0x938   :  { %2541 = vmatpush.msrb.mxu3 %v5765_v34 }
 0x93a   :  { %2542 = vmatpush.msrb.mxu3 %v5773_v37 }
 0x93c   :  { %2543 = vmatpush.msrb.mxu3 %v5781_v48 }
 0x99a   :  { %v2299_v0 = vpop.f32.mrf.mxu0 }
 0x99b   :  { %v2300_v19 = vadd.f32 %v2299_v0, %v6057_v49  ;;  %v2319_v27 = vpop.f32.mrf.mxu1 }
 0x99c   :  { %v2320_v38 = vadd.f32 %v2319_v27, %v5375_v36 }
 0x99d   :  { %v2345_v16 = vadd.f32 %v2343_v54, %v2300_v19 }
 0x99f   :  { %v2692_v25 = vmul.f32 -1.442695, %v2345_v16 }
 0x9a0   :  { %v2279_v31 = vpop.f32.mrf.mxu3 }
 0x9a1   :  { %2830 = vpow2.f32 %v2692_v25  ;;  %v2280_v12 = vadd.f32 %v2279_v31, %v6055_v59 }
 0x9a3   :  { %v2322_v13 = vadd.f32 %v2280_v12, %v2261_v10 }
 0x9a5   :  { %v2691_v22 = vmul.f32 -1.442695, %v2322_v13 }
 0x9a7   :  { %v2831_v24 = vpop.eup %2830  ;;  %2832 = vpow2.f32 %v2691_v22 }
 0x9a8   :  { %v2349_v40 = vadd.f32 1.0, %v2831_v24 }
 0x9aa   :  { %2834 = vrcp.f32 %v2349_v40  ;;  %v2361_v57 = vand.u32 2147483648, %v2349_v40  ;;  %vm2355_vm15 = vweird.f32 %v2349_v40  ;;  %v2359_v7 = vand.u32 2147483647, %v2349_v40 }
 0x9ac   :  { %v2362_v56 = vor.u32 1.1754944e-38, %v2361_v57  ;;  %vm2360_vm1 = vcmp.eq.f32.partialorder %v2359_v7, 8.507059e+37  ;;  %v2610_v57 = vld [vmem:[%s5888_s7 + $0x50] sm:$0xff] }
 0x9ad   :  { %v2833_v62 = vpop.eup %2832 }
 0x9ae   :  { %v2326_v6 = vadd.f32 1.0, %v2833_v62 }
 0x9b0   :  { %2836 = vrcp.f32 %v2326_v6  ;;  %v2835_v34 = vpop.eup %2834  ;;  %v2338_v32 = vand.u32 2147483648, %v2326_v6  ;;  %v2336_v1 = vand.u32 2147483647, %v2326_v6  ;;  %vm2332_vm11 = vweird.f32 %v2326_v6 }
 0x9b1   :  { %v2351_v37 = vmul.f32 %v2835_v34, %v2349_v40  ;;  %vm2356_vm14 = vweird.f32 %v2835_v34 }
 0x9b2   :  { %v2339_v52 = vor.u32 1.1754944e-38, %v2338_v32  ;;  %vm2337_vm13 = vcmp.eq.f32.partialorder %v2336_v1, 8.507059e+37  ;;  %vm2357_vm0 = vmor %vm2355_vm15, %vm2356_vm14 }
 0x9b3   :  { %v2352_v20 = vsub.f32 1.0, %v2351_v37  ;;  %v2479_v37 = vrot.slane %v2374_v43, 4 }
 0x9b5   :  { %v2353_v60 = vmul.f32 %v2835_v34, %v2352_v20 }
 0x9b6   :  { %v2837_v48 = vpop.eup %2836 }
 0x9b7   :  { %v2328_v8 = vmul.f32 %v2837_v48, %v2326_v6  ;;  %vm2333_vm10 = vweird.f32 %v2837_v48  ;;  %v2354_v63 = vadd.f32 %v2835_v34, %v2353_v60 }
 0x9b8   :  { %vm2334_vm12 = vmor %vm2332_vm11, %vm2333_vm10 }
 0x9b9   :  { %v2329_v35 = vsub.f32 1.0, %v2328_v8  ;;  %v2358_v61 = vsel %vm2357_vm0, %v2835_v34, %v2354_v63  ;;  %v2612_v63 = vld [vmem:[%s5888_s7 + $0x60] sm:$0xff] }
 0x9ba   :  { %v2363_v28 = vsel %vm2360_vm1, %v2362_v56, %v2358_v61  ;;  %v2608_v61 = vld [vmem:[%s5888_s7 + $0x40] sm:$0xff]  ;;  %v2487_v56 = vld [vmem:[#allocation3 + $0x2a] sm:$0x3f] }
 0x9bb   :  { %v2330_v50 = vmul.f32 %v2837_v48, %v2329_v35  ;;  %v2370_v9 = vsub.f32 1.0, %v2363_v28  ;;  %v2372_v23 = vmul.f32 %v2363_v28, %v5790_v21 }
 0x9bd   :  { %v2331_v3 = vadd.f32 %v2837_v48, %v2330_v50 }
 0x9bf   :  { %v2335_v46 = vsel %vm2334_vm12, %v2837_v48, %v2331_v3 }
 0x9c0   :  { %v2340_v33 = vsel %vm2337_vm13, %v2339_v52, %v2335_v46  ;;  %v2614_v46 = vld [vmem:[%s5888_s7 + $0x70] sm:$0xff] }
 0x9c1   :  { %v2365_v30 = vmul.f32 %v2340_v33, %v2320_v38  ;;  %v2615_v38 = vld [vmem:[%s5888_s7 + $0x78] sm:$0xff]  ;;  %v2613_v33 = vld [vmem:[%s5888_s7 + $0x68] sm:$0xff] }
 0x9c2   :  { %2620 = vmatpush.msra.mxu0 %v2615_v38 }
 0x9c3   :  { %v2368_v11 = vadd.f32 %v2366_v53, %v2365_v30  ;;  %v2611_v53 = vld [vmem:[%s5888_s7 + $0x58] sm:$0xff]  ;;  %v2609_v30 = vld [vmem:[%s5888_s7 + $0x48] sm:$0xff] }
 0x9c4   :  { %2621 = vmatpush.msra.mxu0 %v2614_v46 }
 0x9c5   :  { %2838 = vtanh.f32 %v2368_v11 }
 0x9c6   :  { %2622 = vmatpush.msra.mxu0 %v2613_v33 }
 0x9c8   :  { %2623 = vmatpush.msra.mxu0 %v2612_v63 }
 0x9ca   :  { %2624 = vmatpush.msra.mxu0 %v2611_v53 }
 0x9cb   :  { %v2839_v44 = vpop.eup %2838 }
 0x9cc   :  { %v2371_v18 = vmul.f32 %v2839_v44, %v2370_v9  ;;  %2625 = vmatpush.msra.mxu0 %v2610_v57  ;;  %v2607_v9 = vld [vmem:[%s5888_s7 + $0x38] sm:$0xff] }
 0x9ce   :  { %v2373_v29 = vadd.f32 %v2372_v23, %v2371_v18  ;;  %2626 = vmatpush.msra.mxu0 %v2609_v30  ;;  %v2606_v18 = vld [vmem:[%s5888_s7 + $0x30] sm:$0xff] }
 0x9d0   :  { %2391 = vmatmul.f32.vlgmr.msra.gmra.mxu2 %v2373_v29  ;;  %2411 = vmatmul.f32.vlgmr.msra.gmra.mxu3 %v2373_v29 }
 0x9d1   :  { %2431 = vmatmul.f32.vlgmr.msrb.gmra.mxu0 %v2373_v29 }
 0x9d2   :  { %2627 = vmatpush.msra.mxu0 %v2608_v61 }
 0x9d4   :  { %2628 = vmatpush.msra.mxu0 %v2607_v9 }
 0x9d6   :  { %2629 = vmatpush.msra.mxu0 %v2606_v18 }
 0xa4e   :  { %v2432_v31 = vpop.f32.mrf.mxu0 }
 0xa4f   :  { %v2433_v24 = vadd.f32 %v2432_v31, %v5375_v36 }
 0xa53   :  { %v2392_v41 = vpop.f32.mrf.mxu2  ;;  %v2412_v2 = vpop.f32.mrf.mxu3 }
 0xa54   :  { %v2393_v58 = vadd.f32 %v2392_v41, %v6055_v59  ;;  %v2413_v17 = vadd.f32 %v2412_v2, %v6057_v49  ;;  %v2604_v41 = vld [vmem:[%s5888_s7 + $0x20] sm:$0xff] }
 0xa56   :  { %v2435_v4 = vadd.f32 %v2393_v58, %v2374_v43  ;;  %v2458_v14 = vadd.f32 %v2456_v51, %v2413_v17  ;;  %v2569_v43 = vrot.slane %v2487_v56, 2  ;;  %v2603_v58 = vld [vmem:[%s5888_s7 + $0x18] sm:$0xff]  ;;  %v2602_v51 = vld [vmem:[%s5888_s7 + $0x10] sm:$0xff] }
 0xa58   :  { %v2693_v5 = vmul.f32 -1.442695, %v2435_v4  ;;  %v2694_v15 = vmul.f32 -1.442695, %v2458_v14 }
 0xa5a   :  { %2840 = vpow2.f32 %v2693_v5  ;;  %v2600_v5 = vld [vmem:[%s5888_s7] sm:$0xff] }
 0xa5b   :  { %2842 = vpow2.f32 %v2694_v15 }
 0xa60   :  { %v2841_v55 = vpop.eup %2840 }
 0xa61   :  { %v2843_v47 = vpop.eup %2842  ;;  %v2439_v42 = vadd.f32 1.0, %v2841_v55 }
 0xa62   :  { %v2462_v26 = vadd.f32 1.0, %v2843_v47 }
 0xa63   :  { %2844 = vrcp.f32 %v2439_v42  ;;  %v2451_v19 = vand.u32 2147483648, %v2439_v42  ;;  %v2449_v25 = vand.u32 2147483647, %v2439_v42  ;;  %vm2445_vm3 = vweird.f32 %v2439_v42 }
 0xa64   :  { %2846 = vrcp.f32 %v2462_v26  ;;  %v2474_v48 = vand.u32 2147483648, %v2462_v26  ;;  %vm2468_vm7 = vweird.f32 %v2462_v26  ;;  %v2472_v8 = vand.u32 2147483647, %v2462_v26 }
 0xa65   :  { %v2452_v22 = vor.u32 1.1754944e-38, %v2451_v19  ;;  %vm2450_vm5 = vcmp.eq.f32.partialorder %v2449_v25, 8.507059e+37 }
 0xa66   :  { %v2475_v32 = vor.u32 1.1754944e-38, %v2474_v48  ;;  %vm2473_vm9 = vcmp.eq.f32.partialorder %v2472_v8, 8.507059e+37 }
 0xa69   :  { %v2845_v45 = vpop.eup %2844 }
 0xa6a   :  { %v2847_v39 = vpop.eup %2846  ;;  %v2441_v21 = vmul.f32 %v2845_v45, %v2439_v42  ;;  %vm2446_vm2 = vweird.f32 %v2845_v45 }
 0xa6b   :  { %v2464_v10 = vmul.f32 %v2847_v39, %v2462_v26  ;;  %vm2447_vm4 = vmor %vm2445_vm3, %vm2446_vm2  ;;  %vm2469_vm6 = vweird.f32 %v2847_v39  ;;  %vm2640_vm2 = vcmask 25600  }
 0xa6c   :  { %v2442_v0 = vsub.f32 1.0, %v2441_v21  ;;  %vm2470_vm8 = vmor %vm2468_vm7, %vm2469_vm6 }
 0xa6d   :  { %v2465_v54 = vsub.f32 1.0, %v2464_v10 }
 0xa6e   :  { %v2443_v16 = vmul.f32 %v2845_v45, %v2442_v0 }
 0xa6f   :  { %v2466_v12 = vmul.f32 %v2847_v39, %v2465_v54 }
 0xa70   :  { %v2444_v13 = vadd.f32 %v2845_v45, %v2443_v16 }
 0xa71   :  { %v2467_v6 = vadd.f32 %v2847_v39, %v2466_v12 }
 0xa72   :  { %v2448_v40 = vsel %vm2447_vm4, %v2845_v45, %v2444_v13 }
 0xa73   :  { %v2453_v62 = vsel %vm2450_vm5, %v2452_v22, %v2448_v40  ;;  %v2471_v35 = vsel %vm2470_vm8, %v2847_v39, %v2467_v6  ;;  %v2592_v22 = vrot.slane %v2487_v56, 4 }
 0xa74   :  { %v2478_v34 = vmul.f32 %v2453_v62, %v2433_v24  ;;  %v2476_v50 = vsel %vm2473_vm9, %v2475_v32, %v2471_v35 }
 0xa75   :  { %v2483_v1 = vsub.f32 1.0, %v2476_v50  ;;  %v2485_v3 = vmul.f32 %v2476_v50, %v2373_v29 }
 0xa76   :  { %v2481_v20 = vadd.f32 %v2479_v37, %v2478_v34 }
 0xa78   :  { %2848 = vtanh.f32 %v2481_v20 }
 0xa7e   :  { %v2849_v27 = vpop.eup %2848 }
 0xa7f   :  { %v2484_v60 = vmul.f32 %v2849_v27, %v2483_v1  ;;  %v2699_v27 = vld [vmem:[%s5889_s8] ss:$0 sm:$0xff] }
 0xa81   :  { %v5818_v52 = vadd.f32 %v2485_v3, %v2484_v60 }
 0xa83   :  { %2504 = vmatmul.f32.vlgmr.msrb.gmra.mxu1 %v5818_v52  ;;  %2524 = vmatmul.f32.vlgmr.msrb.gmra.mxu2 %v5818_v52 }
 0xa84   :  { %2544 = vmatmul.f32.vlgmr.msrb.gmra.mxu3 %v5818_v52 }
 0xb00   :  { %v2505_v7 = vpop.f32.mrf.mxu1 }
 0xb01   :  { %v2506_v11 = vadd.f32 %v2505_v7, %v6055_v59  ;;  %v2605_v59 = vld [vmem:[%s5888_s7 + $0x28] sm:$0xff] }
 0xb02   :  { %2630 = vmatpush.msra.mxu0 %v2605_v59 }
 0xb03   :  { %v2548_v28 = vadd.f32 %v2506_v11, %v2487_v56 }
 0xb04   :  { %2631 = vmatpush.msra.mxu0 %v2604_v41 }
 0xb05   :  { %v2695_v44 = vmul.f32 -1.442695, %v2548_v28 }
 0xb06   :  { %v2525_v23 = vpop.f32.mrf.mxu2  ;;  %2632 = vmatpush.msra.mxu0 %v2603_v58 }
 0xb07   :  { %2850 = vpow2.f32 %v2695_v44  ;;  %v2526_v29 = vadd.f32 %v2525_v23, %v6057_v49  ;;  %v2601_v49 = vld [vmem:[%s5888_s7 + $0x8] sm:$0xff]  ;;  %v2545_v0 = vpop.f32.mrf.mxu3 }
 0xb08   :  { %2633 = vmatpush.msra.mxu0 %v2602_v51  ;;  %v2546_v31 = vadd.f32 %v2545_v0, %v5375_v36 }
 0xb09   :  { %v2571_v2 = vadd.f32 %v2569_v43, %v2526_v29 }
 0xb0a   :  { %2634 = vmatpush.msra.mxu0 %v2601_v49 }
 0xb0b   :  { %v2696_v17 = vmul.f32 -1.442695, %v2571_v2 }
 0xb0c   :  { %2635 = vmatpush.msra.mxu0 %v2600_v5 }
 0xb0d   :  { %v2851_v4 = vpop.eup %2850  ;;  %2852 = vpow2.f32 %v2696_v17 }
 0xb0e   :  { %v2552_v14 = vadd.f32 1.0, %v2851_v4 }
 0xb10   :  { %2854 = vrcp.f32 %v2552_v14  ;;  %v2564_v45 = vand.u32 2147483648, %v2552_v14  ;;  %v2562_v21 = vand.u32 2147483647, %v2552_v14  ;;  %vm2558_vm11 = vweird.f32 %v2552_v14 }
 0xb12   :  { %v2565_v16 = vor.u32 1.1754944e-38, %v2564_v45  ;;  %vm2563_vm13 = vcmp.eq.f32.partialorder %v2562_v21, 8.507059e+37 }
 0xb13   :  { %v2853_v15 = vpop.eup %2852 }
 0xb14   :  { %v2575_v55 = vadd.f32 1.0, %v2853_v15 }
 0xb16   :  { %v2855_v47 = vpop.eup %2854  ;;  %2856 = vrcp.f32 %v2575_v55  ;;  %v2587_v62 = vand.u32 2147483648, %v2575_v55  ;;  %v2585_v6 = vand.u32 2147483647, %v2575_v55  ;;  %vm2581_vm15 = vweird.f32 %v2575_v55 }
 0xb17   :  { %v2554_v42 = vmul.f32 %v2855_v47, %v2552_v14  ;;  %vm2559_vm10 = vweird.f32 %v2855_v47 }
 0xb18   :  { %vm2560_vm12 = vmor %vm2558_vm11, %vm2559_vm10  ;;  %v2588_v8 = vor.u32 1.1754944e-38, %v2587_v62  ;;  %vm2586_vm1 = vcmp.eq.f32.partialorder %v2585_v6, 8.507059e+37 }
 0xb19   :  { %v2555_v26 = vsub.f32 1.0, %v2554_v42 }
 0xb1b   :  { %v2556_v39 = vmul.f32 %v2855_v47, %v2555_v26 }
 0xb1c   :  { %v2857_v10 = vpop.eup %2856 }
 0xb1d   :  { %v2577_v19 = vmul.f32 %v2857_v10, %v2575_v55  ;;  %v2557_v54 = vadd.f32 %v2855_v47, %v2556_v39  ;;  %vm2582_vm14 = vweird.f32 %v2857_v10 }
 0xb1e   :  { %vm2583_vm0 = vmor %vm2581_vm15, %vm2582_vm14 }
 0xb1f   :  { %v2578_v25 = vsub.f32 1.0, %v2577_v19  ;;  %v2561_v12 = vsel %vm2560_vm12, %v2855_v47, %v2557_v54 }
 0xb20   :  { %v2566_v13 = vsel %vm2563_vm13, %v2565_v16, %v2561_v12 }
 0xb21   :  { %v2591_v24 = vmul.f32 %v2566_v13, %v2546_v31  ;;  %v2579_v40 = vmul.f32 %v2857_v10, %v2578_v25 }
 0xb23   :  { %v2594_v34 = vadd.f32 %v2592_v22, %v2591_v24  ;;  %v2580_v37 = vadd.f32 %v2857_v10, %v2579_v40 }
 0xb25   :  { %2858 = vtanh.f32 %v2594_v34  ;;  %v2584_v48 = vsel %vm2583_vm0, %v2857_v10, %v2580_v37 }
 0xb26   :  { %v2589_v20 = vsel %vm2586_vm1, %v2588_v8, %v2584_v48 }
 0xb27   :  { %v2596_v35 = vsub.f32 1.0, %v2589_v20  ;;  %v2598_v50 = vmul.f32 %v2589_v20, %v5818_v52 }
 0xb2b   :  { %v2859_v36 = vpop.eup %2858 }
 0xb2c   :  { %v2597_v32 = vmul.f32 %v2859_v36, %v2596_v35 }
 0xb2e   :  { %v2599_v1 = vadd.f32 %v2598_v50, %v2597_v32 }
 0xb30   :  { %2636 = vmatmul.f32.vlgmr.msra.gmra.mxu0 %v2599_v1 }
 0xbad   :  { %v2637_v60 = vpop.f32.mrf.mxu0 }
 0xbae   :  { %v2638_v3 = vadd.f32 %v2699_v27, %v2637_v60 }
 0xbb0   :  { %2641 = vst.msk [vmem:[#allocation4] sm:$0x3] %vm2640_vm2, %v2638_v3 }
 0xbb1   :  { %2652 = dma.vmem_to_hbm [thread:$0]  %s2648_s22, 32, %s2650_s2, [#allocation5]  }
 0xbb2   :  { %3029 = dma.done.wait [#allocation5], 32  }
 0xbb3   :  { %3030 = vsyncadd [#allocation5], 4294967264 }
 0xbb4   :  { %2657 = vsyncpa [#allocation5], 1 }

</bundles_post_ra>
